<compile_context>
chip_gen: v7x
topology: tpu7x:2x2x1
jax: 0.10.0
libtpu: 0.0.40
codegen_flags: <defaults>
</compile_context>

<pallas_src>
import functools

import jax
import jax.numpy as jnp
from jax.experimental import pallas as pl
from jax.experimental.pallas import tpu as pltpu


def _round_up(x, m):
    return (x + m - 1) // m * m


def _pad2d(a, shape):
    if tuple(a.shape) == tuple(shape):
        return a
    return jnp.pad(a, [(0, t - s) for s, t in zip(a.shape, shape)])


def _vmem_limit_bytes():
    # Leave headroom for compiler scratch / double buffers:
    # v7x (64 MiB physical) -> ~48 MiB; v5e/v6e (128 MiB) -> 112 MiB.
    try:
        cap = int(pltpu.get_tpu_info().vmem_capacity_bytes)
    except Exception:
        cap = 64 * 1024 * 1024  # conservative fallback
    return int(min(max(cap - 16 * 1024 * 1024, 32 * 1024 * 1024),
                   112 * 1024 * 1024))


# --------------------------------------------------------------------------
# Stage 1: avg-pool + backbone linear + projection Linear1 + BN partial stats
# grid = (crop "parallel", row_tile "arbitrary")
# --------------------------------------------------------------------------
def _stage1_kernel(x_ref, wf_ref, bf_ref, w1_ref, b1_ref,
                   h_ref, sum_ref, sq_ref, *, true_b, row_tile, inv_hw):
    i = pl.program_id(1)

    @pl.when(i == 0)
    def _():
        sum_ref[...] = jnp.zeros_like(sum_ref)
        sq_ref[...] = jnp.zeros_like(sq_ref)

    # backbone stand-in: global average pool over HW, then Linear (MXU).
    pooled = jnp.sum(x_ref[...].astype(jnp.float32), axis=-1) * inv_hw
    feat = jnp.dot(pooled.astype(jnp.bfloat16), wf_ref[...],
                   preferred_element_type=jnp.float32) + bf_ref[...]
    # projection head Linear 1 (pre-BatchNorm activations)
    h = jnp.dot(feat.astype(jnp.bfloat16), w1_ref[...],
                preferred_element_type=jnp.float32) + b1_ref[...]
    h_ref[...] = h.astype(h_ref.dtype)

    # per-crop partial BatchNorm statistics; batch-padding rows masked out.
    row = i * row_tile + jax.lax.broadcasted_iota(jnp.int32, (row_tile, 1), 0)
    hm = jnp.where(row < true_b, h, 0.0)
    sum_ref[...] += jnp.sum(hm, axis=0, keepdims=True)
    sq_ref[...] += jnp.sum(hm * hm, axis=0, keepdims=True)


# --------------------------------------------------------------------------
# Stage 2: BN apply -> ReLU -> Linear2 -> L2 normalize -> prototypes matmul
# grid = (row_tile,)   all "parallel", full-width lane-dense stores
# --------------------------------------------------------------------------
def _stage2_kernel(h_ref, scale_ref, shift_ref, w2_ref, b2_ref, wp_ref,
                   emb_ref, logit_ref):
    h = jnp.maximum(h_ref[...].astype(jnp.float32) * scale_ref[...]
                    + shift_ref[...], 0.0)
    z = jnp.dot(h.astype(jnp.bfloat16), w2_ref[...],
                preferred_element_type=jnp.float32) + b2_ref[...]
    # F.normalize(p=2, dim=1, eps=1e-12): x / max(||x||, eps)
    inv = jax.lax.rsqrt(
        jnp.maximum(jnp.sum(z * z, axis=1, keepdims=True), 1e-24))
    z = z * inv
    emb_ref[...] = z
    logit_ref[...] = jnp.dot(z.astype(jnp.bfloat16), wp_ref[...],
                             preferred_element_type=jnp.float32)


@functools.partial(jax.jit, static_argnames=("row_tile",))
def swav_forward(x0, x1, params, row_tile=128):
    """SwAV.forward((x0, x1)) -> (embedding, prototype_scores)."""
    wf, bf, w1, b1, gamma, beta, w2, b2, wp = params
    B, C, H, W = x0.shape
    HW = H * W
    D = wf.shape[1]
    Hm = w1.shape[1]
    P = w2.shape[1]
    K = wp.shape[1]

    # lane-dense padded sizes
    D_p = _round_up(D, 128)
    Hm_p = _round_up(Hm, 128)
    P_p = _round_up(P, 128)
    K_p = _round_up(K, 128)
    B_p = _round_up(B, row_tile)
    N_p = 2 * B_p
    n_row_tiles = B_p // row_tile

    bf16 = jnp.bfloat16
    eps = 1e-5

    # stacked crops: (2, B_p, C, HW); no repeat-folded pool weight.
    x = jnp.stack([x0.reshape(B, C, HW), x1.reshape(B, C, HW)], axis=0)
    x = jnp.pad(x, ((0, 0), (0, B_p - B), (0, 0), (0, 0))).astype(bf16)

    wfp = _pad2d(wf, (C, D_p)).astype(bf16)
    bfp = _pad2d(bf.reshape(1, D), (1, D_p)).astype(jnp.float32)
    w1p = _pad2d(w1, (D_p, Hm_p)).astype(bf16)
    b1p = _pad2d(b1.reshape(1, Hm), (1, Hm_p)).astype(jnp.float32)
    gp = _pad2d(gamma.reshape(1, Hm), (1, Hm_p)).astype(jnp.float32)
    betap = _pad2d(beta.reshape(1, Hm), (1, Hm_p)).astype(jnp.float32)
    w2p = _pad2d(w2, (Hm_p, P_p)).astype(bf16)
    b2p = _pad2d(b2.reshape(1, P), (1, P_p)).astype(jnp.float32)
    wpp = _pad2d(wp, (P_p, K_p)).astype(bf16)

    vmem_limit = _vmem_limit_bytes()
    const = dict(pipeline_mode=pl.Buffered(1))  # resident, single-buffered

    # ---- Stage 1 -----------------------------------------------------------
    stage1 = pl.pallas_call(
        functools.partial(_stage1_kernel, true_b=B, row_tile=row_tile,
                          inv_hw=1.0 / HW),
        grid=(2, n_row_tiles),
        in_specs=[
            pl.BlockSpec((None, row_tile, C, HW), lambda c, i: (c, i, 0, 0)),
            pl.BlockSpec((C, D_p), lambda c, i: (0, 0), **const),
            pl.BlockSpec((1, D_p), lambda c, i: (0, 0), **const),
            pl.BlockSpec((D_p, Hm_p), lambda c, i: (0, 0), **const),
            pl.BlockSpec((1, Hm_p), lambda c, i: (0, 0), **const),
        ],
        out_specs=(
            pl.BlockSpec((row_tile, Hm_p),
                         lambda c, i: (c * n_row_tiles + i, 0)),
            pl.BlockSpec((None, 1, Hm_p), lambda c, i: (c, 0, 0)),
            pl.BlockSpec((None, 1, Hm_p), lambda c, i: (c, 0, 0)),
        ),
        out_shape=(
            jax.ShapeDtypeStruct((N_p, Hm_p), bf16),          # pre-BN h
            jax.ShapeDtypeStruct((2, 1, Hm_p), jnp.float32),  # per-crop sum
            jax.ShapeDtypeStruct((2, 1, Hm_p), jnp.float32),  # per-crop sum-sq
        ),
        compiler_params=pltpu.CompilerParams(
            dimension_semantics=("parallel", "arbitrary"),
            vmem_limit_bytes=vmem_limit),
        cost_estimate=pl.CostEstimate(
            flops=2 * N_p * (C * D_p + D_p * Hm_p) + N_p * C * HW,
            transcendentals=0,
            bytes_accessed=(N_p * C * HW * 2 + C * D_p * 2 + D_p * Hm_p * 2
                            + N_p * Hm_p * 2)),
    )
    h_all, psum, psq = stage1(x, wfp, bfp, w1p, b1p)

    # BN finalize (training-mode batch stats, biased variance) folded with the
    # affine params into per-feature scale/shift -- tiny (1, Hm_p) JAX math.
    n = jnp.float32(2 * B)
    mu = (psum[0] + psum[1]) / n
    var = jnp.maximum((psq[0] + psq[1]) / n - mu * mu, 0.0)
    bn_scale = gp * jax.lax.rsqrt(var + eps)
    bn_shift = betap - mu * bn_scale

    # ---- Stage 2 -----------------------------------------------------------
    stage2 = pl.pallas_call(
        _stage2_kernel,
        grid=(N_p // row_tile,),
        in_specs=[
            pl.BlockSpec((row_tile, Hm_p), lambda i: (i, 0)),
            pl.BlockSpec((1, Hm_p), lambda i: (0, 0), **const),
            pl.BlockSpec((1, Hm_p), lambda i: (0, 0), **const),
            pl.BlockSpec((Hm_p, P_p), lambda i: (0, 0), **const),
            pl.BlockSpec((1, P_p), lambda i: (0, 0), **const),
            pl.BlockSpec((P_p, K_p), lambda i: (0, 0), **const),
        ],
        out_specs=(
            pl.BlockSpec((row_tile, P_p), lambda i: (i, 0)),
            pl.BlockSpec((row_tile, K_p), lambda i: (i, 0)),
        ),
        out_shape=(
            jax.ShapeDtypeStruct((N_p, P_p), jnp.float32),    # embedding
            jax.ShapeDtypeStruct((N_p, K_p), jnp.float32),    # prototype logits
        ),
        compiler_params=pltpu.CompilerParams(
            dimension_semantics=("parallel",),
            vmem_limit_bytes=vmem_limit),
        cost_estimate=pl.CostEstimate(
            flops=2 * N_p * (Hm_p * P_p + P_p * K_p),
            transcendentals=N_p,
            bytes_accessed=(N_p * Hm_p * 2 + Hm_p * P_p * 2 + P_p * K_p * 2
                            + N_p * (P_p + K_p) * 4)),
    )
    emb_p, logit_p = stage2(h_all, bn_scale, bn_shift, w2p, b2p, wpp)

    # strip batch/feature padding and restore [crop0; crop1] row ordering
    emb = jnp.concatenate([emb_p[:B, :P], emb_p[B_p:B_p + B, :P]], axis=0)
    logits = jnp.concatenate([logit_p[:B, :K], logit_p[B_p:B_p + B, :K]],
                             axis=0)
    return emb, logits


def make_params(key, C, feat_dim, hidden_mlp, output_dim, nmb_prototypes):
    ks = jax.random.split(key, 9)
    wf = jax.random.normal(ks[0], (C, feat_dim), jnp.float32) * 0.1
    bf = jax.random.normal(ks[1], (1, feat_dim), jnp.float32) * 0.1
    w1 = jax.random.normal(ks[2], (feat_dim, hidden_mlp), jnp.float32) * 0.1
    b1 = jax.random.normal(ks[3], (1, hidden_mlp), jnp.float32) * 0.1
    gamma = jnp.ones((1, hidden_mlp), jnp.float32)
    beta = jnp.zeros((1, hidden_mlp), jnp.float32)
    w2 = jax.random.normal(ks[4], (hidden_mlp, output_dim), jnp.float32) * 0.1
    b2 = jax.random.normal(ks[5], (1, output_dim), jnp.float32) * 0.1
    # PyTorch prototypes weight is (K, P); kernel consumes its transpose (P, K).
    wp = jax.random.normal(ks[6], (output_dim, nmb_prototypes), jnp.float32) * 0.1
    return (wf, bf, w1, b1, gamma, beta, w2, b2, wp)


if __name__ == "__main__":
    key = jax.random.PRNGKey(0)
    k_x0, k_x1, k_p = jax.random.split(key, 3)

    # small shapes consistent with the module:
    #   two crops (batch=2, channels=4, spatial=16), scaled-down head dims
    B, C, H, W = 2, 4, 16, 16
    feat_dim = 32          # stands in for final_feat_dim=512
    hidden_mlp = 32        # stands in for 2048
    output_dim = 16        # stands in for 128
    nmb_prototypes = 24    # stands in for 3000

    x0 = jax.random.normal(k_x0, (B, C, H, W), jnp.float32)
    x1 = jax.random.normal(k_x1, (B, C, H, W), jnp.float32)
    params = make_params(k_p, C, feat_dim, hidden_mlp, output_dim,
                         nmb_prototypes)

    emb, logits = swav_forward(x0, x1, params)
    jax.block_until_ready((emb, logits))

    assert emb.shape == (2 * B, output_dim)
    assert logits.shape == (2 * B, nmb_prototypes)
    print("KERNEL_OK")
</pallas_src>

<mosaic_0001>
module attributes {stable_mosaic.version = 11 : i64} {
  func.func @_stage1_kernel(%arg0: i32, %arg1: i32, %arg2: memref<1x128x4x256xbf16, #tpu.memory_space<vmem>>, %arg3: memref<4x128xbf16, #tpu.memory_space<vmem>>, %arg4: memref<1x128xf32, #tpu.memory_space<vmem>>, %arg5: memref<128x128xbf16, #tpu.memory_space<vmem>>, %arg6: memref<1x128xf32, #tpu.memory_space<vmem>>, %arg7: memref<128x128xbf16, #tpu.memory_space<vmem>>, %arg8: memref<1x1x128xf32, #tpu.memory_space<vmem>>, %arg9: memref<1x1x128xf32, #tpu.memory_space<vmem>>) attributes {dimension_semantics = [#tpu.dimension_semantics<parallel>, #tpu.dimension_semantics<arbitrary>], iteration_bounds = array<i64: 2, 1>, scalar_prefetch = 0 : i64, scratch_operands = 0 : i64, tpu.core_type = #tpu.core_type<tc>, window_params = [{transform_indices = @transform_0, window_bounds = array<i64: 1, 128, 4, 256>}, {pipeline_mode = #tpu.pipeline_mode<synchronous>, transform_indices = @transform_1, window_bounds = array<i64: 4, 128>}, {pipeline_mode = #tpu.pipeline_mode<synchronous>, transform_indices = @transform_2, window_bounds = array<i64: 1, 128>}, {pipeline_mode = #tpu.pipeline_mode<synchronous>, transform_indices = @transform_3, window_bounds = array<i64: 128, 128>}, {pipeline_mode = #tpu.pipeline_mode<synchronous>, transform_indices = @transform_4, window_bounds = array<i64: 1, 128>}, {transform_indices = @transform_5, window_bounds = array<i64: 128, 128>}, {transform_indices = @transform_6, window_bounds = array<i64: 1, 1, 128>}, {transform_indices = @transform_7, window_bounds = array<i64: 1, 1, 128>}]} {
    %c0_i32 = arith.constant 0 : i32
    %0 = arith.cmpi eq, %arg1, %c0_i32 : i32
    %1 = arith.extui %0 : i1 to i32
    %c0_i32_0 = arith.constant 0 : i32
    %2 = arith.cmpi ne, %1, %c0_i32_0 : i32
    scf.if %2 {
      %cst_32 = arith.constant 0.000000e+00 : f32
      %50 = vector.broadcast %cst_32 : f32 to vector<1x128xf32>
      %c0_33 = arith.constant 0 : index
      %c0_34 = arith.constant 0 : index
      %c0_35 = arith.constant 0 : index
      %51 = vector.load %arg8[%c0_33, %c0_34, %c0_35] : memref<1x1x128xf32, #tpu.memory_space<vmem>>, vector<1x1x128xf32>
      %52 = vector.shape_cast %51 : vector<1x1x128xf32> to vector<1x128xf32>
      %53 = vector.shape_cast %50 : vector<1x128xf32> to vector<1x1x128xf32>
      tpu.vector_store %arg8[%c0_33, %c0_34, %c0_35], %53 {strides = array<i32>} : memref<1x1x128xf32, #tpu.memory_space<vmem>>, vector<1x1x128xf32>,
      %cst_36 = arith.constant 0.000000e+00 : f32
      %54 = vector.broadcast %cst_36 : f32 to vector<1x128xf32>
      %c0_37 = arith.constant 0 : index
      %c0_38 = arith.constant 0 : index
      %c0_39 = arith.constant 0 : index
      %55 = vector.load %arg9[%c0_37, %c0_38, %c0_39] : memref<1x1x128xf32, #tpu.memory_space<vmem>>, vector<1x1x128xf32>
      %56 = vector.shape_cast %55 : vector<1x1x128xf32> to vector<1x128xf32>
      %57 = vector.shape_cast %54 : vector<1x128xf32> to vector<1x1x128xf32>
      tpu.vector_store %arg9[%c0_37, %c0_38, %c0_39], %57 {strides = array<i32>} : memref<1x1x128xf32, #tpu.memory_space<vmem>>, vector<1x1x128xf32>,
    } else {
    }
    %c0 = arith.constant 0 : index
    %c0_1 = arith.constant 0 : index
    %c0_2 = arith.constant 0 : index
    %c0_3 = arith.constant 0 : index
    %3 = vector.load %arg2[%c0, %c0_1, %c0_2, %c0_3] : memref<1x128x4x256xbf16, #tpu.memory_space<vmem>>, vector<1x128x4x256xbf16>
    %4 = vector.shape_cast %3 : vector<1x128x4x256xbf16> to vector<128x4x256xbf16>
    %5 = arith.extf %4 : vector<128x4x256xbf16> to vector<128x4x256xf32>
    %cst = arith.constant dense<0.000000e+00> : vector<128x4xf32>
    %6 = vector.multi_reduction <add>, %5, %cst [2] : vector<128x4x256xf32> to vector<128x4xf32>
    %cst_4 = arith.constant 3.906250e-03 : f32
    %7 = vector.broadcast %cst_4 : f32 to vector<128x4xf32>
    %8 = arith.mulf %6, %7 : vector<128x4xf32>
    %9 = arith.truncf %8 : vector<128x4xf32> to vector<128x4xbf16>
    %c0_5 = arith.constant 0 : index
    %c0_6 = arith.constant 0 : index
    %10 = vector.load %arg3[%c0_5, %c0_6] : memref<4x128xbf16, #tpu.memory_space<vmem>>, vector<4x128xbf16>
    %cst_7 = arith.constant dense<0.000000e+00> : vector<128x128xf32>
    %11 = tpu.matmul %9, %10, %cst_7 {dimension_numbers = #tpu.dot_dimension_numbers<[1], [0], [0], [1], [0, 0, 1, 1], [], []>} : vector<128x4xbf16>, vector<4x128xbf16>, vector<128x128xf32> -> vector<128x128xf32>
    %c0_8 = arith.constant 0 : index
    %c0_9 = arith.constant 0 : index
    %12 = vector.load %arg4[%c0_8, %c0_9] : memref<1x128xf32, #tpu.memory_space<vmem>>, vector<1x128xf32>
    %13 = vector.broadcast %12 : vector<1x128xf32> to vector<128x128xf32>
    %14 = arith.addf %11, %13 : vector<128x128xf32>
    %15 = arith.truncf %14 : vector<128x128xf32> to vector<128x128xbf16>
    %c0_10 = arith.constant 0 : index
    %c0_11 = arith.constant 0 : index
    %16 = vector.load %arg5[%c0_10, %c0_11] : memref<128x128xbf16, #tpu.memory_space<vmem>>, vector<128x128xbf16>
    %cst_12 = arith.constant dense<0.000000e+00> : vector<128x128xf32>
    %17 = tpu.matmul %15, %16, %cst_12 {dimension_numbers = #tpu.dot_dimension_numbers<[1], [0], [0], [1], [0, 0, 1, 1], [], []>} : vector<128x128xbf16>, vector<128x128xbf16>, vector<128x128xf32> -> vector<128x128xf32>
    %c0_13 = arith.constant 0 : index
    %c0_14 = arith.constant 0 : index
    %18 = vector.load %arg6[%c0_13, %c0_14] : memref<1x128xf32, #tpu.memory_space<vmem>>, vector<1x128xf32>
    %19 = vector.broadcast %18 : vector<1x128xf32> to vector<128x128xf32>
    %20 = arith.addf %17, %19 : vector<128x128xf32>
    %21 = arith.truncf %20 : vector<128x128xf32> to vector<128x128xbf16>
    %c0_15 = arith.constant 0 : index
    %c0_16 = arith.constant 0 : index
    %22 = vector.load %arg7[%c0_15, %c0_16] : memref<128x128xbf16, #tpu.memory_space<vmem>>, vector<128x128xbf16>
    tpu.vector_store %arg7[%c0_15, %c0_16], %21 {strides = array<i32>} : memref<128x128xbf16, #tpu.memory_space<vmem>>, vector<128x128xbf16>,
    %c128_i32 = arith.constant 128 : i32
    %23 = arith.muli %arg1, %c128_i32 : i32
    %24 = tpu.iota {dimensions = array<i32: 0>} : vector<128x1xi32>
    %25 = vector.broadcast %23 : i32 to vector<128x1xi32>
    %26 = arith.addi %25, %24 : vector<128x1xi32>
    %c2_i32 = arith.constant 2 : i32
    %27 = vector.broadcast %c2_i32 : i32 to vector<128x1xi32>
    %28 = arith.cmpi slt, %26, %27 : vector<128x1xi32>
    %cst_17 = arith.constant 0.000000e+00 : f32
    %29 = vector.shape_cast %28 : vector<128x1xi1> to vector<128x1xi1>
    %30 = vector.broadcast %29 : vector<128x1xi1> to vector<128x128xi1>
    %31 = vector.broadcast %cst_17 : f32 to vector<128x128xf32>
    %32 = arith.select %30, %20, %31 : vector<128x128xi1>, vector<128x128xf32>
    %c0_18 = arith.constant 0 : index
    %c0_19 = arith.constant 0 : index
    %c0_20 = arith.constant 0 : index
    %33 = vector.load %arg8[%c0_18, %c0_19, %c0_20] : memref<1x1x128xf32, #tpu.memory_space<vmem>>, vector<1x1x128xf32>
    %34 = vector.shape_cast %33 : vector<1x1x128xf32> to vector<1x128xf32>
    %cst_21 = arith.constant dense<0.000000e+00> : vector<128xf32>
    %35 = vector.multi_reduction <add>, %32, %cst_21 [0] : vector<128x128xf32> to vector<128xf32>
    %36 = vector.shape_cast %35 : vector<128xf32> to vector<1x128xf32>
    %37 = arith.addf %34, %36 : vector<1x128xf32>
    %c0_22 = arith.constant 0 : index
    %c0_23 = arith.constant 0 : index
    %c0_24 = arith.constant 0 : index
    %38 = vector.load %arg8[%c0_22, %c0_23, %c0_24] : memref<1x1x128xf32, #tpu.memory_space<vmem>>, vector<1x1x128xf32>
    %39 = vector.shape_cast %38 : vector<1x1x128xf32> to vector<1x128xf32>
    %40 = vector.shape_cast %37 : vector<1x128xf32> to vector<1x1x128xf32>
    tpu.vector_store %arg8[%c0_22, %c0_23, %c0_24], %40 {strides = array<i32>} : memref<1x1x128xf32, #tpu.memory_space<vmem>>, vector<1x1x128xf32>,
    %c0_25 = arith.constant 0 : index
    %c0_26 = arith.constant 0 : index
    %c0_27 = arith.constant 0 : index
    %41 = vector.load %arg9[%c0_25, %c0_26, %c0_27] : memref<1x1x128xf32, #tpu.memory_space<vmem>>, vector<1x1x128xf32>
    %42 = vector.shape_cast %41 : vector<1x1x128xf32> to vector<1x128xf32>
    %43 = arith.mulf %32, %32 : vector<128x128xf32>
    %cst_28 = arith.constant dense<0.000000e+00> : vector<128xf32>
    %44 = vector.multi_reduction <add>, %43, %cst_28 [0] : vector<128x128xf32> to vector<128xf32>
    %45 = vector.shape_cast %44 : vector<128xf32> to vector<1x128xf32>
    %46 = arith.addf %42, %45 : vector<1x128xf32>
    %c0_29 = arith.constant 0 : index
    %c0_30 = arith.constant 0 : index
    %c0_31 = arith.constant 0 : index
    %47 = vector.load %arg9[%c0_29, %c0_30, %c0_31] : memref<1x1x128xf32, #tpu.memory_space<vmem>>, vector<1x1x128xf32>
    %48 = vector.shape_cast %47 : vector<1x1x128xf32> to vector<1x128xf32>
    %49 = vector.shape_cast %46 : vector<1x128xf32> to vector<1x1x128xf32>
    tpu.vector_store %arg9[%c0_29, %c0_30, %c0_31], %49 {strides = array<i32>} : memref<1x1x128xf32, #tpu.memory_space<vmem>>, vector<1x1x128xf32>,
    return
  }
  func.func @transform_0(%arg0: i32, %arg1: i32) -> (i32, i32, i32, i32) {
    %c0_i32 = arith.constant 0 : i32
    %c0_i32_0 = arith.constant 0 : i32
    %c0_i32_1 = arith.constant 0 : i32
    return %arg0, %arg1, %c0_i32, %c0_i32_0 : i32, i32, i32, i32
  }
  func.func @transform_1(%arg0: i32, %arg1: i32) -> (i32, i32) {
    %c0_i32 = arith.constant 0 : i32
    %c0_i32_0 = arith.constant 0 : i32
    %c0_i32_1 = arith.constant 0 : i32
    return %c0_i32, %c0_i32_0 : i32, i32
  }
  func.func @transform_2(%arg0: i32, %arg1: i32) -> (i32, i32) {
    %c0_i32 = arith.constant 0 : i32
    %c0_i32_0 = arith.constant 0 : i32
    %c0_i32_1 = arith.constant 0 : i32
    return %c0_i32, %c0_i32_0 : i32, i32
  }
  func.func @transform_3(%arg0: i32, %arg1: i32) -> (i32, i32) {
    %c0_i32 = arith.constant 0 : i32
    %c0_i32_0 = arith.constant 0 : i32
    %c0_i32_1 = arith.constant 0 : i32
    return %c0_i32, %c0_i32_0 : i32, i32
  }
  func.func @transform_4(%arg0: i32, %arg1: i32) -> (i32, i32) {
    %c0_i32 = arith.constant 0 : i32
    %c0_i32_0 = arith.constant 0 : i32
    %c0_i32_1 = arith.constant 0 : i32
    return %c0_i32, %c0_i32_0 : i32, i32
  }
  func.func @transform_5(%arg0: i32, %arg1: i32) -> (i32, i32) {
    %c1_i32 = arith.constant 1 : i32
    %0 = arith.muli %arg0, %c1_i32 : i32
    %1 = arith.addi %0, %arg1 : i32
    %c0_i32 = arith.constant 0 : i32
    %c0_i32_0 = arith.constant 0 : i32
    return %1, %c0_i32 : i32, i32
  }
  func.func @transform_6(%arg0: i32, %arg1: i32) -> (i32, i32, i32) {
    %c0_i32 = arith.constant 0 : i32
    %c0_i32_0 = arith.constant 0 : i32
    %c0_i32_1 = arith.constant 0 : i32
    return %arg0, %c0_i32, %c0_i32_0 : i32, i32, i32
  }
  func.func @transform_7(%arg0: i32, %arg1: i32) -> (i32, i32, i32) {
    %c0_i32 = arith.constant 0 : i32
    %c0_i32_0 = arith.constant 0 : i32
    %c0_i32_1 = arith.constant 0 : i32
    return %arg0, %c0_i32, %c0_i32_0 : i32, i32, i32
  }
}

module attributes {stable_mosaic.version = 11 : i64} {
  func.func @_stage2_kernel(%arg0: i32, %arg1: memref<128x128xbf16, #tpu.memory_space<vmem>>, %arg2: memref<1x128xf32, #tpu.memory_space<vmem>>, %arg3: memref<1x128xf32, #tpu.memory_space<vmem>>, %arg4: memref<128x128xbf16, #tpu.memory_space<vmem>>, %arg5: memref<1x128xf32, #tpu.memory_space<vmem>>, %arg6: memref<128x128xbf16, #tpu.memory_space<vmem>>, %arg7: memref<128x128xf32, #tpu.memory_space<vmem>>, %arg8: memref<128x128xf32, #tpu.memory_space<vmem>>) attributes {dimension_semantics = [#tpu.dimension_semantics<parallel>], iteration_bounds = array<i64: 2>, scalar_prefetch = 0 : i64, scratch_operands = 0 : i64, tpu.core_type = #tpu.core_type<tc>, window_params = [{transform_indices = @transform_0, window_bounds = array<i64: 128, 128>}, {pipeline_mode = #tpu.pipeline_mode<synchronous>, transform_indices = @transform_1, window_bounds = array<i64: 1, 128>}, {pipeline_mode = #tpu.pipeline_mode<synchronous>, transform_indices = @transform_2, window_bounds = array<i64: 1, 128>}, {pipeline_mode = #tpu.pipeline_mode<synchronous>, transform_indices = @transform_3, window_bounds = array<i64: 128, 128>}, {pipeline_mode = #tpu.pipeline_mode<synchronous>, transform_indices = @transform_4, window_bounds = array<i64: 1, 128>}, {pipeline_mode = #tpu.pipeline_mode<synchronous>, transform_indices = @transform_5, window_bounds = array<i64: 128, 128>}, {transform_indices = @transform_6, window_bounds = array<i64: 128, 128>}, {transform_indices = @transform_7, window_bounds = array<i64: 128, 128>}]} {
    %c0 = arith.constant 0 : index
    %c0_0 = arith.constant 0 : index
    %0 = vector.load %arg1[%c0, %c0_0] : memref<128x128xbf16, #tpu.memory_space<vmem>>, vector<128x128xbf16>
    %1 = arith.extf %0 : vector<128x128xbf16> to vector<128x128xf32>
    %c0_1 = arith.constant 0 : index
    %c0_2 = arith.constant 0 : index
    %2 = vector.load %arg2[%c0_1, %c0_2] : memref<1x128xf32, #tpu.memory_space<vmem>>, vector<1x128xf32>
    %3 = vector.broadcast %2 : vector<1x128xf32> to vector<128x128xf32>
    %4 = arith.mulf %1, %3 : vector<128x128xf32>
    %c0_3 = arith.constant 0 : index
    %c0_4 = arith.constant 0 : index
    %5 = vector.load %arg3[%c0_3, %c0_4] : memref<1x128xf32, #tpu.memory_space<vmem>>, vector<1x128xf32>
    %6 = vector.broadcast %5 : vector<1x128xf32> to vector<128x128xf32>
    %7 = arith.addf %4, %6 : vector<128x128xf32>
    %cst = arith.constant 0.000000e+00 : f32
    %8 = vector.broadcast %cst : f32 to vector<128x128xf32>
    %9 = arith.maximumf %7, %8 : vector<128x128xf32>
    %10 = arith.truncf %9 : vector<128x128xf32> to vector<128x128xbf16>
    %c0_5 = arith.constant 0 : index
    %c0_6 = arith.constant 0 : index
    %11 = vector.load %arg4[%c0_5, %c0_6] : memref<128x128xbf16, #tpu.memory_space<vmem>>, vector<128x128xbf16>
    %cst_7 = arith.constant dense<0.000000e+00> : vector<128x128xf32>
    %12 = tpu.matmul %10, %11, %cst_7 {dimension_numbers = #tpu.dot_dimension_numbers<[1], [0], [0], [1], [0, 0, 1, 1], [], []>} : vector<128x128xbf16>, vector<128x128xbf16>, vector<128x128xf32> -> vector<128x128xf32>
    %c0_8 = arith.constant 0 : index
    %c0_9 = arith.constant 0 : index
    %13 = vector.load %arg5[%c0_8, %c0_9] : memref<1x128xf32, #tpu.memory_space<vmem>>, vector<1x128xf32>
    %14 = vector.broadcast %13 : vector<1x128xf32> to vector<128x128xf32>
    %15 = arith.addf %12, %14 : vector<128x128xf32>
    %16 = arith.mulf %15, %15 : vector<128x128xf32>
    %cst_10 = arith.constant dense<0.000000e+00> : vector<128xf32>
    %17 = vector.multi_reduction <add>, %16, %cst_10 [1] : vector<128x128xf32> to vector<128xf32>
    %18 = vector.shape_cast %17 : vector<128xf32> to vector<128x1xf32>
    %cst_11 = arith.constant 1.000000e-24 : f32
    %19 = vector.broadcast %cst_11 : f32 to vector<128x1xf32>
    %20 = arith.maximumf %18, %19 : vector<128x1xf32>
    %21 = math.rsqrt %20 : vector<128x1xf32>
    %22 = vector.broadcast %21 : vector<128x1xf32> to vector<128x128xf32>
    %23 = arith.mulf %15, %22 : vector<128x128xf32>
    %c0_12 = arith.constant 0 : index
    %c0_13 = arith.constant 0 : index
    %24 = vector.load %arg7[%c0_12, %c0_13] : memref<128x128xf32, #tpu.memory_space<vmem>>, vector<128x128xf32>
    tpu.vector_store %arg7[%c0_12, %c0_13], %23 {strides = array<i32>} : memref<128x128xf32, #tpu.memory_space<vmem>>, vector<128x128xf32>,
    %25 = arith.truncf %23 : vector<128x128xf32> to vector<128x128xbf16>
    %c0_14 = arith.constant 0 : index
    %c0_15 = arith.constant 0 : index
    %26 = vector.load %arg6[%c0_14, %c0_15] : memref<128x128xbf16, #tpu.memory_space<vmem>>, vector<128x128xbf16>
    %cst_16 = arith.constant dense<0.000000e+00> : vector<128x128xf32>
    %27 = tpu.matmul %25, %26, %cst_16 {dimension_numbers = #tpu.dot_dimension_numbers<[1], [0], [0], [1], [0, 0, 1, 1], [], []>} : vector<128x128xbf16>, vector<128x128xbf16>, vector<128x128xf32> -> vector<128x128xf32>
    %c0_17 = arith.constant 0 : index
    %c0_18 = arith.constant 0 : index
    %28 = vector.load %arg8[%c0_17, %c0_18] : memref<128x128xf32, #tpu.memory_space<vmem>>, vector<128x128xf32>
    tpu.vector_store %arg8[%c0_17, %c0_18], %27 {strides = array<i32>} : memref<128x128xf32, #tpu.memory_space<vmem>>, vector<128x128xf32>,
    return
  }
  func.func @transform_0(%arg0: i32) -> (i32, i32) {
    %c0_i32 = arith.constant 0 : i32
    %c0_i32_0 = arith.constant 0 : i32
    return %arg0, %c0_i32 : i32, i32
  }
  func.func @transform_1(%arg0: i32) -> (i32, i32) {
    %c0_i32 = arith.constant 0 : i32
    %c0_i32_0 = arith.constant 0 : i32
    %c0_i32_1 = arith.constant 0 : i32
    return %c0_i32, %c0_i32_0 : i32, i32
  }
  func.func @transform_2(%arg0: i32) -> (i32, i32) {
    %c0_i32 = arith.constant 0 : i32
    %c0_i32_0 = arith.constant 0 : i32
    %c0_i32_1 = arith.constant 0 : i32
    return %c0_i32, %c0_i32_0 : i32, i32
  }
  func.func @transform_3(%arg0: i32) -> (i32, i32) {
    %c0_i32 = arith.constant 0 : i32
    %c0_i32_0 = arith.constant 0 : i32
    %c0_i32_1 = arith.constant 0 : i32
    return %c0_i32, %c0_i32_0 : i32, i32
  }
  func.func @transform_4(%arg0: i32) -> (i32, i32) {
    %c0_i32 = arith.constant 0 : i32
    %c0_i32_0 = arith.constant 0 : i32
    %c0_i32_1 = arith.constant 0 : i32
    return %c0_i32, %c0_i32_0 : i32, i32
  }
  func.func @transform_5(%arg0: i32) -> (i32, i32) {
    %c0_i32 = arith.constant 0 : i32
    %c0_i32_0 = arith.constant 0 : i32
    %c0_i32_1 = arith.constant 0 : i32
    return %c0_i32, %c0_i32_0 : i32, i32
  }
  func.func @transform_6(%arg0: i32) -> (i32, i32) {
    %c0_i32 = arith.constant 0 : i32
    %c0_i32_0 = arith.constant 0 : i32
    return %arg0, %c0_i32 : i32, i32
  }
  func.func @transform_7(%arg0: i32) -> (i32, i32) {
    %c0_i32 = arith.constant 0 : i32
    %c0_i32_0 = arith.constant 0 : i32
    return %arg0, %c0_i32 : i32, i32
  }
}

</mosaic_0001>

<bundles_post_ra>
// kernel: swav_forward.3
= control target key start
LH: loop header
LB: loop body
LE: loop exit
PB: predicated region body
PF: predicated region fallthrough
CT: control target
= control target key end

     0   :  { %s1225_s24 = smov 0   ;;  %s1490_s0 = inlined_call_operand.vmem [shape: bf16[256,128], index: 0, kind: input, shape index: {}]   ;;  %s1491_s1 = inlined_call_operand.vmem [shape: f32[1,128], index: 1, kind: input, shape index: {}]   ;;  %s1492_s2 = inlined_call_operand.vmem [shape: f32[1,128], index: 2, kind: input, shape index: {}]   ;;  %s1493_s3 = inlined_call_operand.vmem [shape: bf16[128,128], index: 3, kind: input, shape index: {}]   ;;  %s1494_s4 = inlined_call_operand.vmem [shape: f32[1,128], index: 4, kind: input, shape index: {}]   ;;  %s1495_s5 = inlined_call_operand.vmem [shape: bf16[128,128], index: 5, kind: input, shape index: {}]   ;;  %s1496_s6 = inlined_call_operand.vmem [shape: f32[256,128], index: 6, kind: output, shape index: {0}]   ;;  %s1497_s7 = inlined_call_operand.vmem [shape: f32[256,128], index: 7, kind: output, shape index: {1}]  }
   0x1 LB: > { %s954_s25 = sadd.s32 4294967295, %s1183_s24   ;;  %p958_p0 = scmp.ge.s32.totalorder %s1183_s24, 1  ;;  %s1183_s24 = sphi %s1225_s24, %s18_s24  }
   0x2   : > { %p241_p1 = scmp.lt.s32.totalorder %s1183_s24, 3 }
   0x4   : > { %p242_p2 = pnand %p958_p0, %p241_p1 }
   0x5   : > { %v1129_v0 = vld [vmem:[%s1493_s3] sm:$0xff] (!%p242_p2)   ;;  %s959_s28 = sshll.u32 (!%p242_p2), %s954_s25, 4  ;;  %v1130_v1 = vld [vmem:[%s1493_s3 + $0x8] sm:$0xff] (!%p242_p2)   ;;  %v1131_v2 = vld [vmem:[%s1493_s3 + $0x10] sm:$0xff] (!%p242_p2)  }
   0x6   : > { %245 = sbr.rel (%p242_p2) target bundleno = 660 (0x294), region = 44  ;;  %p279_p3 = scmp.lt.s32.totalorder (!%p242_p2), %s959_s28, 31  ;;  %1057 = vmatprep.subr.bf16.mxu0 (!%p242_p2), %v1129_v0  ;;  %v1132_v3 = vld [vmem:[%s1493_s3 + $0x18] sm:$0xff] (!%p242_p2)   ;;  %v1257_v5 = vld [vmem:[%s1491_s1] ss:$0 sm:$0xff] (!%p242_p2)  ;;  %v1134_v22 = vld [vmem:[%s1493_s3 + $0x28] sm:$0xff] (!%p242_p2)  }
   0x7   : > { %1058 = vmatpush3.bf16.msra.mxu0 (!%p242_p2), %v1129_v0  ;;  %v1133_v8 = vld [vmem:[%s1493_s3 + $0x20] sm:$0xff] (!%p242_p2)   ;;  %v1135_v29 = vld [vmem:[%s1493_s3 + $0x30] sm:$0xff] (!%p242_p2)   ;;  %v1136_v39 = vld [vmem:[%s1493_s3 + $0x38] sm:$0xff] (!%p242_p2)  }
   0x8   : > { %1059 = vmatprep.subr.bf16.mxu0 (!%p242_p2), %v1130_v1  ;;  %v1265_v9 = vld [vmem:[%s1492_s2] ss:$0 sm:$0xff] (!%p242_p2) }
   0xb   : > { %1060 = vmatpush3.bf16.msra.mxu0 (!%p242_p2), %v1130_v1 }
   0xc   : > { %1061 = vmatprep.subr.bf16.mxu0 (!%p242_p2), %v1131_v2 }
   0xd   : > { %s1499_s28 = smov (!%p279_p3, %s959_s28), 31 }
   0xe   : > { %s960_s10 = sshll.u32 %s1499_s28, 2  ;;  %s962_s26 = sshll.u32 %s1499_s28, 3 }
   0xf   : > { %s1248_s13 = scalar_lea.vmem %s1490_s0, %s960_s10  ;;  %1062 = vmatpush3.bf16.msra.mxu0 %v1131_v2  ;;  %s1430_s30 = scalar_lea.vmem %s1496_s6, %s962_s26 }
  0x10   : > { %v987_v4 = vld [vmem:[%s1248_s13] sm:$0xff]   ;;  %v1018_v10 = vld [vmem:[%s1248_s13 + $0x8] sm:$0xff]   ;;  %v1019_v13 = vld [vmem:[%s1248_s13 + $0x10] sm:$0xff]   ;;  %1063 = vmatprep.subr.bf16.mxu0 %v1132_v3  ;;  %s1469_s10 = scalar_lea.vmem %s1497_s7, %s962_s26 }
  0x11   : > { %v988_v6 = vunpack.c.l.bf16 %v987_v4  ;;  %v989_v7 = vunpack.c.h.bf16 %v987_v4  ;;  %v992_v16 = vunpack.c.l.bf16 %v1018_v10  ;;  %v993_v17 = vunpack.c.h.bf16 %v1018_v10  ;;  %v1020_v28 = vld [vmem:[%s1248_s13 + $0x18] sm:$0xff]   ;;  %v1021_v30 = vld [vmem:[%s1248_s13 + $0x20] sm:$0xff]   ;;  %v1022_v48 = vld [vmem:[%s1248_s13 + $0x28] sm:$0xff]  }
  0x12   : > { %v996_v18 = vunpack.c.l.bf16 %v1019_v13  ;;  %v997_v19 = vunpack.c.h.bf16 %v1019_v13  ;;  %v1000_v31 = vunpack.c.l.bf16 %v1020_v28  ;;  %v1001_v32 = vunpack.c.h.bf16 %v1020_v28  ;;  %v1023_v49 = vld [vmem:[%s1248_s13 + $0x30] sm:$0xff]   ;;  %v1024_v4 = vld [vmem:[%s1248_s13 + $0x38] sm:$0xff]   ;;  %v1137_v28 = vld [vmem:[%s1495_s5] sm:$0xff]  }
  0x13   : > { %v336_v11 = vmul.f32 %v988_v6, %v1257_v5  ;;  %v337_v12 = vmul.f32 %v989_v7, %v1257_v5  ;;  %1064 = vmatpush3.bf16.msra.mxu0 %v1132_v3  ;;  %v338_v24 = vmul.f32 %v992_v16, %v1257_v5  ;;  %v339_v25 = vmul.f32 %v993_v17, %v1257_v5 }
  0x14   : > { %1065 = vmatprep.subr.bf16.mxu0 %v1133_v8  ;;  %v340_v26 = vmul.f32 %v996_v18, %v1257_v5  ;;  %v341_v27 = vmul.f32 %v997_v19, %v1257_v5  ;;  %v1004_v37 = vunpack.c.l.bf16 %v1021_v30  ;;  %v1005_v38 = vunpack.c.h.bf16 %v1021_v30  ;;  %1089 = vmatprep.subr.bf16.mxu1 %v1137_v28 }
  0x15   : > { %v359_v14 = vadd.f32 %v1265_v9, %v336_v11  ;;  %v360_v15 = vadd.f32 %v1265_v9, %v337_v12  ;;  %v361_v33 = vadd.f32 %v1265_v9, %v338_v24  ;;  %v362_v34 = vadd.f32 %v1265_v9, %v339_v25  ;;  %1090 = vmatpush3.bf16.msra.mxu1 %v1137_v28 }
  0x16   : > { %v363_v35 = vadd.f32 %v1265_v9, %v340_v26  ;;  %v364_v36 = vadd.f32 %v1265_v9, %v341_v27  ;;  %v342_v40 = vmul.f32 %v1000_v31, %v1257_v5  ;;  %v343_v41 = vmul.f32 %v1001_v32, %v1257_v5 }
  0x17   : > { %v375_v20 = vmax.f32 %v359_v14, 0.0  ;;  %v376_v21 = vmax.f32 %v360_v15, 0.0  ;;  %1066 = vmatpush3.bf16.msra.mxu0 %v1133_v8  ;;  %v377_v42 = vmax.f32 %v361_v33, 0.0  ;;  %v378_v43 = vmax.f32 %v362_v34, 0.0 }
  0x18   : > { %1067 = vmatprep.subr.bf16.mxu0 %v1134_v22  ;;  %v379_v44 = vmax.f32 %v363_v35, 0.0  ;;  %v380_v45 = vmax.f32 %v364_v36, 0.0  ;;  %v344_v46 = vmul.f32 %v1004_v37, %v1257_v5  ;;  %v345_v47 = vmul.f32 %v1005_v38, %v1257_v5 }
  0x19   : > { %v391_v23 = vpack.c.bf16 %v376_v21, %v375_v20  ;;  %v365_v50 = vadd.f32 %v1265_v9, %v342_v40  ;;  %v366_v51 = vadd.f32 %v1265_v9, %v343_v41  ;;  %v392_v52 = vpack.c.bf16 %v378_v43, %v377_v42 }
  0x1a   : > { %v393_v53 = vpack.c.bf16 %v380_v45, %v379_v44  ;;  %v1008_v54 = vunpack.c.l.bf16 %v1022_v48  ;;  %v1009_v55 = vunpack.c.h.bf16 %v1022_v48  ;;  %v367_v56 = vadd.f32 %v1265_v9, %v344_v46 }
  0x1b   : > { %1073 = vmatprep.mubr.bf16.mxu0 %v391_v23  ;;  %1068 = vmatpush3.bf16.msra.mxu0 %v1134_v22  ;;  %v368_v57 = vadd.f32 %v1265_v9, %v345_v47  ;;  %v1012_v58 = vunpack.c.l.bf16 %v1023_v49  ;;  %v1013_v59 = vunpack.c.h.bf16 %v1023_v49  ;;  %v381_v60 = vmax.f32 %v365_v50, 0.0 }
  0x1c   : > { %1069 = vmatprep.subr.bf16.mxu0 %v1135_v29  ;;  %v382_v61 = vmax.f32 %v366_v51, 0.0  ;;  %v346_v62 = vmul.f32 %v1008_v54, %v1257_v5  ;;  %v347_v63 = vmul.f32 %v1009_v55, %v1257_v5  ;;  %v383_v0 = vmax.f32 %v367_v56, 0.0 }
  0x1d   : > { %v384_v1 = vmax.f32 %v368_v57, 0.0  ;;  %v348_v2 = vmul.f32 %v1012_v58, %v1257_v5  ;;  %v349_v3 = vmul.f32 %v1013_v59, %v1257_v5  ;;  %v1016_v10 = vunpack.c.l.bf16 %v1024_v4 }
  0x1e   : > { %v394_v6 = vpack.c.bf16 %v382_v61, %v381_v60  ;;  %v369_v7 = vadd.f32 %v1265_v9, %v346_v62  ;;  %v370_v8 = vadd.f32 %v1265_v9, %v347_v63  ;;  %v1017_v11 = vunpack.c.h.bf16 %v1024_v4  ;;  %v1140_v62 = vld [vmem:[%s1495_s5 + $0x18] sm:$0xff]  }
  0x1f   : > { %1070 = vmatpush3.bf16.msra.mxu0 %v1135_v29  ;;  %v395_v12 = vpack.c.bf16 %v384_v1, %v383_v0  ;;  %v371_v13 = vadd.f32 %v1265_v9, %v348_v2  ;;  %v372_v14 = vadd.f32 %v1265_v9, %v349_v3  ;;  %v350_v17 = vmul.f32 %v1016_v10, %v1257_v5  ;;  %v1327_v29 = vld [vmem:[%s1494_s4] ss:$0 sm:$0xff] }
  0x20   : > { %1071 = vmatprep.subr.bf16.mxu0 %v1136_v39  ;;  %v385_v15 = vmax.f32 %v369_v7, 0.0  ;;  %v386_v16 = vmax.f32 %v370_v8, 0.0  ;;  %v351_v18 = vmul.f32 %v1017_v11, %v1257_v5  ;;  %v1138_v5 = vld [vmem:[%s1495_s5 + $0x8] sm:$0xff]   ;;  %v1141_v3 = vld [vmem:[%s1495_s5 + $0x20] sm:$0xff]  }
  0x21   : > { %v387_v19 = vmax.f32 %v371_v13, 0.0  ;;  %v388_v20 = vmax.f32 %v372_v14, 0.0  ;;  %v373_v22 = vadd.f32 %v1265_v9, %v350_v17  ;;  %1091 = vmatprep.subr.bf16.mxu1 %v1138_v5  ;;  %v1142_v14 = vld [vmem:[%s1495_s5 + $0x28] sm:$0xff]  }
  0x22   : > { %v396_v21 = vpack.c.bf16 %v386_v16, %v385_v15  ;;  %v374_v23 = vadd.f32 %v1265_v9, %v351_v18  ;;  %v1139_v9 = vld [vmem:[%s1495_s5 + $0x10] sm:$0xff]   ;;  %1092 = vmatpush3.bf16.msra.mxu1 %v1138_v5 }
  0x23   : > { %1072 = vmatpush3.bf16.msra.mxu0 %v1136_v39  ;;  %v397_v24 = vpack.c.bf16 %v388_v20, %v387_v19  ;;  %v389_v25 = vmax.f32 %v373_v22, 0.0  ;;  %1093 = vmatprep.subr.bf16.mxu1 %v1139_v9  ;;  %v1143_v18 = vld [vmem:[%s1495_s5 + $0x30] sm:$0xff]   ;;  %v1144_v20 = vld [vmem:[%s1495_s5 + $0x38] sm:$0xff]  }
  0x24   : > { %v390_v26 = vmax.f32 %v374_v23, 0.0 }
  0x26   : > { %1074 = vmatmul.mubr.bf16.vlgmr.msra.gmra.mrb[0].mxu0 %v392_v52  ;;  %v398_v27 = vpack.c.bf16 %v390_v26, %v389_v25  ;;  %1094 = vmatpush3.bf16.msra.mxu1 %v1139_v9 }
  0x27   : > { %1077 = vmatprep.mubr.bf16.mxu0 %v393_v53  ;;  %1095 = vmatprep.subr.bf16.mxu1 %v1140_v62 }
  0x2a   : > { %1096 = vmatpush3.bf16.msra.mxu1 %v1140_v62 }
  0x2b   : > { %1097 = vmatprep.subr.bf16.mxu1 %v1141_v3 }
  0x2e   : > { %1078 = vmatmul.mubr.bf16.gmra.mrb[4].mxu0 %v394_v6  ;;  %1098 = vmatpush3.bf16.msra.mxu1 %v1141_v3 }
  0x2f   : > { %1081 = vmatprep.mubr.bf16.mxu0 %v395_v12  ;;  %1099 = vmatprep.subr.bf16.mxu1 %v1142_v14 }
  0x32   : > { %1100 = vmatpush3.bf16.msra.mxu1 %v1142_v14 }
  0x33   : > { %1101 = vmatprep.subr.bf16.mxu1 %v1143_v18 }
  0x36   : > { %1082 = vmatmul.mubr.bf16.gmra.mrb[8].mxu0 %v396_v21  ;;  %1102 = vmatpush3.bf16.msra.mxu1 %v1143_v18 }
  0x37   : > { %1085 = vmatprep.mubr.bf16.mxu0 %v397_v24  ;;  %1103 = vmatprep.subr.bf16.mxu1 %v1144_v20 }
  0x3a   : > { %1104 = vmatpush3.bf16.msra.mxu1 %v1144_v20 }
  0x3e   : > { %1086 = vmatmul.mubr.bf16.gmra.mrb[12].mxu0 %v398_v27 }
  0xf9   : > { %v1075_v30 = vpop.f32.mrb[0].mxu0 }
  0xfa   : > { %v1330_v31 = vadd.f32 %v1075_v30, %v1327_v29  ;;  %v504_v32 = vpop.f32.mrb[1].mxu0 }
  0xfb   : > { %v1333_v33 = vadd.f32 %v1327_v29, %v504_v32  ;;  %v1076_v34 = vpop.f32.mrb[2].mxu0 }
  0xfc   : > { %v1336_v35 = vadd.f32 %v1076_v34, %v1327_v29  ;;  %v507_v36 = vpop.f32.mrb[3].mxu0  ;;  %v569_v37 = vmul.f32 %v1330_v31, %v1330_v31 }
  0xfd   : > { %v1341_v38 = vadd.f32 %v1327_v29, %v507_v36  ;;  %v567_v39 = vmul.f32 %v1333_v33, %v1333_v33 }
  0xfe   : > { %587 = vadd.xlane.f32.xlu1 %v569_v37  ;;  %v570_v40 = vmul.f32 %v1336_v35, %v1336_v35 }
  0xff   : > { %583 = vadd.xlane.f32.xlu0 %v567_v39  ;;  %v568_v42 = vmul.f32 %v1341_v38, %v1341_v38 }
 0x101   : > { %v1079_v41 = vpop.f32.mrb[4].mxu0 }
 0x102   : > { %589 = vadd.xlane.f32.xlu1 %v570_v40  ;;  %v520_v43 = vpop.f32.mrb[5].mxu0  ;;  %v1353_v47 = vadd.f32 %v1079_v41, %v1327_v29 }
 0x103   : > { %v1350_v44 = vadd.f32 %v1327_v29, %v520_v43  ;;  %v1080_v45 = vpop.f32.mrb[6].mxu0  ;;  %585 = vadd.xlane.f32.xlu0 %v568_v42 }
 0x104   : > { %v523_v46 = vpop.f32.mrb[7].mxu0  ;;  %v1361_v50 = vadd.f32 %v1080_v45, %v1327_v29  ;;  %v573_v53 = vmul.f32 %v1353_v47, %v1353_v47 }
 0x105   : > { %v1356_v48 = vadd.f32 %v1327_v29, %v523_v46  ;;  %v571_v49 = vmul.f32 %v1350_v44, %v1350_v44 }
 0x106   : > { %v574_v57 = vmul.f32 %v1361_v50, %v1361_v50 }
 0x107   : > { %591 = vadd.xlane.f32.xlu0 %v571_v49  ;;  %v572_v51 = vmul.f32 %v1356_v48, %v1356_v48 }
 0x109   : > { %v1083_v52 = vpop.f32.mrb[8].mxu0  ;;  %593 = vadd.xlane.f32.xlu1 %v572_v51 }
 0x10a   : > { %v536_v54 = vpop.f32.mrb[9].mxu0  ;;  %v1373_v59 = vadd.f32 %v1083_v52, %v1327_v29 }
 0x10b   : > { %v1368_v55 = vadd.f32 %v1327_v29, %v536_v54  ;;  %v1084_v56 = vpop.f32.mrb[10].mxu0  ;;  %595 = vadd.xlane.f32.xlu0 %v573_v53 }
 0x10c   : > { %v539_v58 = vpop.f32.mrb[11].mxu0  ;;  %v1384_v63 = vadd.f32 %v1084_v56, %v1327_v29  ;;  %v577_v2 = vmul.f32 %v1373_v59, %v1373_v59 }
 0x10d   : > { %v1376_v60 = vadd.f32 %v1327_v29, %v539_v58  ;;  %597 = vadd.xlane.f32.xlu1 %v574_v57  ;;  %v575_v61 = vmul.f32 %v1368_v55, %v1368_v55 }
 0x10e   : > { %v578_v8 = vmul.f32 %v1384_v63, %v1384_v63 }
 0x10f   : > { %599 = vadd.xlane.f32.xlu0 %v575_v61  ;;  %v576_v0 = vmul.f32 %v1376_v60, %v1376_v60 }
 0x111   : > { %v1087_v1 = vpop.f32.mrb[12].mxu0  ;;  %601 = vadd.xlane.f32.xlu1 %v576_v0 }
 0x112   : > { %v552_v4 = vpop.f32.mrb[13].mxu0  ;;  %v1399_v11 = vadd.f32 %v1087_v1, %v1327_v29 }
 0x113   : > { %v1394_v6 = vadd.f32 %v1327_v29, %v552_v4  ;;  %v1088_v7 = vpop.f32.mrb[14].mxu0  ;;  %603 = vadd.xlane.f32.xlu0 %v577_v2 }
 0x114   : > { %v555_v10 = vpop.f32.mrb[15].mxu0  ;;  %v1410_v15 = vadd.f32 %v1088_v7, %v1327_v29  ;;  %v581_v17 = vmul.f32 %v1399_v11, %v1399_v11 }
 0x115   : > { %v1402_v12 = vadd.f32 %v1327_v29, %v555_v10  ;;  %605 = vadd.xlane.f32.xlu1 %v578_v8  ;;  %v579_v13 = vmul.f32 %v1394_v6, %v1394_v6 }
 0x116   : > { %v582_v19 = vmul.f32 %v1410_v15, %v1410_v15 }
 0x117   : > { %607 = vadd.xlane.f32.xlu0 %v579_v13  ;;  %v580_v16 = vmul.f32 %v1402_v12, %v1402_v12 }
 0x119   : > { %609 = vadd.xlane.f32.xlu1 %v580_v16 }
 0x11b   : > { %611 = vadd.xlane.f32.xlu0 %v581_v17 }
 0x11d   : > { %613 = vadd.xlane.f32.xlu1 %v582_v19 }
 0x18b   : > { %v588_v21 = vpop.xlane.xlu1 %587 }
 0x18c   : > { %v617_v22 = vmax.f32 %v588_v21, 1e-24  ;;  %v584_v23 = vpop.xlane.xlu0 %583 }
 0x18d   : > { %v615_v24 = vmax.f32 %v584_v23, 1e-24 }
 0x18e   : > { %1145 = vrsqrt.f32 %v617_v22 }
 0x18f   : > { %1147 = vrsqrt.f32 %v615_v24  ;;  %v590_v25 = vpop.xlane.xlu1 %589 }
 0x190   : > { %v618_v26 = vmax.f32 %v590_v25, 1e-24  ;;  %v586_v27 = vpop.xlane.xlu0 %585 }
 0x191   : > { %v616_v28 = vmax.f32 %v586_v27, 1e-24 }
 0x192   : > { %1149 = vrsqrt.f32 %v618_v26 }
 0x193   : > { %1151 = vrsqrt.f32 %v616_v28 }
 0x194   : > { %v592_v5 = vpop.xlane.xlu0 %591 }
 0x195   : > { %v619_v9 = vmax.f32 %v592_v5, 1e-24 }
 0x196   : > { %v594_v29 = vpop.xlane.xlu1 %593 }
 0x197   : > { %1153 = vrsqrt.f32 %v619_v9  ;;  %v620_v30 = vmax.f32 %v594_v29, 1e-24 }
 0x198   : > { %v1146_v32 = vpop.eup %1145  ;;  %v596_v34 = vpop.xlane.xlu0 %595 }
 0x199   : > { %v1148_v36 = vpop.eup %1147  ;;  %1155 = vrsqrt.f32 %v620_v30  ;;  %v621_v37 = vmax.f32 %v596_v34, 1e-24  ;;  %v649_v39 = vmul.f32 %v1146_v32, %v1330_v31 }
 0x19a   : > { %v598_v40 = vpop.xlane.xlu1 %597  ;;  %v647_v41 = vmul.f32 %v1148_v36, %v1333_v33 }
 0x19b   : > { %1157 = vrsqrt.f32 %v621_v37  ;;  %v622_v42 = vmax.f32 %v598_v40, 1e-24  ;;  %665 = vst [vmem:[%s1430_s30 + $0x10] sm:$0xff] %v649_v39 }
 0x19c   : > { %v1150_v43 = vpop.eup %1149  ;;  %v600_v45 = vpop.xlane.xlu0 %599  ;;  %663 = vst [vmem:[%s1430_s30] sm:$0xff] %v647_v41 }
 0x19d   : > { %v1152_v46 = vpop.eup %1151  ;;  %1159 = vrsqrt.f32 %v622_v42  ;;  %v623_v49 = vmax.f32 %v600_v45, 1e-24  ;;  %v650_v51 = vmul.f32 %v1150_v43, %v1336_v35 }
 0x19e   : > { %v602_v52 = vpop.xlane.xlu1 %601  ;;  %v648_v53 = vmul.f32 %v1152_v46, %v1341_v38 }
 0x19f   : > { %1161 = vrsqrt.f32 %v623_v49  ;;  %v624_v31 = vmax.f32 %v602_v52, 1e-24  ;;  %666 = vst [vmem:[%s1430_s30 + $0x18] sm:$0xff] %v650_v51  ;;  %v680_v58 = vpack.c.bf16 %v650_v51, %v649_v39 }
 0x1a0   : > { %v604_v54 = vpop.xlane.xlu0 %603  ;;  %664 = vst [vmem:[%s1430_s30 + $0x8] sm:$0xff] %v648_v53  ;;  %v679_v33 = vpack.c.bf16 %v648_v53, %v647_v41 }
 0x1a1   : > { %v1154_v56 = vpop.eup %1153  ;;  %1163 = vrsqrt.f32 %v624_v31  ;;  %v625_v57 = vmax.f32 %v604_v54, 1e-24 }
 0x1a2   : > { %v606_v61 = vpop.xlane.xlu1 %605  ;;  %1105 = vmatprep.mubr.bf16.mxu1 %v679_v33  ;;  %v651_v62 = vmul.f32 %v1154_v56, %v1350_v44 }
 0x1a3   : > { %v1156_v35 = vpop.eup %1155  ;;  %1165 = vrsqrt.f32 %v625_v57  ;;  %v626_v0 = vmax.f32 %v606_v61, 1e-24  ;;  %1106 = vmatmul.mubr.bf16.vlgmr.msra.gmra.mrb[0].mxu1 %v680_v58 }
 0x1a4   : > { %v608_v38 = vpop.xlane.xlu0 %607  ;;  %v652_v1 = vmul.f32 %v1156_v35, %v1356_v48  ;;  %667 = vst [vmem:[%s1430_s30 + $0x20] sm:$0xff] %v651_v62 }
 0x1a5   : > { %v1158_v2 = vpop.eup %1157  ;;  %1167 = vrsqrt.f32 %v626_v0  ;;  %v627_v3 = vmax.f32 %v608_v38, 1e-24 }
 0x1a6   : > { %v610_v4 = vpop.xlane.xlu1 %609  ;;  %668 = vst [vmem:[%s1430_s30 + $0x28] sm:$0xff] %v652_v1  ;;  %v681_v7 = vpack.c.bf16 %v652_v1, %v651_v62  ;;  %v653_v8 = vmul.f32 %v1158_v2, %v1353_v47 }
 0x1a7   : > { %v1160_v10 = vpop.eup %1159  ;;  %1169 = vrsqrt.f32 %v627_v3  ;;  %v628_v44 = vmax.f32 %v610_v4, 1e-24 }
 0x1a8   : > { %1109 = vmatprep.mubr.bf16.mxu1 %v681_v7  ;;  %v612_v13 = vpop.xlane.xlu0 %611  ;;  %v654_v14 = vmul.f32 %v1160_v10, %v1361_v50  ;;  %669 = vst [vmem:[%s1430_s30 + $0x30] sm:$0xff] %v653_v8 }
 0x1a9   : > { %v1162_v48 = vpop.eup %1161  ;;  %1171 = vrsqrt.f32 %v628_v44  ;;  %v629_v16 = vmax.f32 %v612_v13, 1e-24 }
 0x1aa   : > { %v614_v17 = vpop.xlane.xlu1 %613  ;;  %670 = vst [vmem:[%s1430_s30 + $0x38] sm:$0xff] %v654_v14  ;;  %v682_v18 = vpack.c.bf16 %v654_v14, %v653_v8  ;;  %v655_v19 = vmul.f32 %v1162_v48, %v1368_v55 }
 0x1ab   : > { %v1164_v47 = vpop.eup %1163  ;;  %1173 = vrsqrt.f32 %v629_v16  ;;  %v630_v20 = vmax.f32 %v614_v17, 1e-24 }
 0x1ac   : > { %1110 = vmatmul.mubr.bf16.gmra.mrb[4].mxu1 %v682_v18  ;;  %v656_v21 = vmul.f32 %v1164_v47, %v1376_v60  ;;  %671 = vst [vmem:[%s1430_s30 + $0x40] sm:$0xff] %v655_v19 }
 0x1ad   : > { %v1166_v50 = vpop.eup %1165  ;;  %1175 = vrsqrt.f32 %v630_v20 }
 0x1ae   : > { %672 = vst [vmem:[%s1430_s30 + $0x48] sm:$0xff] %v656_v21  ;;  %v683_v22 = vpack.c.bf16 %v656_v21, %v655_v19  ;;  %v657_v23 = vmul.f32 %v1166_v50, %v1373_v59 }
 0x1af   : > { %v1168_v24 = vpop.eup %1167 }
 0x1b0   : > { %1113 = vmatprep.mubr.bf16.mxu1 %v683_v22  ;;  %v658_v55 = vmul.f32 %v1168_v24, %v1384_v63  ;;  %673 = vst [vmem:[%s1430_s30 + $0x50] sm:$0xff] %v657_v23 }
 0x1b1   : > { %v1170_v25 = vpop.eup %1169 }
 0x1b2   : > { %674 = vst [vmem:[%s1430_s30 + $0x58] sm:$0xff] %v658_v55  ;;  %v684_v26 = vpack.c.bf16 %v658_v55, %v657_v23  ;;  %v659_v60 = vmul.f32 %v1170_v25, %v1394_v6 }
 0x1b3   : > { %v1172_v27 = vpop.eup %1171 }
 0x1b4   : > { %1114 = vmatmul.mubr.bf16.gmra.mrb[8].mxu1 %v684_v26  ;;  %v660_v28 = vmul.f32 %v1172_v27, %v1402_v12  ;;  %675 = vst [vmem:[%s1430_s30 + $0x60] sm:$0xff] %v659_v60 }
 0x1b5   : > { %v1174_v5 = vpop.eup %1173 }
 0x1b6   : > { %676 = vst [vmem:[%s1430_s30 + $0x68] sm:$0xff] %v660_v28  ;;  %v685_v59 = vpack.c.bf16 %v660_v28, %v659_v60  ;;  %v661_v9 = vmul.f32 %v1174_v5, %v1399_v11 }
 0x1b7   : > { %v1176_v63 = vpop.eup %1175 }
 0x1b8   : > { %1117 = vmatprep.mubr.bf16.mxu1 %v685_v59  ;;  %v662_v29 = vmul.f32 %v1176_v63, %v1410_v15  ;;  %677 = vst [vmem:[%s1430_s30 + $0x70] sm:$0xff] %v661_v9 }
 0x1ba   : > { %678 = vst [vmem:[%s1430_s30 + $0x78] sm:$0xff] %v662_v29  ;;  %v686_v30 = vpack.c.bf16 %v662_v29, %v661_v9 }
 0x1bc   : > { %1118 = vmatmul.mubr.bf16.gmra.mrb[12].mxu1 %v686_v30 }
 0x276   : > { %v1107_v6 = vpop.f32.mrb[0].mxu1 }
 0x277   : > { %850 = vst [vmem:[%s1469_s10 + $0x10] sm:$0xff] %v1107_v6  ;;  %v785_v11 = vpop.f32.mrb[1].mxu1 }
 0x278   : > { %848 = vst [vmem:[%s1469_s10] sm:$0xff] %v785_v11  ;;  %v1108_v12 = vpop.f32.mrb[2].mxu1 }
 0x279   : > { %851 = vst [vmem:[%s1469_s10 + $0x18] sm:$0xff] %v1108_v12  ;;  %v788_v15 = vpop.f32.mrb[3].mxu1 }
 0x27a   : > { %849 = vst [vmem:[%s1469_s10 + $0x8] sm:$0xff] %v788_v15 }
 0x27f   : > { %v1111_v32 = vpop.f32.mrb[4].mxu1 }
 0x280   : > { %854 = vst [vmem:[%s1469_s10 + $0x30] sm:$0xff] %v1111_v32  ;;  %v801_v34 = vpop.f32.mrb[5].mxu1 }
 0x281   : > { %852 = vst [vmem:[%s1469_s10 + $0x20] sm:$0xff] %v801_v34  ;;  %v1112_v36 = vpop.f32.mrb[6].mxu1 }
 0x282   : > { %855 = vst [vmem:[%s1469_s10 + $0x38] sm:$0xff] %v1112_v36  ;;  %v804_v37 = vpop.f32.mrb[7].mxu1 }
 0x283   : > { %853 = vst [vmem:[%s1469_s10 + $0x28] sm:$0xff] %v804_v37 }
 0x287   : > { %v1115_v39 = vpop.f32.mrb[8].mxu1 }
 0x288   : > { %858 = vst [vmem:[%s1469_s10 + $0x50] sm:$0xff] %v1115_v39  ;;  %v817_v40 = vpop.f32.mrb[9].mxu1 }
 0x289   : > { %856 = vst [vmem:[%s1469_s10 + $0x40] sm:$0xff] %v817_v40  ;;  %v1116_v41 = vpop.f32.mrb[10].mxu1 }
 0x28a   : > { %859 = vst [vmem:[%s1469_s10 + $0x58] sm:$0xff] %v1116_v41  ;;  %v820_v42 = vpop.f32.mrb[11].mxu1 }
 0x28b   : > { %857 = vst [vmem:[%s1469_s10 + $0x48] sm:$0xff] %v820_v42 }
 0x28f   : > { %v1119_v43 = vpop.f32.mrb[12].mxu1 }
 0x290   : > { %862 = vst [vmem:[%s1469_s10 + $0x70] sm:$0xff] %v1119_v43  ;;  %v833_v45 = vpop.f32.mrb[13].mxu1 }
 0x291   : > { %860 = vst [vmem:[%s1469_s10 + $0x60] sm:$0xff] %v833_v45  ;;  %v1120_v46 = vpop.f32.mrb[14].mxu1 }
 0x292   : > { %863 = vst [vmem:[%s1469_s10 + $0x78] sm:$0xff] %v1120_v46  ;;  %v836_v49 = vpop.f32.mrb[15].mxu1 }
 0x293   : > { %861 = vst [vmem:[%s1469_s10 + $0x68] sm:$0xff] %v836_v49 }
 0x294 PF: > { %s18_s24 = sadd.s32 1, %s1183_s24  }
 0x295   : > { %p15_p4 = scmp.ge.s32.totalorder %s18_s24, 4  }
 0x297   :  { %17 = sbr.rel (!%p15_p4) target bundleno = 1 (0x1), region = 86 }

// kernel: swav_forward.2
= control target key start
LH: loop header
LB: loop body
LE: loop exit
PB: predicated region body
PF: predicated region fallthrough
CT: control target
= control target key end

     0   :  { %s4072_s24 = smov 0   ;;  %s4074_s25 = smov 0   ;;  %s5089_s0 = inlined_call_operand.vmem [shape: bf16[2,128,4,256], index: 0, kind: input, shape index: {}]   ;;  %s5090_s1 = inlined_call_operand.vmem [shape: bf16[4,128], index: 1, kind: input, shape index: {}]   ;;  %s5091_s2 = inlined_call_operand.vmem [shape: f32[1,128], index: 2, kind: input, shape index: {}]   ;;  %s5092_s3 = inlined_call_operand.vmem [shape: bf16[128,128], index: 3, kind: input, shape index: {}]   ;;  %s5093_s4 = inlined_call_operand.vmem [shape: f32[1,128], index: 4, kind: input, shape index: {}]   ;;  %s5094_s5 = inlined_call_operand.vmem [shape: bf16[256,128], index: 5, kind: output, shape index: {0}]   ;;  %s5095_s6 = inlined_call_operand.vmem [shape: f32[2,1,128], index: 6, kind: output, shape index: {1}]   ;;  %s5096_s7 = inlined_call_operand.vmem [shape: f32[2,1,128], index: 7, kind: output, shape index: {2}]  }
   0x1   :  { %s4076_s26 = smov 0  }
   0x2 LB: > { %s30_s27 = sadd.s32 1, %s4025_s25  ;;  %p3458_p0 = scmp.ge.s32.totalorder %s4029_s26, 1  ;;  %s4029_s26 = sphi %s4076_s26, %s18_s26   ;;  %s4025_s25 = sphi %s4074_s25, %s5098_s25   ;;  %s4021_s24 = sphi %s4072_s24, %s5097_s24  }
   0x3   : > { %p32_p1 = scmp.ge.s32.totalorder %s30_s27, 2  ;;  %p264_p2 = scmp.lt.s32.totalorder %s4029_s26, 3 }
   0x5   : > { %s5100_s27 = smov (%p32_p1, %s30_s27), 0  ;;  %p265_p3 = pnand %p3458_p0, %p264_p2 }
   0x6   : > { %p309_p4 = scmp.lt.s32.totalorder (!%p265_p3), %s4021_s24, 1  ;;  %vm980_vm0 = vcmask (!%p265_p3), 1043456   ;;  %vm2807_vm1 = vcmask (!%p265_p3), 1041408   ;;  %vm2655_vm2 = vcmask (!%p265_p3), 1041409   ;;  %vm2657_vm3 = vcmask (!%p265_p3), 1042434  }
   0x7   : > { %268 = sbr.rel (%p265_p3) target bundleno = 872 (0x368), region = 40  ;;  %vm2659_vm4 = vcmask (!%p265_p3), 1043459   ;;  %vm2661_vm5 = vcmask (!%p265_p3), 1044484   ;;  %vm2663_vm6 = vcmask (!%p265_p3), 1045509   ;;  %vm2665_vm7 = vcmask (!%p265_p3), 1046534  }
   0x8   : > { %vm2667_vm8 = vcmask (!%p265_p3), 1047559   ;;  %vm2782_vm9 = vcmask (!%p265_p3), 31744  }
   0xe   : > { %s4094_s28 = scalar_select %p309_p4, %s4021_s24, 1 }
  0x10   : > { %s3499_s29 = sshll.u32 %s4094_s28, 9  ;;  %s5030_s14 = scalar_lea.vmem %s5095_s6, %s4094_s28 }
  0x11   : > { %s4100_s9 = scalar_lea.vmem %s5089_s0, %s3499_s29  ;;  %s5036_s17 = scalar_lea.vmem %s5096_s7, %s4094_s28 }
  0x12   : > { %v3815_v0 = vld [vmem:[%s4100_s9 + $0x20] sm:$0xff]   ;;  %v3816_v2 = vld [vmem:[%s4100_s9 + $0x28] sm:$0xff]   ;;  %v3817_v62 = vld [vmem:[%s4100_s9 + $0x30] sm:$0xff]   ;;  %s3461_s28 = sshll.u32 %s4021_s24, 4 }
  0x13   : > { %v3517_v1 = vld [vmem:[%s4100_s9] sm:$0xff]   ;;  %v3534_v3 = vunpack.c.l.bf16 %v3815_v0  ;;  %v3535_v5 = vunpack.c.h.bf16 %v3815_v0  ;;  %v3812_v7 = vld [vmem:[%s4100_s9 + $0x8] sm:$0xff]   ;;  %v3538_v9 = vunpack.c.l.bf16 %v3816_v2  ;;  %v3539_v44 = vunpack.c.h.bf16 %v3816_v2  ;;  %v3813_v0 = vld [vmem:[%s4100_s9 + $0x10] sm:$0xff]   ;;  %p321_p5 = scmp.lt.s32.totalorder %s3461_s28, 31 }
  0x14   : > { %v3518_v4 = vunpack.c.l.bf16 %v3517_v1  ;;  %v3519_v6 = vunpack.c.h.bf16 %v3517_v1  ;;  %v3819_v8 = vld [vmem:[%s4100_s9 + $0x40] sm:$0xff]   ;;  %v3522_v10 = vunpack.c.l.bf16 %v3812_v7  ;;  %v3523_v49 = vunpack.c.h.bf16 %v3812_v7  ;;  %v3824_v50 = vld [vmem:[%s4100_s9 + $0x68] sm:$0xff]  }
  0x15   : > { %v3551_v11 = vunpack.c.h.bf16 %v3819_v8  ;;  %v732_v12 = vcombine.high %v3534_v3, %v3534_v3  ;;  %v1021_v13 = vsel %vm980_vm0, %v3534_v3, 0.0  ;;  %v733_v16 = vcombine.high %v3535_v5, %v3535_v5  ;;  %v3823_v28 = vld [vmem:[%s4100_s9 + $0x60] sm:$0xff]   ;;  %v3820_v51 = vld [vmem:[%s4100_s9 + $0x48] sm:$0xff]   ;;  %s5102_s28 = smov (!%p321_p5, %s3461_s28), 31 }
  0x16   : > { %v724_v14 = vcombine.high %v3518_v4, %v3518_v4  ;;  %v981_v15 = vsel %vm980_vm0, %v3518_v4, 0.0  ;;  %v1026_v17 = vsel %vm980_vm0, %v3535_v5, 0.0  ;;  %v725_v18 = vcombine.high %v3519_v6, %v3519_v6  ;;  %s3462_s20 = sshll.u32 %s5102_s28, 2 }
  0x17   : > { %v3550_v19 = vunpack.c.l.bf16 %v3819_v8  ;;  %v1022_v20 = vsel %vm980_vm0, %v732_v12, 0.0  ;;  %v986_v22 = vsel %vm980_vm0, %v3519_v6, 0.0  ;;  %v734_v23 = vcombine.high %v3538_v9, %v3538_v9  ;;  %s5053_s22 = scalar_lea.vmem %s5094_s5, %s3462_s20 }
  0x18   : > { %v982_v21 = vsel %vm980_vm0, %v724_v14, 0.0  ;;  %v1023_v24 = vadd.f32 %v1022_v20, %v1021_v13  ;;  %v1027_v26 = vsel %vm980_vm0, %v733_v16, 0.0  ;;  %v987_v27 = vsel %vm980_vm0, %v725_v18, 0.0 }
  0x19   : > { %v983_v25 = vadd.f32 %v982_v21, %v981_v15  ;;  %v1031_v29 = vsel %vm980_vm0, %v3538_v9, 0.0  ;;  %v1032_v30 = vsel %vm980_vm0, %v734_v23, 0.0  ;;  %v726_v31 = vcombine.high %v3522_v10, %v3522_v10 }
  0x1a   : > { %1024 = vadd.xlane.f32.xlu1 %v1023_v24  ;;  %v1028_v32 = vadd.f32 %v1027_v26, %v1026_v17  ;;  %v988_v33 = vadd.f32 %v987_v27, %v986_v22  ;;  %v741_v34 = vcombine.high %v3551_v11, %v3551_v11  ;;  %v991_v35 = vsel %vm980_vm0, %v3522_v10, 0.0 }
  0x1b   : > { %984 = vadd.xlane.f32.xlu0 %v983_v25  ;;  %v992_v36 = vsel %vm980_vm0, %v726_v31, 0.0  ;;  %v740_v37 = vcombine.high %v3550_v19, %v3550_v19  ;;  %v3567_v38 = vunpack.c.h.bf16 %v3823_v28  ;;  %v1033_v39 = vadd.f32 %v1032_v30, %v1031_v29  ;;  %v3825_v30 = vld [vmem:[%s4100_s9 + $0x70] sm:$0xff]  }
  0x1c   : > { %v3566_v40 = vunpack.c.l.bf16 %v3823_v28  ;;  %v1066_v41 = vsel %vm980_vm0, %v3551_v11, 0.0  ;;  %v1067_v42 = vsel %vm980_vm0, %v741_v34, 0.0  ;;  %v993_v45 = vadd.f32 %v992_v36, %v991_v35 }
  0x1d   : > { %v749_v43 = vcombine.high %v3567_v38, %v3567_v38  ;;  %v1061_v46 = vsel %vm980_vm0, %v3550_v19, 0.0  ;;  %v1062_v47 = vsel %vm980_vm0, %v740_v37, 0.0  ;;  %v1068_v52 = vadd.f32 %v1067_v42, %v1066_v41  ;;  %v3818_v42 = vld [vmem:[%s4100_s9 + $0x38] sm:$0xff]  }
  0x1e   : > { %1029 = vadd.xlane.f32.xlu1 %v1028_v32  ;;  %v748_v48 = vcombine.high %v3566_v40, %v3566_v40  ;;  %v1106_v53 = vsel %vm980_vm0, %v3567_v38, 0.0  ;;  %v1063_v54 = vadd.f32 %v1062_v47, %v1061_v46  ;;  %v1101_v56 = vsel %vm980_vm0, %v3566_v40, 0.0  ;;  %v3821_v32 = vld [vmem:[%s4100_s9 + $0x50] sm:$0xff]  }
  0x1f   : > { %989 = vadd.xlane.f32.xlu0 %v988_v33  ;;  %v1107_v55 = vsel %vm980_vm0, %v749_v43, 0.0  ;;  %v735_v57 = vcombine.high %v3539_v44, %v3539_v44  ;;  %v727_v59 = vcombine.high %v3523_v49, %v3523_v49  ;;  %v3570_v60 = vunpack.c.l.bf16 %v3824_v50  ;;  %v3814_v43 = vld [vmem:[%s4100_s9 + $0x18] sm:$0xff]  }
  0x20   : > { %v1102_v58 = vsel %vm980_vm0, %v748_v48, 0.0  ;;  %v3554_v61 = vunpack.c.l.bf16 %v3820_v51  ;;  %v1036_v63 = vsel %vm980_vm0, %v3539_v44, 0.0  ;;  %v1108_v1 = vadd.f32 %v1107_v55, %v1106_v53 }
  0x21   : > { %v1103_v2 = vadd.f32 %v1102_v58, %v1101_v56  ;;  %v1037_v3 = vsel %vm980_vm0, %v735_v57, 0.0  ;;  %v996_v4 = vsel %vm980_vm0, %v3523_v49, 0.0  ;;  %v997_v5 = vsel %vm980_vm0, %v727_v59, 0.0 }
  0x22   : > { %1034 = vadd.xlane.f32.xlu1 %v1033_v39  ;;  %v750_v6 = vcombine.high %v3570_v60, %v3570_v60  ;;  %v742_v7 = vcombine.high %v3554_v61, %v3554_v61  ;;  %v3542_v8 = vunpack.c.l.bf16 %v3817_v62  ;;  %v3526_v9 = vunpack.c.l.bf16 %v3813_v0 }
  0x23   : > { %994 = vadd.xlane.f32.xlu0 %v993_v45  ;;  %v1038_v10 = vadd.f32 %v1037_v3, %v1036_v63  ;;  %v998_v11 = vadd.f32 %v997_v5, %v996_v4  ;;  %v1111_v12 = vsel %vm980_vm0, %v3570_v60, 0.0  ;;  %v1071_v13 = vsel %vm980_vm0, %v3554_v61, 0.0 }
  0x24   : > { %v3571_v14 = vunpack.c.h.bf16 %v3824_v50  ;;  %v1112_v15 = vsel %vm980_vm0, %v750_v6, 0.0  ;;  %v1072_v16 = vsel %vm980_vm0, %v742_v7, 0.0  ;;  %v736_v17 = vcombine.high %v3542_v8, %v3542_v8 }
  0x25   : > { %v3555_v18 = vunpack.c.h.bf16 %v3820_v51  ;;  %v728_v19 = vcombine.high %v3526_v9, %v3526_v9  ;;  %v1113_v20 = vadd.f32 %v1112_v15, %v1111_v12  ;;  %v1073_v21 = vadd.f32 %v1072_v16, %v1071_v13 }
  0x26   : > { %1069 = vadd.xlane.f32.xlu1 %v1068_v52  ;;  %v751_v22 = vcombine.high %v3571_v14, %v3571_v14  ;;  %v3543_v23 = vunpack.c.h.bf16 %v3817_v62  ;;  %v1041_v24 = vsel %vm980_vm0, %v3542_v8, 0.0  ;;  %v1042_v25 = vsel %vm980_vm0, %v736_v17, 0.0  ;;  %v3826_v8 = vld [vmem:[%s4100_s9 + $0x78] sm:$0xff]  }
  0x27   : > { %1064 = vadd.xlane.f32.xlu0 %v1063_v54  ;;  %v743_v26 = vcombine.high %v3555_v18, %v3555_v18  ;;  %v3527_v27 = vunpack.c.h.bf16 %v3813_v0  ;;  %v1001_v28 = vsel %vm980_vm0, %v3526_v9, 0.0  ;;  %v1002_v29 = vsel %vm980_vm0, %v728_v19, 0.0 }
  0x28   : > { %v1116_v31 = vsel %vm980_vm0, %v3571_v14, 0.0  ;;  %v1043_v33 = vadd.f32 %v1042_v25, %v1041_v24  ;;  %v1117_v34 = vsel %vm980_vm0, %v751_v22, 0.0  ;;  %v1076_v35 = vsel %vm980_vm0, %v3555_v18, 0.0 }
  0x29   : > { %v737_v36 = vcombine.high %v3543_v23, %v3543_v23  ;;  %v1003_v37 = vadd.f32 %v1002_v29, %v1001_v28  ;;  %v1077_v38 = vsel %vm980_vm0, %v743_v26, 0.0  ;;  %v729_v39 = vcombine.high %v3527_v27, %v3527_v27 }
  0x2a   : > { %1109 = vadd.xlane.f32.xlu1 %v1108_v1  ;;  %v3574_v40 = vunpack.c.l.bf16 %v3825_v30  ;;  %v3558_v41 = vunpack.c.l.bf16 %v3821_v32  ;;  %v1118_v44 = vadd.f32 %v1117_v34, %v1116_v31  ;;  %v1078_v45 = vadd.f32 %v1077_v38, %v1076_v35 }
  0x2b   : > { %1104 = vadd.xlane.f32.xlu0 %v1103_v2  ;;  %v1046_v46 = vsel %vm980_vm0, %v3543_v23, 0.0  ;;  %v1047_v47 = vsel %vm980_vm0, %v737_v36, 0.0  ;;  %v1006_v48 = vsel %vm980_vm0, %v3527_v27, 0.0  ;;  %v1007_v49 = vsel %vm980_vm0, %v729_v39, 0.0 }
  0x2c   : > { %v752_v50 = vcombine.high %v3574_v40, %v3574_v40  ;;  %v3546_v51 = vunpack.c.l.bf16 %v3818_v42  ;;  %v3530_v52 = vunpack.c.l.bf16 %v3814_v43  ;;  %v744_v53 = vcombine.high %v3558_v41, %v3558_v41 }
  0x2d   : > { %v1048_v54 = vadd.f32 %v1047_v47, %v1046_v46  ;;  %v1008_v55 = vadd.f32 %v1007_v49, %v1006_v48  ;;  %v3575_v56 = vunpack.c.h.bf16 %v3825_v30  ;;  %v1121_v57 = vsel %vm980_vm0, %v3574_v40, 0.0 }
  0x2e   : > { %1039 = vadd.xlane.f32.xlu1 %v1038_v10  ;;  %v1122_v58 = vsel %vm980_vm0, %v752_v50, 0.0  ;;  %v738_v59 = vcombine.high %v3546_v51, %v3546_v51  ;;  %v730_v60 = vcombine.high %v3530_v52, %v3530_v52  ;;  %v1081_v61 = vsel %vm980_vm0, %v3558_v41, 0.0 }
  0x2f   : > { %999 = vadd.xlane.f32.xlu0 %v998_v11  ;;  %v1082_v62 = vsel %vm980_vm0, %v744_v53, 0.0  ;;  %v3559_v63 = vunpack.c.h.bf16 %v3821_v32  ;;  %v1123_v0 = vadd.f32 %v1122_v58, %v1121_v57  ;;  %v1051_v1 = vsel %vm980_vm0, %v3546_v51, 0.0  ;;  %v3822_v11 = vld [vmem:[%s4100_s9 + $0x58] sm:$0xff]   ;;  %v3827_v32 = vld [vmem:[%s4100_s9 + $0x80] sm:$0xff]   ;;  %v3832_v53 = vld [vmem:[%s4100_s9 + $0xa8] sm:$0xff]  }
  0x30   : > { %v1011_v2 = vsel %vm980_vm0, %v3530_v52, 0.0  ;;  %v753_v3 = vcombine.high %v3575_v56, %v3575_v56  ;;  %v1083_v4 = vadd.f32 %v1082_v62, %v1081_v61  ;;  %v1052_v5 = vsel %vm980_vm0, %v738_v59, 0.0 }
  0x31   : > { %v1012_v6 = vsel %vm980_vm0, %v730_v60, 0.0  ;;  %v3547_v7 = vunpack.c.h.bf16 %v3818_v42  ;;  %v745_v9 = vcombine.high %v3559_v63, %v3559_v63  ;;  %v3531_v10 = vunpack.c.h.bf16 %v3814_v43  ;;  %v3831_v43 = vld [vmem:[%s4100_s9 + $0xa0] sm:$0xff]  }
  0x32   : > { %1114 = vadd.xlane.f32.xlu1 %v1113_v20  ;;  %v1053_v12 = vadd.f32 %v1052_v5, %v1051_v1  ;;  %v1013_v13 = vadd.f32 %v1012_v6, %v1011_v2  ;;  %v3578_v14 = vunpack.c.l.bf16 %v3826_v8  ;;  %v1126_v15 = vsel %vm980_vm0, %v3575_v56, 0.0  ;;  %v3835_v2 = vld [vmem:[%s4100_s9 + $0xc0] sm:$0xff]  }
  0x33   : > { %1074 = vadd.xlane.f32.xlu0 %v1073_v21  ;;  %v1127_v16 = vsel %vm980_vm0, %v753_v3, 0.0  ;;  %v739_v17 = vcombine.high %v3547_v7, %v3547_v7  ;;  %v3562_v18 = vunpack.c.l.bf16 %v3822_v11  ;;  %v1086_v19 = vsel %vm980_vm0, %v3559_v63, 0.0 }
  0x34   : > { %v1087_v20 = vsel %vm980_vm0, %v745_v9, 0.0  ;;  %v731_v21 = vcombine.high %v3531_v10, %v3531_v10  ;;  %v1128_v22 = vadd.f32 %v1127_v16, %v1126_v15  ;;  %v754_v23 = vcombine.high %v3578_v14, %v3578_v14 }
  0x35   : > { %v3579_v24 = vunpack.c.h.bf16 %v3826_v8  ;;  %v3563_v25 = vunpack.c.h.bf16 %v3822_v11  ;;  %v1088_v26 = vadd.f32 %v1087_v20, %v1086_v19  ;;  %v1056_v27 = vsel %vm980_vm0, %v3547_v7, 0.0  ;;  %v3839_v11 = vld [vmem:[%s4100_s9 + $0xe0] sm:$0xff]  }
  0x36   : > { %1044 = vadd.xlane.f32.xlu1 %v1043_v33  ;;  %v1057_v28 = vsel %vm980_vm0, %v739_v17, 0.0  ;;  %v746_v29 = vcombine.high %v3562_v18, %v3562_v18  ;;  %v1016_v30 = vsel %vm980_vm0, %v3531_v10, 0.0  ;;  %v1017_v31 = vsel %vm980_vm0, %v731_v21, 0.0 }
  0x37   : > { %1004 = vadd.xlane.f32.xlu0 %v1003_v37  ;;  %v1131_v33 = vsel %vm980_vm0, %v3578_v14, 0.0  ;;  %v1058_v34 = vadd.f32 %v1057_v28, %v1056_v27  ;;  %v1132_v35 = vsel %vm980_vm0, %v754_v23, 0.0  ;;  %v1091_v36 = vsel %vm980_vm0, %v3562_v18, 0.0 }
  0x38   : > { %v755_v37 = vcombine.high %v3579_v24, %v3579_v24  ;;  %v1018_v38 = vadd.f32 %v1017_v31, %v1016_v30  ;;  %v1092_v39 = vsel %vm980_vm0, %v746_v29, 0.0  ;;  %v747_v40 = vcombine.high %v3563_v25, %v3563_v25 }
  0x39   : > { %v3583_v41 = vunpack.c.h.bf16 %v3827_v32  ;;  %v3582_v42 = vunpack.c.l.bf16 %v3827_v32  ;;  %v1136_v46 = vsel %vm980_vm0, %v3579_v24, 0.0  ;;  %v1096_v48 = vsel %vm980_vm0, %v3563_v25, 0.0 }
  0x3a   : > { %1119 = vadd.xlane.f32.xlu1 %v1118_v44  ;;  %v1133_v44 = vadd.f32 %v1132_v35, %v1131_v33  ;;  %v1137_v47 = vsel %vm980_vm0, %v755_v37, 0.0  ;;  %v1097_v49 = vsel %vm980_vm0, %v747_v40, 0.0  ;;  %v3599_v51 = vunpack.c.h.bf16 %v3831_v43 }
  0x3b   : > { %1079 = vadd.xlane.f32.xlu0 %v1078_v45  ;;  %v1093_v45 = vadd.f32 %v1092_v39, %v1091_v36  ;;  %v757_v50 = vcombine.high %v3583_v41, %v3583_v41  ;;  %v3598_v52 = vunpack.c.l.bf16 %v3831_v43  ;;  %v1138_v56 = vadd.f32 %v1137_v47, %v1136_v46  ;;  %v3836_v36 = vld [vmem:[%s4100_s9 + $0xc8] sm:$0xff]   ;;  %v3833_v46 = vld [vmem:[%s4100_s9 + $0xb0] sm:$0xff]  }
  0x3c   : > { %v1098_v57 = vadd.f32 %v1097_v49, %v1096_v48  ;;  %v3602_v58 = vunpack.c.l.bf16 %v3832_v53  ;;  %v1146_v59 = vsel %vm980_vm0, %v3583_v41, 0.0  ;;  %v765_v61 = vcombine.high %v3599_v51, %v3599_v51  ;;  %v3829_v47 = vld [vmem:[%s4100_s9 + $0x90] sm:$0xff]  }
  0x3d   : > { %v1147_v60 = vsel %vm980_vm0, %v757_v50, 0.0  ;;  %v764_v62 = vcombine.high %v3598_v52, %v3598_v52  ;;  %v1141_v63 = vsel %vm980_vm0, %v3582_v42, 0.0  ;;  %v1181_v5 = vsel %vm980_vm0, %v3598_v52, 0.0 }
  0x3e   : > { %1049 = vadd.xlane.f32.xlu1 %v1048_v54  ;;  %v756_v54 = vcombine.high %v3582_v42, %v3582_v42  ;;  %v1148_v3 = vadd.f32 %v1147_v60, %v1146_v59  ;;  %v766_v6 = vcombine.high %v3602_v58, %v3602_v58  ;;  %v1187_v8 = vsel %vm980_vm0, %v765_v61, 0.0 }
  0x3f   : > { %1009 = vadd.xlane.f32.xlu0 %v1008_v55  ;;  %v3828_v55 = vld [vmem:[%s4100_s9 + $0x88] sm:$0xff]   ;;  %v1182_v9 = vsel %vm980_vm0, %v764_v62, 0.0  ;;  %v3615_v10 = vunpack.c.h.bf16 %v3835_v2  ;;  %v3631_v16 = vunpack.c.h.bf16 %v3839_v11  ;;  %v1191_v17 = vsel %vm980_vm0, %v3602_v58, 0.0 }
  0x40   : > { %v3586_v1 = vunpack.c.l.bf16 %v3828_v55  ;;  %v1183_v15 = vadd.f32 %v1182_v9, %v1181_v5  ;;  %v1192_v18 = vsel %vm980_vm0, %v766_v6, 0.0  ;;  %v3630_v20 = vunpack.c.l.bf16 %v3839_v11 }
  0x41   : > { %v773_v19 = vcombine.high %v3615_v10, %v3615_v10  ;;  %v1193_v24 = vadd.f32 %v1192_v18, %v1191_v17  ;;  %v781_v25 = vcombine.high %v3631_v16, %v3631_v16  ;;  %v3587_v27 = vunpack.c.h.bf16 %v3828_v55 }
  0x42   : > { %1124 = vadd.xlane.f32.xlu1 %v1123_v0  ;;  %v1142_v0 = vsel %vm980_vm0, %v756_v54, 0.0  ;;  %v1151_v21 = vsel %vm980_vm0, %v3586_v1, 0.0  ;;  %v1226_v29 = vsel %vm980_vm0, %v3615_v10, 0.0  ;;  %v780_v31 = vcombine.high %v3630_v20, %v3630_v20 }
  0x43   : > { %1084 = vadd.xlane.f32.xlu0 %v1083_v4  ;;  %v1186_v4 = vsel %vm980_vm0, %v3599_v51, 0.0  ;;  %v1143_v7 = vadd.f32 %v1142_v0, %v1141_v63  ;;  %v1227_v30 = vsel %vm980_vm0, %v773_v19, 0.0  ;;  %v1266_v35 = vsel %vm980_vm0, %v3631_v16, 0.0 }
  0x44   : > { %v1188_v14 = vadd.f32 %v1187_v8, %v1186_v4  ;;  %v1228_v37 = vadd.f32 %v1227_v30, %v1226_v29  ;;  %v1261_v39 = vsel %vm980_vm0, %v3630_v20, 0.0  ;;  %v1262_v42 = vsel %vm980_vm0, %v780_v31, 0.0 }
  0x45   : > { %v759_v43 = vcombine.high %v3587_v27, %v3587_v27  ;;  %v1263_v49 = vadd.f32 %v1262_v42, %v1261_v39  ;;  %v1156_v52 = vsel %vm980_vm0, %v3587_v27, 0.0  ;;  %v3606_v55 = vunpack.c.l.bf16 %v3833_v46  ;;  %v3830_v27 = vld [vmem:[%s4100_s9 + $0x98] sm:$0xff]  }
  0x46   : > { %1054 = vadd.xlane.f32.xlu1 %v1053_v12  ;;  %v758_v12 = vcombine.high %v3586_v1, %v3586_v1  ;;  %v3607_v11 = vunpack.c.h.bf16 %v3833_v46 }
  0x47   : > { %1014 = vadd.xlane.f32.xlu0 %v1013_v13  ;;  %v3614_v13 = vunpack.c.l.bf16 %v3835_v2  ;;  %v768_v63 = vcombine.high %v3606_v55, %v3606_v55  ;;  %v1201_v5 = vsel %vm980_vm0, %v3606_v55, 0.0 }
  0x48   : > { %v769_v20 = vcombine.high %v3607_v11, %v3607_v11  ;;  %v1206_v31 = vsel %vm980_vm0, %v3607_v11, 0.0  ;;  %v3847_v11 = vld [vmem:[%s4100_s9 + $0x120] sm:$0xff]  }
  0x49   : > { %v772_v23 = vcombine.high %v3614_v13, %v3614_v13  ;;  %v1221_v32 = vsel %vm980_vm0, %v3614_v13, 0.0  ;;  %v1202_v9 = vsel %vm980_vm0, %v768_v63, 0.0  ;;  %v3591_v13 = vunpack.c.h.bf16 %v3829_v47 }
  0x4a   : > { %1129 = vadd.xlane.f32.xlu1 %v1128_v22  ;;  %v1152_v22 = vsel %vm980_vm0, %v758_v12, 0.0  ;;  %v1203_v16 = vadd.f32 %v1202_v9, %v1201_v5 }
  0x4b   : > { %1089 = vadd.xlane.f32.xlu0 %v1088_v26  ;;  %v3603_v26 = vunpack.c.h.bf16 %v3832_v53  ;;  %v1153_v28 = vadd.f32 %v1152_v22, %v1151_v21  ;;  %v1222_v33 = vsel %vm980_vm0, %v772_v23, 0.0  ;;  %v1157_v53 = vsel %vm980_vm0, %v759_v43, 0.0  ;;  %v3834_v22 = vld [vmem:[%s4100_s9 + $0xb8] sm:$0xff]  }
  0x4c   : > { %v1223_v41 = vadd.f32 %v1222_v33, %v1221_v32  ;;  %v1158_v59 = vadd.f32 %v1157_v53, %v1156_v52  ;;  %v3610_v29 = vunpack.c.l.bf16 %v3834_v22  ;;  %v1207_v32 = vsel %vm980_vm0, %v769_v20, 0.0 }
  0x4d   : > { %v767_v40 = vcombine.high %v3603_v26, %v3603_v26  ;;  %v1196_v50 = vsel %vm980_vm0, %v3603_v26, 0.0 }
  0x4e   : > { %1059 = vadd.xlane.f32.xlu1 %v1058_v34  ;;  %v3840_v34 = vld [vmem:[%s4100_s9 + $0xe8] sm:$0xff]   ;;  %v770_v42 = vcombine.high %v3610_v29, %v3610_v29  ;;  %v1211_v53 = vsel %vm980_vm0, %v3610_v29, 0.0 }
  0x4f   : > { %1019 = vadd.xlane.f32.xlu0 %v1018_v38  ;;  %v1267_v38 = vsel %vm980_vm0, %v781_v25, 0.0  ;;  %v1197_v51 = vsel %vm980_vm0, %v767_v40, 0.0  ;;  %v3635_v60 = vunpack.c.h.bf16 %v3840_v34  ;;  %v761_v25 = vcombine.high %v3591_v13, %v3591_v13  ;;  %v4260_v29 = vld [vmem:[%s4100_s9 + $0x108] sm:$0xff]  }
  0x50   : > { %v1268_v48 = vadd.f32 %v1267_v38, %v1266_v35  ;;  %v1198_v58 = vadd.f32 %v1197_v51, %v1196_v50  ;;  %v1208_v38 = vadd.f32 %v1207_v32, %v1206_v31  ;;  %v3842_v50 = vld [vmem:[%s4100_s9 + $0xf8] sm:$0xff]  }
  0x51   : > { %v1276_v18 = vsel %vm980_vm0, %v3635_v60, 0.0  ;;  %v1167_v35 = vsel %vm980_vm0, %v761_v25, 0.0 }
  0x52   : > { %1134 = vadd.xlane.f32.xlu1 %v1133_v44  ;;  %v3634_v44 = vunpack.c.l.bf16 %v3840_v34  ;;  %v1166_v34 = vsel %vm980_vm0, %v3591_v13, 0.0 }
  0x53   : > { %1094 = vadd.xlane.f32.xlu0 %v1093_v45  ;;  %v3618_v45 = vunpack.c.l.bf16 %v3836_v36  ;;  %v1168_v40 = vadd.f32 %v1167_v35, %v1166_v34  ;;  %v3851_v34 = vld [vmem:[%s4100_s9 + $0x140] sm:$0xff]  }
  0x54   : > { %v782_v54 = vcombine.high %v3634_v44, %v3634_v44  ;;  %v1271_v61 = vsel %vm980_vm0, %v3634_v44, 0.0 }
  0x55   : > { %v1231_v1 = vsel %vm980_vm0, %v3618_v45, 0.0 }
  0x56   : > { %1139 = vadd.xlane.f32.xlu1 %v1138_v56  ;;  %v3590_v56 = vunpack.c.l.bf16 %v3829_v47  ;;  %v1272_v62 = vsel %vm980_vm0, %v782_v54, 0.0  ;;  %v1212_v54 = vsel %vm980_vm0, %v770_v42, 0.0  ;;  %v3650_v42 = vunpack.c.l.bf16 %v4260_v29 }
  0x57   : > { %1099 = vadd.xlane.f32.xlu0 %v1098_v57  ;;  %v774_v57 = vcombine.high %v3618_v45, %v3618_v45  ;;  %v1273_v4 = vadd.f32 %v1272_v62, %v1271_v61  ;;  %v1213_v63 = vadd.f32 %v1212_v54, %v1211_v53 }
  0x58   : > { %v760_v0 = vcombine.high %v3590_v56, %v3590_v56  ;;  %v1161_v6 = vsel %vm980_vm0, %v3590_v56, 0.0  ;;  %v3838_v56 = vld [vmem:[%s4100_s9 + $0xd8] sm:$0xff]  }
  0x59   : > { %v1232_v2 = vsel %vm980_vm0, %v774_v57, 0.0 }
  0x5a   : > { %1149 = vadd.xlane.f32.xlu1 %v1148_v3  ;;  %v3619_v3 = vunpack.c.h.bf16 %v3836_v36  ;;  %v1233_v8 = vadd.f32 %v1232_v2, %v1231_v1  ;;  %v1162_v10 = vsel %vm980_vm0, %v760_v0, 0.0  ;;  %v3626_v0 = vunpack.c.l.bf16 %v3838_v56  ;;  %v3843_v2 = vld [vmem:[%s4100_s9 + $0x100] sm:$0xff]  }
  0x5b   : > { %1144 = vadd.xlane.f32.xlu0 %v1143_v7  ;;  %v783_v7 = vcombine.high %v3635_v60, %v3635_v60  ;;  %v1163_v17 = vadd.f32 %v1162_v10, %v1161_v6  ;;  %v3642_v60 = vunpack.c.l.bf16 %v3842_v50  ;;  %v3643_v1 = vunpack.c.h.bf16 %v3842_v50 }
  0x5c   : > { %v775_v12 = vcombine.high %v3619_v3, %v3619_v3  ;;  %v1236_v23 = vsel %vm980_vm0, %v3619_v3, 0.0  ;;  %v3627_v6 = vunpack.c.h.bf16 %v3838_v56 }
  0x5d   : > { %v1277_v19 = vsel %vm980_vm0, %v783_v7, 0.0  ;;  %v786_v10 = vcombine.high %v3642_v60, %v3642_v60  ;;  %v1296_v31 = vsel %vm980_vm0, %v3643_v1, 0.0 }
  0x5e   : > { %1189 = vadd.xlane.f32.xlu1 %v1188_v14  ;;  %v3841_v14 = vld [vmem:[%s4100_s9 + $0xf0] sm:$0xff]   ;;  %v1256_v32 = vsel %vm980_vm0, %v3627_v6, 0.0 }
  0x5f   : > { %1184 = vadd.xlane.f32.xlu0 %v1183_v15  ;;  %v3837_v15 = vld [vmem:[%s4100_s9 + $0xd0] sm:$0xff]   ;;  %v3638_v21 = vunpack.c.l.bf16 %v3841_v14  ;;  %v3639_v43 = vunpack.c.h.bf16 %v3841_v14 }
  0x60   : > { %v3622_v26 = vunpack.c.l.bf16 %v3837_v15  ;;  %v3623_v47 = vunpack.c.h.bf16 %v3837_v15  ;;  %v3647_v15 = vunpack.c.h.bf16 %v3843_v2 }
  0x61   : > { %v784_v33 = vcombine.high %v3638_v21, %v3638_v21  ;;  %v1281_v39 = vsel %vm980_vm0, %v3638_v21, 0.0  ;;  %v785_v55 = vcombine.high %v3639_v43, %v3639_v43  ;;  %v779_v21 = vcombine.high %v3627_v6, %v3627_v6 }
  0x62   : > { %1194 = vadd.xlane.f32.xlu1 %v1193_v24  ;;  %v1237_v24 = vsel %vm980_vm0, %v775_v12, 0.0  ;;  %v776_v36 = vcombine.high %v3622_v26, %v3622_v26  ;;  %v1241_v44 = vsel %vm980_vm0, %v3622_v26, 0.0  ;;  %v1246_v7 = vsel %vm980_vm0, %v3623_v47, 0.0 }
  0x63   : > { %1154 = vadd.xlane.f32.xlu0 %v1153_v28  ;;  %v1278_v28 = vadd.f32 %v1277_v19, %v1276_v18  ;;  %v1238_v30 = vadd.f32 %v1237_v24, %v1236_v23  ;;  %v1287_v5 = vsel %vm980_vm0, %v785_v55, 0.0  ;;  %v787_v18 = vcombine.high %v3643_v1, %v3643_v1  ;;  %v3848_v24 = vld [vmem:[%s4100_s9 + $0x128] sm:$0xff]  }
  0x64   : > { %v1242_v45 = vsel %vm980_vm0, %v776_v36, 0.0  ;;  %v3646_v19 = vunpack.c.l.bf16 %v3843_v2  ;;  %v3662_v23 = vunpack.c.l.bf16 %v3847_v11 }
  0x65   : > { %v1243_v52 = vadd.f32 %v1242_v45, %v1241_v44  ;;  %v1297_v36 = vsel %vm980_vm0, %v787_v18, 0.0  ;;  %v1306_v44 = vsel %vm980_vm0, %v3647_v15, 0.0  ;;  %v3679_v45 = vunpack.c.h.bf16 %v3851_v34  ;;  %v3849_v18 = vld [vmem:[%s4100_s9 + $0x130] sm:$0xff]  }
  0x66   : > { %1229 = vadd.xlane.f32.xlu1 %v1228_v37  ;;  %v3594_v37 = vunpack.c.l.bf16 %v3830_v27  ;;  %v1301_v50 = vsel %vm980_vm0, %v3646_v19, 0.0 }
  0x67   : > { %1224 = vadd.xlane.f32.xlu0 %v1223_v41  ;;  %v1282_v41 = vsel %vm980_vm0, %v784_v33, 0.0  ;;  %v789_v33 = vcombine.high %v3647_v15, %v3647_v15 }
  0x68   : > { %v762_v46 = vcombine.high %v3594_v37, %v3594_v37  ;;  %v1283_v51 = vadd.f32 %v1282_v41, %v1281_v39  ;;  %v1171_v57 = vsel %vm980_vm0, %v3594_v37, 0.0  ;;  %v788_v37 = vcombine.high %v3646_v19, %v3646_v19 }
  0x69   : > { %v1257_v39 = vsel %vm980_vm0, %v779_v21, 0.0  ;;  %v796_v41 = vcombine.high %v3662_v23, %v3662_v23 }
  0x6a   : > { %1269 = vadd.xlane.f32.xlu1 %v1268_v48  ;;  %v3611_v48 = vunpack.c.h.bf16 %v3834_v22  ;;  %v3663_v22 = vunpack.c.h.bf16 %v3847_v11  ;;  %v1302_v53 = vsel %vm980_vm0, %v788_v37, 0.0 }
  0x6b   : > { %1264 = vadd.xlane.f32.xlu0 %v1263_v49  ;;  %v3595_v49 = vunpack.c.h.bf16 %v3830_v27  ;;  %v1291_v27 = vsel %vm980_vm0, %v3642_v60, 0.0  ;;  %v805_v60 = vcombine.high %v3679_v45, %v3679_v45  ;;  %v1303_v1 = vadd.f32 %v1302_v53, %v1301_v50 }
  0x6c   : > { %v771_v61 = vcombine.high %v3611_v48, %v3611_v48  ;;  %v1216_v9 = vsel %vm980_vm0, %v3611_v48, 0.0  ;;  %v1298_v48 = vadd.f32 %v1297_v36, %v1296_v31  ;;  %v1346_v54 = vsel %vm980_vm0, %v3663_v22, 0.0  ;;  %v1877_v36 = vld [vmem:[%s5090_s1] sm:$0x3] }
  0x6d   : > { %v763_v62 = vcombine.high %v3595_v49, %v3595_v49  ;;  %v1176_v13 = vsel %vm980_vm0, %v3595_v49, 0.0  ;;  %v1307_v49 = vsel %vm980_vm0, %v789_v33, 0.0  ;;  %3973 = vmatprep.subr.msk.bf16.mxu0 %vm2807_vm1, %v1877_v36 }
  0x6e   : > { %1199 = vadd.xlane.f32.xlu1 %v1198_v58  ;;  %v1172_v58 = vsel %vm980_vm0, %v762_v46, 0.0  ;;  %v1217_v12 = vsel %vm980_vm0, %v771_v61, 0.0  ;;  %v3678_v46 = vunpack.c.l.bf16 %v3851_v34 }
  0x6f   : > { %1159 = vadd.xlane.f32.xlu0 %v1158_v59  ;;  %v777_v59 = vcombine.high %v3623_v47, %v3623_v47  ;;  %v1173_v3 = vadd.f32 %v1172_v58, %v1171_v57  ;;  %v1177_v14 = vsel %vm980_vm0, %v763_v62, 0.0  ;;  %v1218_v25 = vadd.f32 %v1217_v12, %v1216_v9  ;;  %v3856_v12 = vld [vmem:[%s4100_s9 + $0x168] sm:$0xff]  }
  0x70   : > { %v1178_v26 = vadd.f32 %v1177_v14, %v1176_v13  ;;  %v1341_v57 = vsel %vm980_vm0, %v3662_v23, 0.0  ;;  %v1342_v58 = vsel %vm980_vm0, %v796_v41, 0.0  ;;  %v804_v61 = vcombine.high %v3678_v46, %v3678_v46  ;;  %v3852_v13 = vld [vmem:[%s4100_s9 + $0x148] sm:$0xff]   ;;  %v3845_v23 = vld [vmem:[%s4100_s9 + $0x110] sm:$0xff]  }
  0x71   : > { %v2141_v62 = vlaneseq  ;;  %v1381_v11 = vsel %vm980_vm0, %v3678_v46, 0.0  ;;  %v1387_v14 = vsel %vm980_vm0, %v805_v60, 0.0 }
  0x72   : > { %1274 = vadd.xlane.f32.xlu1 %v1273_v4  ;;  %v1286_v4 = vsel %vm980_vm0, %v3639_v43, 0.0  ;;  %v1382_v15 = vsel %vm980_vm0, %v804_v61, 0.0 }
  0x73   : > { %1234 = vadd.xlane.f32.xlu0 %v1233_v8  ;;  %v1247_v8 = vsel %vm980_vm0, %v777_v59, 0.0  ;;  %v790_v59 = vcombine.high %v3650_v42, %v3650_v42 }
  0x74   : > { %v1248_v20 = vadd.f32 %v1247_v8, %v1246_v7  ;;  %v1311_v8 = vsel %vm980_vm0, %v3650_v42, 0.0 }
  0x75   : > { %v1312_v9 = vsel %vm980_vm0, %v790_v59, 0.0 }
  0x76   : > { %1204 = vadd.xlane.f32.xlu1 %v1203_v16  ;;  %v1288_v16 = vadd.f32 %v1287_v5, %v1286_v4  ;;  %v4281_v5 = vadd.f32 %v1342_v58, %v1341_v57  ;;  %v3853_v57 = vld [vmem:[%s4100_s9 + $0x150] sm:$0xff]   ;;  %v3850_v58 = vld [vmem:[%s4100_s9 + $0x138] sm:$0xff]  }
  0x77   : > { %1164 = vadd.xlane.f32.xlu0 %v1163_v17  ;;  %v778_v17 = vcombine.high %v3626_v0, %v3626_v0 }
  0x79   : > { %v1252_v35 = vsel %vm980_vm0, %v778_v17, 0.0 }
  0x7a   : > { %1279 = vadd.xlane.f32.xlu1 %v1278_v28  ;;  %v1292_v28 = vsel %vm980_vm0, %v786_v10, 0.0  ;;  %v1386_v10 = vsel %vm980_vm0, %v3679_v45, 0.0 }
  0x7b   : > { %1239 = vadd.xlane.f32.xlu0 %v1238_v30  ;;  %v1251_v30 = vsel %vm980_vm0, %v3626_v0, 0.0  ;;  %v1293_v43 = vadd.f32 %v1292_v28, %v1291_v27  ;;  %v1308_v0 = vadd.f32 %v1307_v49, %v1306_v44  ;;  %v3682_v27 = vunpack.c.l.bf16 %v3852_v13 }
  0x7c   : > { %v1253_v47 = vadd.f32 %v1252_v35, %v1251_v30  ;;  %v4302_v28 = vadd.f32 %v1387_v14, %v1386_v10  ;;  %v4304_v30 = vadd.f32 %v1382_v15, %v1381_v11  ;;  %v3654_v35 = vunpack.c.l.bf16 %v3845_v23 }
  0x7d   : > { %v1391_v60 = vsel %vm980_vm0, %v3682_v27, 0.0 }
  0x7e   : > { %1209 = vadd.xlane.f32.xlu1 %v1208_v38  ;;  %v3666_v38 = vunpack.c.l.bf16 %v3848_v24  ;;  %v792_v50 = vcombine.high %v3654_v35, %v3654_v35 }
  0x7f   : > { %1169 = vadd.xlane.f32.xlu0 %v1168_v40  ;;  %v797_v40 = vcombine.high %v3663_v22, %v3663_v22  ;;  %v3651_v22 = vunpack.c.h.bf16 %v4260_v29 }
  0x80   : > { %v798_v55 = vcombine.high %v3666_v38, %v3666_v38  ;;  %v1351_v6 = vsel %vm980_vm0, %v3666_v38, 0.0 }
  0x81   : > { %v1347_v56 = vsel %vm980_vm0, %v797_v40, 0.0  ;;  %v3699_v40 = vunpack.c.h.bf16 %v3856_v12  ;;  %v1316_v45 = vsel %vm980_vm0, %v3651_v22, 0.0 }
  0x82   : > { %1284 = vadd.xlane.f32.xlu1 %v1283_v51  ;;  %v3855_v51 = vld [vmem:[%s4100_s9 + $0x160] sm:$0xff]   ;;  %v4279_v4 = vadd.f32 %v1347_v56, %v1346_v54  ;;  %v1352_v7 = vsel %vm980_vm0, %v798_v55, 0.0  ;;  %v3671_v56 = vunpack.c.h.bf16 %v3849_v18 }
  0x83   : > { %1244 = vadd.xlane.f32.xlu0 %v1243_v52  ;;  %v1258_v52 = vadd.f32 %v1257_v39, %v1256_v32  ;;  %v3694_v2 = vunpack.c.l.bf16 %v3855_v51  ;;  %v4294_v19 = vadd.f32 %v1352_v7, %v1351_v6  ;;  %v3670_v32 = vunpack.c.l.bf16 %v3849_v18 }
  0x84   : > { %v791_v39 = vcombine.high %v3651_v22, %v3651_v22  ;;  %v815_v55 = vcombine.high %v3699_v40, %v3699_v40  ;;  %v1322_v6 = vsel %vm980_vm0, %v792_v50, 0.0  ;;  %v1436_v10 = vsel %vm980_vm0, %v3699_v40, 0.0 }
  0x85   : > { %v1421_v29 = vsel %vm980_vm0, %v3694_v2, 0.0  ;;  %v800_v46 = vcombine.high %v3670_v32, %v3670_v32 }
  0x86   : > { %1214 = vadd.xlane.f32.xlu1 %v1213_v63  ;;  %v3695_v63 = vunpack.c.h.bf16 %v3855_v51  ;;  %v3683_v51 = vunpack.c.h.bf16 %v3852_v13  ;;  %v1317_v53 = vsel %vm980_vm0, %v791_v39, 0.0  ;;  %v1437_v11 = vsel %vm980_vm0, %v815_v55, 0.0 }
  0x87   : > { %1174 = vadd.xlane.f32.xlu0 %v1173_v3  ;;  %v3667_v3 = vunpack.c.h.bf16 %v3848_v24  ;;  %v4298_v24 = vadd.f32 %v1312_v9, %v1311_v8  ;;  %v3686_v8 = vunpack.c.l.bf16 %v3853_v57  ;;  %v3674_v9 = vunpack.c.l.bf16 %v3850_v58 }
  0x88   : > { %v813_v17 = vcombine.high %v3695_v63, %v3695_v63  ;;  %v1426_v31 = vsel %vm980_vm0, %v3695_v63, 0.0  ;;  %v3846_v63 = vld [vmem:[%s4100_s9 + $0x118] sm:$0xff]   ;;  %v807_v7 = vcombine.high %v3683_v51, %v3683_v51  ;;  %v3675_v39 = vunpack.c.h.bf16 %v3850_v58 }
  0x89   : > { %v799_v21 = vcombine.high %v3667_v3, %v3667_v3  ;;  %v1356_v34 = vsel %vm980_vm0, %v3667_v3, 0.0  ;;  %v3658_v13 = vunpack.c.l.bf16 %v3846_v63  ;;  %v3659_v40 = vunpack.c.h.bf16 %v3846_v63 }
  0x8a   : > { %1289 = vadd.xlane.f32.xlu1 %v1288_v16  ;;  %v2142_v16 = vand.u32 127, %v2141_v62  ;;  %v1427_v33 = vsel %vm980_vm0, %v813_v17, 0.0  ;;  %v1396_v17 = vsel %vm980_vm0, %v3683_v51, 0.0  ;;  %v1397_v22 = vsel %vm980_vm0, %v807_v7, 0.0 }
  0x8b   : > { %1249 = vadd.xlane.f32.xlu0 %v1248_v20  ;;  %v812_v20 = vcombine.high %v3694_v2, %v3694_v2  ;;  %v1357_v38 = vsel %vm980_vm0, %v799_v21, 0.0  ;;  %v4318_v44 = vadd.f32 %v1427_v33, %v1426_v31  ;;  %v3655_v2 = vunpack.c.h.bf16 %v3845_v23 }
  0x8c   : > { %v4323_v49 = vadd.f32 %v1357_v38, %v1356_v34  ;;  %v4355_v21 = vadd.f32 %v1437_v11, %v1436_v10  ;;  %v808_v23 = vcombine.high %v3686_v8, %v3686_v8  ;;  %v1401_v34 = vsel %vm980_vm0, %v3686_v8, 0.0  ;;  %v3863_v8 = vld [vmem:[%s4100_s9 + $0x1a0] sm:$0xff]  }
  0x8d   : > { %v1422_v37 = vsel %vm980_vm0, %v812_v20, 0.0  ;;  %v793_v18 = vcombine.high %v3655_v2, %v3655_v2  ;;  %v1326_v33 = vsel %vm980_vm0, %v3655_v2, 0.0  ;;  %v803_v58 = vcombine.high %v3675_v39, %v3675_v39 }
  0x8e   : > { %1219 = vadd.xlane.f32.xlu1 %v1218_v25  ;;  %v4300_v25 = vshrl.u32 %v2141_v62, 7  ;;  %v1361_v62 = vsel %vm980_vm0, %v3670_v32, 0.0  ;;  %v1376_v10 = vsel %vm980_vm0, %v3675_v39, 0.0  ;;  %v1336_v11 = vsel %vm980_vm0, %v3659_v40, 0.0 }
  0x8f   : > { %1179 = vadd.xlane.f32.xlu0 %v1178_v26  ;;  %v3698_v26 = vunpack.c.l.bf16 %v3856_v12  ;;  %v801_v12 = vcombine.high %v3671_v56, %v3671_v56 }
  0x90   : > { %v4316_v41 = vsub.s32 %v2142_v16, %v4300_v25  ;;  %vm3199_vm10 = vcmp.lt.s32.totalorder %v4300_v25, 2 }
  0x91   : > { %v814_v42 = vcombine.high %v3698_v26, %v3698_v26  ;;  %v1431_v54 = vsel %vm980_vm0, %v3698_v26, 0.0  ;;  %v802_v26 = vcombine.high %v3674_v9, %v3674_v9  ;;  %v1367_v31 = vsel %vm980_vm0, %v801_v12, 0.0 }
  0x92   : > { %1294 = vadd.xlane.f32.xlu1 %v1293_v43  ;;  %v806_v43 = vcombine.high %v3682_v27, %v3682_v27  ;;  %v1366_v27 = vsel %vm980_vm0, %v3671_v56, 0.0 }
  0x93   : > { %1254 = vadd.xlane.f32.xlu0 %v1253_v47  ;;  %v2809_v47 = vsel %vm2807_vm1, %v1877_v36, 0  ;;  %v1432_v59 = vsel %vm980_vm0, %v814_v42, 0.0  ;;  %v3854_v36 = vld [vmem:[%s4100_s9 + $0x158] sm:$0xff]  }
  0x94   : > { %3908 = vmatpush3.bf16.msra.mxu0 %v2809_v47  ;;  %v1392_v61 = vsel %vm980_vm0, %v806_v43, 0.0  ;;  %v1372_v47 = vsel %vm980_vm0, %v802_v26, 0.0  ;;  %v3691_v12 = vunpack.c.h.bf16 %v3854_v36 }
  0x95   : > { %v4346_v14 = vadd.f32 %v1392_v61, %v1391_v60 }
  0x96   : > { %1299 = vadd.xlane.f32.xlu1 %v1298_v48  ;;  %v4321_v48 = vadd.f32 %v1422_v37, %v1421_v29  ;;  %v1327_v37 = vsel %vm980_vm0, %v793_v18, 0.0 }
  0x97   : > { %1259 = vadd.xlane.f32.xlu0 %v1258_v52  ;;  %v3857_v52 = vld [vmem:[%s4100_s9 + $0x170] sm:$0xff]   ;;  %v4382_v55 = vadd.f32 %v1327_v37, %v1326_v33  ;;  %v4428_v37 = vld [vmem:[%s4100_s9 + $0x188] sm:$0xff]  }
  0x98   : > { %v3702_v3 = vunpack.c.l.bf16 %v3857_v52  ;;  %v3703_v32 = vunpack.c.h.bf16 %v3857_v52  ;;  %v3690_v52 = vunpack.c.l.bf16 %v3854_v36  ;;  %v3864_v36 = vld [vmem:[%s4100_s9 + $0x1a8] sm:$0xff]  }
  0x9a   : > { %1309 = vadd.xlane.f32.xlu1 %v1308_v0  ;;  %v1362_v0 = vsel %vm980_vm0, %v800_v46, 0.0  ;;  %v816_v20 = vcombine.high %v3702_v3, %v3702_v3  ;;  %v1441_v29 = vsel %vm980_vm0, %v3702_v3, 0.0  ;;  %v1371_v46 = vsel %vm980_vm0, %v3674_v9, 0.0 }
  0x9b   : > { %1304 = vadd.xlane.f32.xlu0 %v1303_v1  ;;  %v1321_v1 = vsel %vm980_vm0, %v3654_v35, 0.0  ;;  %v4348_v15 = vadd.f32 %v1362_v0, %v1361_v62  ;;  %v3687_v35 = vunpack.c.h.bf16 %v3853_v57  ;;  %v817_v51 = vcombine.high %v3703_v32, %v3703_v32 }
  0x9c   : > { %v4352_v16 = vadd.f32 %v1322_v6, %v1321_v1  ;;  %v1442_v38 = vsel %vm980_vm0, %v816_v20, 0.0  ;;  %v4394_v0 = vadd.f32 %v1372_v47, %v1371_v46  ;;  %v810_v7 = vcombine.high %v3690_v52, %v3690_v52  ;;  %v3871_v47 = vld [vmem:[%s4100_s9 + $0x1e0] sm:$0xff]  }
  0x9d   : > { %v809_v56 = vcombine.high %v3687_v35, %v3687_v35  ;;  %v4386_v57 = vadd.f32 %v1442_v38, %v1441_v29  ;;  %v1447_v3 = vsel %vm980_vm0, %v817_v51, 0.0  ;;  %v1406_v6 = vsel %vm980_vm0, %v3687_v35, 0.0  ;;  %v3867_v38 = vld [vmem:[%s4100_s9 + $0x1c0] sm:$0xff]  }
  0x9e   : > { %1349 = vadd.xlane.f32.xlu1 %v4279_v4  ;;  %v4342_v4 = vadd.f32 %v1317_v53, %v1316_v45  ;;  %v1402_v45 = vsel %vm980_vm0, %v808_v23, 0.0  ;;  %v4378_v53 = vadd.f32 %v1397_v22, %v1396_v17  ;;  %v811_v35 = vcombine.high %v3691_v12, %v3691_v12 }
  0x9f   : > { %1344 = vadd.xlane.f32.xlu0 %v4281_v5  ;;  %v4344_v5 = vadd.f32 %v1432_v59, %v1431_v54  ;;  %v4380_v54 = vadd.f32 %v1367_v31, %v1366_v27  ;;  %v795_v59 = vcombine.high %v3659_v40, %v3659_v40  ;;  %v4392_v63 = vadd.f32 %v1402_v45, %v1401_v34 }
  0xa0   : > { %v1407_v9 = vsel %vm980_vm0, %v809_v56, 0.0  ;;  %v3727_v31 = vunpack.c.h.bf16 %v3863_v8  ;;  %v1416_v51 = vsel %vm980_vm0, %v3691_v12, 0.0 }
  0xa1   : > { %v1337_v17 = vsel %vm980_vm0, %v795_v59, 0.0  ;;  %v4420_v33 = vadd.f32 %v1407_v9, %v1406_v6  ;;  %v3714_v59 = vunpack.c.l.bf16 %v4428_v37 }
  0xa2   : > { %1354 = vadd.xlane.f32.xlu1 %v4294_v19  ;;  %v794_v19 = vcombine.high %v3658_v13, %v3658_v13  ;;  %v4424_v34 = vadd.f32 %v1337_v17, %v1336_v11  ;;  %v1506_v12 = vsel %vm980_vm0, %v3727_v31, 0.0 }
  0xa3   : > { %1314 = vadd.xlane.f32.xlu0 %v4298_v24  ;;  %v3858_v24 = vld [vmem:[%s4100_s9 + $0x178] sm:$0xff]  }
  0xa4   : > { %v3706_v50 = vunpack.c.l.bf16 %v3858_v24  ;;  %v3707_v60 = vunpack.c.h.bf16 %v3858_v24  ;;  %v1412_v24 = vsel %vm980_vm0, %v810_v7, 0.0 }
  0xa6   : > { %1389 = vadd.xlane.f32.xlu1 %v4302_v28  ;;  %v1331_v28 = vsel %vm980_vm0, %v3658_v13, 0.0  ;;  %v818_v2 = vcombine.high %v3706_v50, %v3706_v50  ;;  %v1377_v13 = vsel %vm980_vm0, %v803_v58, 0.0  ;;  %v819_v18 = vcombine.high %v3707_v60, %v3707_v60 }
  0xa7   : > { %1384 = vadd.xlane.f32.xlu0 %v4304_v30  ;;  %v4369_v42 = vpop.xlane.xlu1 %1024  ;;  %v1332_v30 = vsel %vm980_vm0, %v794_v19, 0.0  ;;  %v1451_v26 = vsel %vm980_vm0, %v3706_v50, 0.0  ;;  %v4422_v29 = vadd.f32 %v1377_v13, %v1376_v10  ;;  %v1456_v40 = vsel %vm980_vm0, %v3707_v60, 0.0 }
  0xa8   : > { %v4371_v43 = vpop.xlane.xlu0 %984  ;;  %v4396_v1 = vadd.f32 %v1332_v30, %v1331_v28  ;;  %v1452_v27 = vsel %vm980_vm0, %v818_v2, 0.0  ;;  %v1457_v45 = vsel %vm980_vm0, %v819_v18, 0.0  ;;  %v3730_v58 = vunpack.c.l.bf16 %v3864_v36 }
  0xa9   : > { %v4432_v39 = vadd.f32 %v1452_v27, %v1451_v26  ;;  %v3743_v60 = vunpack.c.h.bf16 %v3867_v38  ;;  %v4446_v2 = vadd.f32 %v1457_v45, %v1456_v40 }
  0xaa   : > { %1429 = vadd.xlane.f32.xlu1 %v4318_v44  ;;  %v3859_v44 = vld [vmem:[%s4100_s9 + $0x180] sm:$0xff]   ;;  %v830_v18 = vcombine.high %v3730_v58, %v3730_v58 }
  0xab   : > { %1424 = vadd.xlane.f32.xlu0 %v4321_v48  ;;  %v4388_v61 = vpop.xlane.xlu1 %1029  ;;  %v1446_v48 = vsel %vm980_vm0, %v3703_v32, 0.0  ;;  %v3711_v20 = vunpack.c.h.bf16 %v3859_v44  ;;  %v1411_v32 = vsel %vm980_vm0, %v3690_v52, 0.0  ;;  %v837_v26 = vcombine.high %v3743_v60, %v3743_v60 }
  0xac   : > { %v4390_v62 = vpop.xlane.xlu0 %989  ;;  %v4416_v19 = vadd.f32 %v1447_v3, %v1446_v48  ;;  %v4442_v30 = vadd.f32 %v1412_v24, %v1411_v32  ;;  %v3759_v48 = vunpack.c.h.bf16 %v3871_v47 }
  0xad   : > { %v821_v46 = vcombine.high %v3711_v20, %v3711_v20  ;;  %v1466_v3 = vsel %vm980_vm0, %v3711_v20, 0.0  ;;  %v822_v20 = vcombine.high %v3714_v59, %v3714_v59 }
  0xae   : > { %1359 = vadd.xlane.f32.xlu1 %v4323_v49  ;;  %v3710_v49 = vunpack.c.l.bf16 %v3859_v44  ;;  %v1417_v44 = vsel %vm980_vm0, %v811_v35, 0.0  ;;  %v845_v32 = vcombine.high %v3759_v48, %v3759_v48 }
  0xaf   : > { %1319 = vadd.xlane.f32.xlu0 %v4342_v4  ;;  %v4410_v22 = vpop.xlane.xlu1 %1034  ;;  %v3726_v4 = vunpack.c.l.bf16 %v3863_v8  ;;  %v1467_v6 = vsel %vm980_vm0, %v821_v46, 0.0  ;;  %v3758_v8 = vunpack.c.l.bf16 %v3871_v47  ;;  %v4463_v27 = vadd.f32 %v1417_v44, %v1416_v51  ;;  %v4483_v51 = vld [vmem:[%s4100_s9 + $0x1e8] sm:$0xff]  }
  0xb0   : > { %v4412_v23 = vpop.xlane.xlu0 %994  ;;  %v820_v52 = vcombine.high %v3710_v49, %v3710_v49  ;;  %v1461_v7 = vsel %vm980_vm0, %v3710_v49, 0.0  ;;  %v1511_v46 = vsel %vm980_vm0, %v3730_v58, 0.0  ;;  %v1471_v47 = vsel %vm980_vm0, %v3714_v59, 0.0 }
  0xb1   : > { %v828_v56 = vcombine.high %v3726_v4, %v3726_v4  ;;  %v844_v35 = vcombine.high %v3758_v8, %v3758_v8  ;;  %v1586_v44 = vsel %vm980_vm0, %v3759_v48, 0.0  ;;  %v1587_v58 = vsel %vm980_vm0, %v845_v32, 0.0 }
  0xb2   : > { %1434 = vadd.xlane.f32.xlu1 %v4344_v5  ;;  %v829_v5 = vcombine.high %v3727_v31, %v3727_v31  ;;  %v1462_v11 = vsel %vm980_vm0, %v820_v52, 0.0  ;;  %v1512_v52 = vsel %vm980_vm0, %v830_v18, 0.0  ;;  %v1581_v59 = vsel %vm980_vm0, %v3758_v8, 0.0 }
  0xb3   : > { %1394 = vadd.xlane.f32.xlu0 %v4346_v14  ;;  %v4438_v50 = vpop.xlane.xlu1 %1069  ;;  %v3742_v14 = vunpack.c.l.bf16 %v3867_v38  ;;  %v1502_v17 = vsel %vm980_vm0, %v828_v56, 0.0  ;;  %v4468_v24 = vadd.f32 %v1462_v11, %v1461_v7  ;;  %v3762_v7 = vunpack.c.l.bf16 %v4483_v51 }
  0xb4   : > { %v4440_v28 = vpop.xlane.xlu0 %1064  ;;  %v1507_v13 = vsel %vm980_vm0, %v829_v5, 0.0  ;;  %v1622_v11 = vmul.f32 0.00390625, %v4390_v62  ;;  %v4502_v8 = vadd.f32 %v1512_v52, %v1511_v46 }
  0xb5   : > { %v836_v49 = vcombine.high %v3742_v14, %v3742_v14  ;;  %v4470_v31 = vadd.f32 %v1507_v13, %v1506_v12  ;;  %v1541_v5 = vsel %vm980_vm0, %v3742_v14, 0.0  ;;  %v1630_v14 = vmul.f32 0.00390625, %v4388_v61  ;;  %v4512_v61 = vld [vmem:[%s4100_s9 + $0x1c8] sm:$0xff]  }
  0xb6   : > { %1364 = vadd.xlane.f32.xlu1 %v4348_v15  ;;  %v1501_v15 = vsel %vm980_vm0, %v3726_v4, 0.0  ;;  %v3731_v4 = vunpack.c.h.bf16 %v3864_v36  ;;  %v1472_v36 = vsel %vm980_vm0, %v822_v20, 0.0  ;;  %v1629_v13 = vmul.f32 0.00390625, %v4369_v42 }
  0xb7   : > { %1324 = vadd.xlane.f32.xlu0 %v4352_v16  ;;  %v4454_v9 = vpop.xlane.xlu1 %1109  ;;  %v4465_v16 = vadd.f32 %v1467_v6, %v1466_v3  ;;  %v4477_v45 = vadd.f32 %v1502_v17, %v1501_v15  ;;  %v1542_v56 = vsel %vm980_vm0, %v836_v49, 0.0  ;;  %v3715_v6 = vunpack.c.h.bf16 %v4428_v37  ;;  %v4525_v49 = vld [vmem:[%s4100_s9 + $0x1b0] sm:$0xff]  }
  0xb8   : > { %v4456_v10 = vpop.xlane.xlu0 %1104  ;;  %v831_v3 = vcombine.high %v3731_v4, %v3731_v4  ;;  %v1621_v37 = vmul.f32 0.00390625, %v4371_v43  ;;  %v1631_v15 = vmul.f32 0.00390625, %v4410_v22  ;;  %v4514_v62 = vadd.f32 %v1542_v56, %v1541_v5 }
  0xb9   : > { %v1516_v20 = vsel %vm980_vm0, %v3731_v4, 0.0  ;;  %v1476_v43 = vsel %vm980_vm0, %v3715_v6, 0.0  ;;  %v846_v22 = vcombine.high %v3762_v7, %v3762_v7  ;;  %v1758_v32 = vpack.c.bf16 %v1630_v14, %v1630_v14 }
  0xba   : > { %1439 = vadd.xlane.f32.xlu1 %v4355_v21  ;;  %v1546_v21 = vsel %vm980_vm0, %v3743_v60, 0.0  ;;  %v1582_v60 = vsel %vm980_vm0, %v844_v35, 0.0  ;;  %v1517_v42 = vsel %vm980_vm0, %v831_v3, 0.0  ;;  %v1750_v35 = vpack.c.bf16 %v1622_v11, %v1622_v11 }
  0xbb   : > { %1399 = vadd.xlane.f32.xlu0 %v4378_v53  ;;  %v4473_v38 = vpop.xlane.xlu1 %1039  ;;  %v1547_v53 = vsel %vm980_vm0, %v837_v26, 0.0  ;;  %v4518_v18 = vadd.f32 %v1582_v60, %v1581_v59  ;;  %v823_v26 = vcombine.high %v3715_v6, %v3715_v6  ;;  %v4532_v4 = vunpack.c.l.bf16 %v4512_v61 }
  0xbc   : > { %v4475_v40 = vpop.xlane.xlu0 %999  ;;  %v4509_v17 = vadd.f32 %v1547_v53, %v1546_v21  ;;  %v4529_v21 = vsel %vm980_vm0, %v3762_v7, 0.0  ;;  %v1749_v52 = vpack.c.bf16 %v1621_v37, %v1621_v37  ;;  %v1623_v53 = vmul.f32 0.00390625, %v4412_v23 }
  0xbd   : > { %v1638_v5 = vmul.f32 0.00390625, %v4438_v50  ;;  %v1637_v56 = vmul.f32 0.00390625, %v4440_v28  ;;  %v1645_v59 = vmul.f32 0.00390625, %v4456_v10  ;;  %v1477_v60 = vsel %vm980_vm0, %v823_v26, 0.0 }
  0xbe   : > { %1369 = vadd.xlane.f32.xlu1 %v4380_v54  ;;  %v4504_v54 = vadd.f32 %v1472_v36, %v1471_v47  ;;  %v1759_v36 = vpack.c.bf16 %v1631_v15, %v1631_v15  ;;  %v4547_v23 = vsel %vm980_vm0, %v846_v22, 0.0  ;;  %v2022_v3 = vunpack.c.l.b16 %v1758_v32 }
  0xbf   : > { %1329 = vadd.xlane.f32.xlu0 %v4382_v55  ;;  %v1115_v48 = vpop.xlane.xlu1 %1114  ;;  %v4516_v55 = vadd.f32 %v1587_v58, %v1586_v44  ;;  %v4540_v44 = vunpack.c.l.bf16 %v4525_v49  ;;  %v1646_v58 = vmul.f32 0.00390625, %v4454_v9  ;;  %v2014_v50 = vunpack.c.l.b16 %v1750_v35 }
  0xc0   : > { %v4500_v12 = vpop.xlane.xlu0 %1074  ;;  %v1632_v28 = vmul.f32 0.00390625, %v4473_v38  ;;  %v1624_v6 = vmul.f32 0.00390625, %v4475_v40  ;;  %v2013_v11 = vunpack.c.l.b16 %v1749_v52  ;;  %v2023_v10 = vunpack.c.l.b16 %v1759_v36 }
  0xc1   : > { %v1765_v37 = vpack.c.bf16 %v1637_v56, %v1637_v56  ;;  %v4552_v15 = vadd.f32 %v1477_v60, %v1476_v43  ;;  %v1773_v26 = vpack.c.bf16 %v1645_v59, %v1645_v59  ;;  %v1647_v38 = vmul.f32 0.00390625, %v1115_v48 }
  0xc2   : > { %1444 = vadd.xlane.f32.xlu1 %v4386_v57  ;;  %v1757_v57 = vpack.c.bf16 %v1629_v13, %v1629_v13  ;;  %v1751_v13 = vpack.c.bf16 %v1623_v53, %v1623_v53  ;;  %v2182_v40 = vrot.slane %v2022_v3, %v4316_v41  ;;  %v2150_v22 = vrot.slane %v2014_v50, %v4316_v41 }
  0xc3   : > { %1404 = vadd.xlane.f32.xlu0 %v4392_v63  ;;  %v1045_v46 = vpop.xlane.xlu1 %1044  ;;  %v4537_v63 = vadd.f32 %v1517_v42, %v1516_v20  ;;  %v838_v20 = vcombine.high %v4532_v4, %v4532_v4  ;;  %v1774_v42 = vpack.c.bf16 %v1646_v58, %v1646_v58  ;;  %v1760_v32 = vpack.c.bf16 %v1632_v28, %v1632_v28 }
  0xc4   : > { %v1005_v47 = vpop.xlane.xlu0 %1004  ;;  %v2021_v9 = vunpack.c.l.b16 %v1757_v57  ;;  %v1752_v35 = vpack.c.bf16 %v1624_v6, %v1624_v6  ;;  %v2146_v36 = vrot.slane %v2013_v11, %v4316_v41  ;;  %v2186_v48 = vrot.slane %v2023_v10, %v4316_v41 }
  0xc5   : > { %v1633_v56 = vmul.f32 0.00390625, %v1045_v46  ;;  %v1625_v58 = vmul.f32 0.00390625, %v1005_v47  ;;  %v2038_v59 = vunpack.c.l.b16 %v1774_v42  ;;  %v2037_v60 = vunpack.c.l.b16 %v1773_v26 }
  0xc6   : > { %1374 = vadd.xlane.f32.xlu1 %v4394_v0  ;;  %v1766_v0 = vpack.c.bf16 %v1638_v5, %v1638_v5  ;;  %v2178_v52 = vrot.slane %v2021_v9, %v4316_v41  ;;  %v2029_v5 = vunpack.c.l.b16 %v1765_v37  ;;  %v1775_v3 = vpack.c.bf16 %v1647_v38, %v1647_v38 }
  0xc7   : > { %1334 = vadd.xlane.f32.xlu0 %v4396_v1  ;;  %v1120_v7 = vpop.xlane.xlu1 %1119  ;;  %v832_v1 = vcombine.high %v4540_v44, %v4540_v44  ;;  %v1639_v50 = vmul.f32 0.00390625, %v4500_v12  ;;  %v2656_v28 = vsel %vm2655_vm2, %v2150_v22, %v2146_v36  ;;  %v2024_v6 = vunpack.c.l.b16 %v1760_v32 }
  0xc8   : > { %v1080_v14 = vpop.xlane.xlu0 %1079  ;;  %v2030_v53 = vunpack.c.l.b16 %v1766_v0  ;;  %v2016_v9 = vunpack.c.l.b16 %v1752_v35  ;;  %v1761_v37 = vpack.c.bf16 %v1633_v56, %v1633_v56  ;;  %v1753_v42 = vpack.c.bf16 %v1625_v58, %v1625_v58 }
  0xc9   : > { %v2246_v26 = vrot.slane %v2038_v59, %v4316_v41  ;;  %v2242_v38 = vrot.slane %v2037_v60, %v4316_v41  ;;  %v2190_v22 = vrot.slane %v2024_v6, %v4316_v41  ;;  %v1648_v35 = vmul.f32 0.00390625, %v1120_v7 }
  0xca   : > { %1449 = vadd.xlane.f32.xlu1 %v4416_v19  ;;  %v2015_v19 = vunpack.c.l.b16 %v1751_v13  ;;  %v2214_v12 = vrot.slane %v2030_v53, %v4316_v41  ;;  %v2158_v32 = vrot.slane %v2016_v9, %v4316_v41  ;;  %v2025_v56 = vunpack.c.l.b16 %v1761_v37 }
  0xcb   : > { %1409 = vadd.xlane.f32.xlu0 %v4420_v33  ;;  %v1050_v43 = vpop.xlane.xlu1 %1049  ;;  %v2669_v33 = vsel %vm2655_vm2, %v2182_v40, %v2178_v52  ;;  %v2039_v40 = vunpack.c.l.b16 %v1775_v3  ;;  %v2017_v58 = vunpack.c.l.b16 %v1753_v42  ;;  %v2683_v7 = vsel %vm2655_vm2, %v2246_v26, %v2242_v38 }
  0xcc   : > { %v1010_v57 = vpop.xlane.xlu0 %1009  ;;  %v2670_v46 = vsel %vm2657_vm3, %v2186_v48, %v2669_v33  ;;  %v2154_v47 = vrot.slane %v2015_v19, %v4316_v41  ;;  %v1634_v13 = vmul.f32 0.00390625, %v1050_v43  ;;  %v1640_v43 = vmul.f32 0.00390625, %v1080_v14 }
  0xcd   : > { %v1626_v0 = vmul.f32 0.00390625, %v1010_v57  ;;  %v2250_v14 = vrot.slane %v2039_v40, %v4316_v41  ;;  %v1776_v60 = vpack.c.bf16 %v1648_v35, %v1648_v35  ;;  %v2671_v9 = vsel %vm2659_vm4, %v2190_v22, %v2670_v46 }
  0xce   : > { %1379 = vadd.xlane.f32.xlu1 %v4422_v29  ;;  %v2210_v29 = vrot.slane %v2029_v5, %v4316_v41  ;;  %v1762_v36 = vpack.c.bf16 %v1634_v13, %v1634_v13  ;;  %v2658_v5 = vsel %vm2657_vm3, %v2154_v47, %v2656_v28  ;;  %v1768_v3 = vpack.c.bf16 %v1640_v43, %v1640_v43 }
  0xcf   : > { %1339 = vadd.xlane.f32.xlu0 %v4424_v34  ;;  %v1125_v11 = vpop.xlane.xlu1 %1124  ;;  %v1767_v34 = vpack.c.bf16 %v1639_v50, %v1639_v50  ;;  %v1754_v48 = vpack.c.bf16 %v1626_v0, %v1626_v0  ;;  %v2194_v0 = vrot.slane %v2025_v56, %v4316_v41  ;;  %v4595_v37 = vsel %vm2657_vm3, %v2250_v14, %v2683_v7 }
  0xd0   : > { %v1085_v10 = vpop.xlane.xlu0 %1084  ;;  %v1649_v59 = vmul.f32 0.00390625, %v1125_v11  ;;  %v2660_v11 = vsel %vm2659_vm4, %v2158_v32, %v2658_v5  ;;  %v2026_v47 = vunpack.c.l.b16 %v1762_v36  ;;  %v4600_v26 = vunpack.c.l.b16 %v1776_v60 }
  0xd1   : > { %v2018_v13 = vunpack.c.l.b16 %v1754_v48  ;;  %v4602_v38 = vunpack.c.l.b16 %v1768_v3  ;;  %v2672_v48 = vsel %vm2661_vm5, %v2194_v0, %v2671_v9 }
  0xd2   : > { %1454 = vadd.xlane.f32.xlu1 %v4432_v39  ;;  %v4582_v39 = vsel %vm2655_vm2, %v2214_v12, %v2210_v29  ;;  %v2162_v12 = vrot.slane %v2017_v58, %v4316_v41  ;;  %v1641_v29 = vmul.f32 0.00390625, %v1085_v10  ;;  %v2198_v32 = vrot.slane %v2026_v47, %v4316_v41 }
  0xd3   : > { %1414 = vadd.xlane.f32.xlu0 %v4442_v30  ;;  %v1055_v57 = vpop.xlane.xlu1 %1054  ;;  %v4586_v30 = vunpack.c.l.b16 %v1767_v34  ;;  %v2166_v35 = vrot.slane %v2018_v13, %v4316_v41  ;;  %v2254_v56 = vrot.slane %v4600_v26, %v4316_v41  ;;  %v2222_v58 = vrot.slane %v4602_v38, %v4316_v41 }
  0xd4   : > { %v1015_v52 = vpop.xlane.xlu0 %1014  ;;  %v1635_v19 = vmul.f32 0.00390625, %v1055_v57  ;;  %v2662_v36 = vsel %vm2661_vm5, %v2162_v12, %v2660_v11 }
  0xd5   : > { %v1627_v53 = vmul.f32 0.00390625, %v1015_v52 }
  0xd6   : > { %1459 = vadd.xlane.f32.xlu1 %v4446_v2  ;;  %v1763_v50 = vpack.c.bf16 %v1635_v19, %v1635_v19  ;;  %v1777_v2 = vpack.c.bf16 %v1649_v59, %v1649_v59 }
  0xd7   : > { %v1755_v33 = vpack.c.bf16 %v1627_v53, %v1627_v53  ;;  %1419 = vadd.xlane.f32.xlu0 %v4463_v27  ;;  %v1130_v28 = vpop.xlane.xlu1 %1129  ;;  %v2218_v27 = vrot.slane %v4586_v30, %v4316_v41 }
  0xd8   : > { %v1090_v6 = vpop.xlane.xlu0 %1089  ;;  %v1650_v42 = vmul.f32 0.00390625, %v1130_v28  ;;  %v2027_v40 = vunpack.c.l.b16 %v1763_v50  ;;  %v4607_v52 = vunpack.c.l.b16 %v1777_v2 }
  0xd9   : > { %v1642_v46 = vmul.f32 0.00390625, %v1090_v6  ;;  %v2019_v34 = vunpack.c.l.b16 %v1755_v33  ;;  %v2664_v33 = vsel %vm2663_vm6, %v2166_v35, %v2662_v36  ;;  %v2677_v36 = vsel %vm2657_vm3, %v2218_v27, %v4582_v39 }
  0xda   : > { %1469 = vadd.xlane.f32.xlu1 %v4465_v16  ;;  %v1769_v16 = vpack.c.bf16 %v1641_v29, %v1641_v29  ;;  %v1778_v19 = vpack.c.bf16 %v1650_v42, %v1650_v42  ;;  %v2202_v59 = vrot.slane %v2027_v40, %v4316_v41  ;;  %v2258_v28 = vrot.slane %v4607_v52, %v4316_v41 }
  0xdb   : > { %1464 = vadd.xlane.f32.xlu0 %v4468_v24  ;;  %v1060_v10 = vpop.xlane.xlu1 %1059  ;;  %v1770_v53 = vpack.c.bf16 %v1642_v46, %v1642_v46  ;;  %v2170_v7 = vrot.slane %v2019_v34, %v4316_v41  ;;  %v2678_v30 = vsel %vm2659_vm4, %v2222_v58, %v2677_v36 }
  0xdc   : > { %v1020_v22 = vpop.xlane.xlu0 %1019  ;;  %v1636_v43 = vmul.f32 0.00390625, %v1060_v10  ;;  %v2033_v6 = vunpack.c.l.b16 %v1769_v16  ;;  %v2042_v47 = vunpack.c.l.b16 %v1778_v19 }
  0xdd   : > { %v1628_v57 = vmul.f32 0.00390625, %v1020_v22  ;;  %v2034_v13 = vunpack.c.l.b16 %v1770_v53  ;;  %v2666_v46 = vsel %vm2665_vm7, %v2170_v7, %v2664_v33  ;;  %v3861_v22 = vld [vmem:[%s4100_s9 + $0x190] sm:$0xff]   ;;  %v1593_v33 = vadd.f32 %v4547_v23, %v4529_v21 }
  0xde   : > { %v1764_v5 = vpack.c.bf16 %v1636_v43, %v1636_v43  ;;  %1509 = vadd.xlane.f32.xlu1 %v4470_v31  ;;  %v2673_v31 = vsel %vm2663_vm6, %v2198_v32, %v2672_v48  ;;  %v2226_v32 = vrot.slane %v2033_v6, %v4316_v41  ;;  %v1522_v21 = vsel %vm980_vm0, %v832_v1, 0.0 }
  0xdf   : > { %v1756_v24 = vpack.c.bf16 %v1628_v57, %v1628_v57  ;;  %1504 = vadd.xlane.f32.xlu0 %v4477_v45  ;;  %v1135_v14 = vpop.xlane.xlu1 %1134  ;;  %v2674_v26 = vsel %vm2665_vm7, %v2202_v59, %v2673_v31  ;;  %v2230_v57 = vrot.slane %v2034_v13, %v4316_v41  ;;  %v1551_v31 = vsel %vm980_vm0, %v4532_v4, 0.0 }
  0xe0   : > { %v1095_v60 = vpop.xlane.xlu0 %1094  ;;  %v2028_v3 = vunpack.c.l.b16 %v1764_v5  ;;  %v1651_v9 = vmul.f32 0.00390625, %v1135_v14  ;;  %v2679_v7 = vsel %vm2661_vm5, %v2226_v32, %v2678_v30  ;;  %v3747_v14 = vunpack.c.h.bf16 %v4512_v61 }
  0xe1   : > { %v2020_v50 = vunpack.c.l.b16 %v1756_v24  ;;  %v1643_v11 = vmul.f32 0.00390625, %v1095_v60  ;;  %v3718_v24 = vunpack.c.l.bf16 %v3861_v22  ;;  %v1521_v13 = vsel %vm980_vm0, %v4540_v44, 0.0 }
  0xe2   : > { %v2206_v0 = vrot.slane %v2028_v3, %v4316_v41  ;;  %1514 = vadd.xlane.f32.xlu1 %v4502_v8  ;;  %v1779_v12 = vpack.c.bf16 %v1651_v9, %v1651_v9  ;;  %v2680_v3 = vsel %vm2663_vm6, %v2230_v57, %v2679_v7  ;;  %v3735_v23 = vunpack.c.h.bf16 %v4525_v49 }
  0xe3   : > { %v2174_v45 = vrot.slane %v2020_v50, %v4316_v41  ;;  %v1771_v2 = vpack.c.bf16 %v1643_v11, %v1643_v11  ;;  %1474 = vadd.xlane.f32.xlu0 %v4504_v54  ;;  %v1140_v29 = vpop.xlane.xlu1 %1139  ;;  %v2262_v54 = vrot.slane %v2042_v47, %v4316_v41  ;;  %v824_v9 = vcombine.high %v3718_v24, %v3718_v24  ;;  %v3869_v11 = vld [vmem:[%s4100_s9 + $0x1d0] sm:$0xff]  }
  0xe4   : > { %v1100_v42 = vpop.xlane.xlu0 %1099  ;;  %v1652_v38 = vmul.f32 0.00390625, %v1140_v29  ;;  %v2675_v10 = vsel %vm2667_vm8, %v2206_v0, %v2674_v26  ;;  %v2043_v8 = vunpack.c.l.b16 %v1779_v12  ;;  %v839_v0 = vcombine.high %v3747_v14, %v3747_v14 }
  0xe5   : > { %v1644_v40 = vmul.f32 0.00390625, %v1100_v42  ;;  %v2668_v34 = vsel %vm2667_vm8, %v2174_v45, %v2666_v46  ;;  %v2035_v35 = vunpack.c.l.b16 %v1771_v2  ;;  %v3750_v29 = vunpack.c.l.bf16 %v3869_v11  ;;  %v3866_v42 = vld [vmem:[%s4100_s9 + $0x1b8] sm:$0xff]  }
  0xe6   : > { %v2774_v43 = vpack.c.b16 %v2675_v10, %v2668_v34  ;;  %v1780_v52 = vpack.c.bf16 %v1652_v38, %v1652_v38  ;;  %1549 = vadd.xlane.f32.xlu1 %v4509_v17  ;;  %v2266_v48 = vrot.slane %v2043_v8, %v4316_v41  ;;  %v2685_v17 = vsel %vm2659_vm4, %v2254_v56, %v4595_v37 }
  0xe7   : > { %v1772_v16 = vpack.c.bf16 %v1644_v40, %v1644_v40  ;;  %v2234_v19 = vrot.slane %v2035_v35, %v4316_v41  ;;  %1544 = vadd.xlane.f32.xlu0 %v4514_v62  ;;  %v4644_v53 = vpop.xlane.xlu1 %1149  ;;  %v2686_v27 = vsel %vm2661_vm5, %v2258_v28, %v2685_v17  ;;  %v3763_v62 = vunpack.c.h.bf16 %v4483_v51  ;;  %v3873_v28 = vld [vmem:[%s4100_s9 + $0x1f0] sm:$0xff]  }
  0xe8   : > { %3909 = vmatprep.mubr.msk.bf16.mxu0 %vm2782_vm9, %v2774_v43  ;;  %v4647_v5 = vpop.xlane.xlu0 %1144  ;;  %v2044_v59 = vunpack.c.l.b16 %v1780_v52  ;;  %v2687_v60 = vsel %vm2663_vm6, %v2262_v54, %v2686_v27  ;;  %v3766_v45 = vunpack.c.l.bf16 %v3873_v28  ;;  %v1481_v1 = vsel %vm980_vm0, %v3718_v24, 0.0 }
  0xe9   : > { %v2036_v39 = vunpack.c.l.b16 %v1772_v16  ;;  %v2688_v58 = vsel %vm2665_vm7, %v2266_v48, %v2687_v60  ;;  %v2681_v50 = vsel %vm2665_vm7, %v2234_v19, %v2680_v3  ;;  %v847_v4 = vcombine.high %v3763_v62, %v3763_v62 }
  0xea   : > { %v2270_v37 = vrot.slane %v2044_v59, %v4316_v41  ;;  %1589 = vadd.xlane.f32.xlu1 %v4516_v55  ;;  %v1482_v49 = vsel %vm980_vm0, %v824_v9, 0.0  ;;  %v1523_v46 = vadd.f32 %v1522_v21, %v1521_v13  ;;  %v1596_v26 = vsel %vm980_vm0, %v3763_v62, 0.0 }
  0xeb   : > { %v2238_v56 = vrot.slane %v2036_v39, %v4316_v41  ;;  %1584 = vadd.xlane.f32.xlu0 %v4518_v18  ;;  %v4664_v51 = vpop.xlane.xlu1 %1189  ;;  %v1552_v18 = vsel %vm980_vm0, %v838_v20, 0.0  ;;  %v3719_v20 = vunpack.c.h.bf16 %v3861_v22  ;;  %v1556_v38 = vsel %vm980_vm0, %v3747_v14, 0.0 }
  0xec   : > { %v4666_v61 = vpop.xlane.xlu0 %1184  ;;  %v2689_v6 = vsel %vm2667_vm8, %v2270_v37, %v2688_v58  ;;  %v1553_v44 = vadd.f32 %v1552_v18, %v1551_v31  ;;  %v1597_v40 = vsel %vm980_vm0, %v847_v4, 0.0  ;;  %v1557_v34 = vsel %vm980_vm0, %v839_v0, 0.0 }
  0xed   : > { %v2682_v55 = vsel %vm2667_vm8, %v2238_v56, %v2681_v50  ;;  %v825_v10 = vcombine.high %v3719_v20, %v3719_v20  ;;  %v848_v22 = vcombine.high %v3766_v45, %v3766_v45  ;;  %v1483_v35 = vadd.f32 %v1482_v49, %v1481_v1  ;;  %v3874_v56 = vld [vmem:[%s4100_s9 + $0x1f8] sm:$0xff]  }
  0xee   : > { %v2775_v47 = vpack.c.b16 %v2689_v6, %v2682_v55  ;;  %1519 = vadd.xlane.f32.xlu1 %v4537_v63  ;;  %v3862_v63 = vld [vmem:[%s4100_s9 + $0x198] sm:$0xff]   ;;  %v840_v43 = vcombine.high %v3750_v29, %v3750_v29  ;;  %v3738_v54 = vunpack.c.l.bf16 %v3866_v42  ;;  %v1526_v52 = vsel %vm980_vm0, %v3735_v23, 0.0 }
  0xef   : > { %1479 = vadd.xlane.f32.xlu0 %v4552_v15  ;;  %v4689_v12 = vpop.xlane.xlu1 %1194  ;;  %v833_v15 = vcombine.high %v3735_v23, %v3735_v23  ;;  %v3722_v57 = vunpack.c.l.bf16 %v3862_v63  ;;  %v1486_v16 = vsel %vm980_vm0, %v3719_v20, 0.0  ;;  %v3767_v36 = vunpack.c.h.bf16 %v3873_v28 }
  0xf0   : > { %3910 = vmatmul.mubr.msk.bf16.vlgmr.msra.gmra.mrb[0].mxu0 %vm2782_vm9, %v2775_v47  ;;  %v4692_v2 = vpop.xlane.xlu0 %1154  ;;  %v1598_v48 = vadd.f32 %v1597_v40, %v1596_v26  ;;  %v1558_v19 = vadd.f32 %v1557_v34, %v1556_v38  ;;  %v3751_v17 = vunpack.c.h.bf16 %v3869_v11  ;;  %v1487_v30 = vsel %vm980_vm0, %v825_v10, 0.0  ;;  %v3870_v47 = vld [vmem:[%s4100_s9 + $0x1d8] sm:$0xff]  }
  0xf1   : > { %v1527_v24 = vsel %vm980_vm0, %v833_v15, 0.0  ;;  %v1601_v59 = vsel %vm980_vm0, %v3766_v45, 0.0  ;;  %v1602_v39 = vsel %vm980_vm0, %v848_v22, 0.0  ;;  %v3739_v27 = vunpack.c.h.bf16 %v3866_v42 }
  0xf2   : > { %1594 = vadd.xlane.f32.xlu1 %v1593_v33  ;;  %v1561_v14 = vsel %vm980_vm0, %v3750_v29, 0.0  ;;  %v1562_v60 = vsel %vm980_vm0, %v840_v43, 0.0  ;;  %v834_v3 = vcombine.high %v3738_v54, %v3738_v54  ;;  %v826_v37 = vcombine.high %v3722_v57, %v3722_v57 }
  0xf3   : > { %1554 = vadd.xlane.f32.xlu0 %v1553_v44  ;;  %v4702_v32 = vpop.xlane.xlu1 %1229  ;;  %v849_v58 = vcombine.high %v3767_v36, %v3767_v36  ;;  %v3723_v50 = vunpack.c.h.bf16 %v3862_v63  ;;  %v1528_v33 = vadd.f32 %v1527_v24, %v1526_v52  ;;  %v1488_v31 = vadd.f32 %v1487_v30, %v1486_v16 }
  0xf4   : > { %v4704_v8 = vpop.xlane.xlu0 %1224  ;;  %v1603_v28 = vadd.f32 %v1602_v39, %v1601_v59  ;;  %v841_v6 = vcombine.high %v3751_v17, %v3751_v17  ;;  %v1563_v55 = vadd.f32 %v1562_v60, %v1561_v14  ;;  %v1531_v18 = vsel %vm980_vm0, %v3738_v54, 0.0 }
  0xf5   : > { %v835_v9 = vcombine.high %v3739_v27, %v3739_v27  ;;  %v3770_v11 = vunpack.c.l.bf16 %v3874_v56  ;;  %v1532_v23 = vsel %vm980_vm0, %v834_v3, 0.0  ;;  %v1491_v4 = vsel %vm980_vm0, %v3722_v57, 0.0 }
  0xf6   : > { %1524 = vadd.xlane.f32.xlu1 %v1523_v46  ;;  %v1492_v0 = vsel %vm980_vm0, %v826_v37, 0.0  ;;  %v1606_v20 = vsel %vm980_vm0, %v3767_v36, 0.0  ;;  %v1654_v45 = vmul.f32 0.00390625, %v4644_v53  ;;  %v1653_v44 = vmul.f32 0.00390625, %v4647_v5 }
  0xf7   : > { %1484 = vadd.xlane.f32.xlu0 %v1483_v35  ;;  %v4712_v7 = vpop.xlane.xlu1 %1269  ;;  %v1607_v29 = vsel %vm980_vm0, %v849_v58, 0.0  ;;  %v827_v1 = vcombine.high %v3723_v50, %v3723_v50  ;;  %v1566_v49 = vsel %vm980_vm0, %v3751_v17, 0.0  ;;  %v1567_v42 = vsel %vm980_vm0, %v841_v6, 0.0 }
  0xf8   : > { %v4714_v62 = vpop.xlane.xlu0 %1264  ;;  %v1536_v63 = vsel %vm980_vm0, %v3739_v27, 0.0  ;;  %v3754_v46 = vunpack.c.l.bf16 %v3870_v47  ;;  %v1662_v26 = vmul.f32 0.00390625, %v4664_v51  ;;  %v1661_v38 = vmul.f32 0.00390625, %v4666_v61 }
  0xf9   : > { %v1537_v15 = vsel %vm980_vm0, %v835_v9, 0.0  ;;  %v850_v53 = vcombine.high %v3770_v11, %v3770_v11  ;;  %v1533_v34 = vadd.f32 %v1532_v23, %v1531_v18  ;;  %v1493_v10 = vadd.f32 %v1492_v0, %v1491_v4 }
  0xfa   : > { %1599 = vadd.xlane.f32.xlu1 %v1598_v48  ;;  %v3771_v22 = vunpack.c.h.bf16 %v3874_v56  ;;  %v3755_v35 = vunpack.c.h.bf16 %v3870_v47  ;;  %v1782_v43 = vpack.c.bf16 %v1654_v45, %v1654_v45  ;;  %v1781_v54 = vpack.c.bf16 %v1653_v44, %v1653_v44 }
  0xfb   : > { %1559 = vadd.xlane.f32.xlu0 %v1558_v19  ;;  %v4721_v13 = vpop.xlane.xlu1 %1199  ;;  %v1496_v57 = vsel %vm980_vm0, %v3723_v50, 0.0  ;;  %v1497_v51 = vsel %vm980_vm0, %v827_v1, 0.0  ;;  %v1608_v52 = vadd.f32 %v1607_v29, %v1606_v20  ;;  %v1568_v61 = vadd.f32 %v1567_v42, %v1566_v49 }
  0xfc   : > { %v4723_v21 = vpop.xlane.xlu0 %1159  ;;  %v4742_v16 = vadd.f32 %v1537_v15, %v1536_v63  ;;  %v842_v36 = vcombine.high %v3754_v46, %v3754_v46  ;;  %v1790_v48 = vpack.c.bf16 %v1662_v26, %v1662_v26  ;;  %v1789_v19 = vpack.c.bf16 %v1661_v38, %v1661_v38 }
  0xfd   : > { %v1611_v24 = vsel %vm980_vm0, %v3770_v11, 0.0  ;;  %v1612_v17 = vsel %vm980_vm0, %v850_v53, 0.0  ;;  %v1498_v39 = vadd.f32 %v1497_v51, %v1496_v57  ;;  %v1571_v27 = vsel %vm980_vm0, %v3754_v46, 0.0 }
  0xfe   : > { %1529 = vadd.xlane.f32.xlu1 %v1528_v33  ;;  %v851_v14 = vcombine.high %v3771_v22, %v3771_v22  ;;  %v843_v60 = vcombine.high %v3755_v35, %v3755_v35  ;;  %v2046_v3 = vunpack.c.l.b16 %v1782_v43  ;;  %v2045_v37 = vunpack.c.l.b16 %v1781_v54 }
  0xff   : > { %1489 = vadd.xlane.f32.xlu0 %v1488_v31  ;;  %v1275_v5 = vpop.xlane.xlu1 %1274  ;;  %v1663_v56 = vmul.f32 0.00390625, %v4689_v12  ;;  %v1655_v58 = vmul.f32 0.00390625, %v4692_v2  ;;  %v1670_v50 = vmul.f32 0.00390625, %v4702_v32  ;;  %v1669_v33 = vmul.f32 0.00390625, %v4704_v8 }
 0x100   : > { %v4738_v40 = vpop.xlane.xlu0 %1234  ;;  %v4751_v31 = vadd.f32 %v1612_v17, %v1611_v24  ;;  %v2054_v6 = vunpack.c.l.b16 %v1790_v48  ;;  %v1678_v18 = vmul.f32 0.00390625, %v4712_v7  ;;  %v1677_v9 = vmul.f32 0.00390625, %v4714_v62 }
 0x101   : > { %v1616_v2 = vsel %vm980_vm0, %v3771_v22, 0.0  ;;  %v1617_v32 = vsel %vm980_vm0, %v851_v14, 0.0  ;;  %v1576_v8 = vsel %vm980_vm0, %v3755_v35, 0.0  ;;  %v1577_v47 = vsel %vm980_vm0, %v843_v60, 0.0 }
 0x102   : > { %1604 = vadd.xlane.f32.xlu1 %v1603_v28  ;;  %v1572_v28 = vsel %vm980_vm0, %v842_v36, 0.0  ;;  %v2278_v23 = vrot.slane %v2046_v3, %v4316_v41  ;;  %v2274_v4 = vrot.slane %v2045_v37, %v4316_v41  ;;  %v1791_v0 = vpack.c.bf16 %v1663_v56, %v1663_v56 }
 0x103   : > { %1564 = vadd.xlane.f32.xlu0 %v1563_v55  ;;  %v1205_v30 = vpop.xlane.xlu1 %1204  ;;  %v2053_v55 = vunpack.c.l.b16 %v1789_v19  ;;  %v1783_v7 = vpack.c.bf16 %v1655_v58, %v1655_v58  ;;  %v1798_v20 = vpack.c.bf16 %v1670_v50, %v1670_v50  ;;  %v1797_v62 = vpack.c.bf16 %v1669_v33, %v1669_v33 }
 0x104   : > { %v1165_v59 = vpop.xlane.xlu0 %1164  ;;  %v1664_v45 = vmul.f32 0.00390625, %v4721_v13  ;;  %v1656_v44 = vmul.f32 0.00390625, %v4723_v21  ;;  %v2310_v29 = vrot.slane %v2054_v6, %v4316_v41  ;;  %v1806_v49 = vpack.c.bf16 %v1678_v18, %v1678_v18 }
 0x105   : > { %v2306_v1 = vrot.slane %v2053_v55, %v4316_v41  ;;  %v1805_v42 = vpack.c.bf16 %v1677_v9, %v1677_v9  ;;  %v1679_v63 = vmul.f32 0.00390625, %v1275_v5  ;;  %v1665_v46 = vmul.f32 0.00390625, %v1205_v30 }
 0x106   : > { %1534 = vadd.xlane.f32.xlu1 %v1533_v34  ;;  %v1657_v26 = vmul.f32 0.00390625, %v1165_v59  ;;  %v1573_v53 = vadd.f32 %v1572_v28, %v1571_v27  ;;  %v2055_v34 = vunpack.c.l.b16 %v1791_v0  ;;  %v1618_v22 = vadd.f32 %v1617_v32, %v1616_v2 }
 0x107   : > { %1494 = vadd.xlane.f32.xlu0 %v1493_v10  ;;  %v1280_v11 = vpop.xlane.xlu1 %1279  ;;  %v2047_v10 = vunpack.c.l.b16 %v1783_v7  ;;  %v1578_v13 = vadd.f32 %v1577_v47, %v1576_v8  ;;  %v2062_v35 = vunpack.c.l.b16 %v1798_v20  ;;  %v2061_v21 = vunpack.c.l.b16 %v1797_v62 }
 0x108   : > { %v1240_v12 = vpop.xlane.xlu0 %1239  ;;  %v1792_v43 = vpack.c.bf16 %v1664_v45, %v1664_v45  ;;  %v1784_v54 = vpack.c.bf16 %v1656_v44, %v1656_v44  ;;  %v2690_v57 = vsel %vm2655_vm2, %v2278_v23, %v2274_v4  ;;  %v2697_v51 = vsel %vm2655_vm2, %v2310_v29, %v2306_v1 }
 0x109   : > { %v2069_v5 = vunpack.c.l.b16 %v1805_v42  ;;  %v1671_v36 = vmul.f32 0.00390625, %v4738_v40  ;;  %v1793_v48 = vpack.c.bf16 %v1665_v46, %v1665_v46  ;;  %v1785_v19 = vpack.c.bf16 %v1657_v26, %v1657_v26 }
 0x10a   : > { %1609 = vadd.xlane.f32.xlu1 %v1608_v52  ;;  %v2070_v52 = vunpack.c.l.b16 %v1806_v49  ;;  %v2314_v30 = vrot.slane %v2055_v34, %v4316_v41  ;;  %v2282_v59 = vrot.slane %v2047_v10, %v4316_v41  ;;  %v2342_v60 = vrot.slane %v2062_v35, %v4316_v41 }
 0x10b   : > { %1569 = vadd.xlane.f32.xlu0 %v1568_v61  ;;  %v1210_v38 = vpop.xlane.xlu1 %1209  ;;  %v1807_v61 = vpack.c.bf16 %v1679_v63, %v1679_v63  ;;  %v2338_v3 = vrot.slane %v2061_v21, %v4316_v41  ;;  %v2056_v37 = vunpack.c.l.b16 %v1792_v43  ;;  %v2370_v40 = vrot.slane %v2069_v5, %v4316_v41 }
 0x10c   : > { %v1170_v15 = vpop.xlane.xlu0 %1169  ;;  %v1666_v27 = vmul.f32 0.00390625, %v1210_v38  ;;  %v2374_v56 = vrot.slane %v2070_v52, %v4316_v41  ;;  %v1680_v58 = vmul.f32 0.00390625, %v1280_v11  ;;  %v1799_v33 = vpack.c.bf16 %v1671_v36, %v1671_v36 }
 0x10d   : > { %v1658_v14 = vmul.f32 0.00390625, %v1170_v15  ;;  %v2071_v50 = vunpack.c.l.b16 %v1807_v61  ;;  %v2057_v28 = vunpack.c.l.b16 %v1793_v48  ;;  %v2049_v6 = vunpack.c.l.b16 %v1785_v19 }
 0x10e   : > { %1539 = vadd.xlane.f32.xlu1 %v4742_v16  ;;  %v2048_v16 = vunpack.c.l.b16 %v1784_v54  ;;  %v1794_v9 = vpack.c.bf16 %v1666_v27, %v1666_v27  ;;  %v2698_v47 = vsel %vm2657_vm3, %v2314_v30, %v2697_v51  ;;  %v2691_v23 = vsel %vm2657_vm3, %v2282_v59, %v2690_v57 }
 0x10f   : > { %1499 = vadd.xlane.f32.xlu0 %v1498_v39  ;;  %v1285_v24 = vpop.xlane.xlu1 %1284  ;;  %v1672_v39 = vmul.f32 0.00390625, %v1240_v12  ;;  %v1786_v2 = vpack.c.bf16 %v1658_v14, %v1658_v14  ;;  %v2318_v11 = vrot.slane %v2056_v37, %v4316_v41  ;;  %v2711_v4 = vsel %vm2655_vm2, %v2374_v56, %v2370_v40 }
 0x110   : > { %v1245_v17 = vpop.xlane.xlu0 %1244  ;;  %v2286_v12 = vrot.slane %v2048_v16, %v4316_v41  ;;  %v1808_v0 = vpack.c.bf16 %v1680_v58, %v1680_v58  ;;  %v2378_v20 = vrot.slane %v2071_v50, %v4316_v41  ;;  %v4786_v62 = vunpack.c.l.b16 %v1799_v33 }
 0x111   : > { %v1800_v7 = vpack.c.bf16 %v1672_v39, %v1672_v39  ;;  %v2322_v49 = vrot.slane %v2057_v28, %v4316_v41  ;;  %v2290_v42 = vrot.slane %v2049_v6, %v4316_v41  ;;  %v2058_v63 = vunpack.c.l.b16 %v1794_v9 }
 0x112   : > { %1614 = vadd.xlane.f32.xlu1 %v4751_v31  ;;  %v4782_v31 = vsel %vm2655_vm2, %v2342_v60, %v2338_v3  ;;  %v2050_v46 = vunpack.c.l.b16 %v1786_v2  ;;  %v2699_v26 = vsel %vm2659_vm4, %v2318_v11, %v2698_v47  ;;  %v2692_v38 = vsel %vm2659_vm4, %v2286_v12, %v2691_v23 }
 0x113   : > { %1574 = vadd.xlane.f32.xlu0 %v1573_v53  ;;  %v1215_v55 = vpop.xlane.xlu1 %1214  ;;  %v1681_v15 = vmul.f32 0.00390625, %v1285_v24  ;;  %v1673_v53 = vmul.f32 0.00390625, %v1245_v17  ;;  %v4792_v34 = vunpack.c.l.b16 %v1808_v0  ;;  %v4794_v10 = vunpack.c.l.b16 %v1800_v7 }
 0x114   : > { %v1175_v18 = vpop.xlane.xlu0 %1174  ;;  %v1667_v32 = vmul.f32 0.00390625, %v1215_v55  ;;  %v2712_v35 = vsel %vm2657_vm3, %v2378_v20, %v2711_v4  ;;  %v2346_v21 = vrot.slane %v4786_v62, %v4316_v41  ;;  %v2700_v52 = vsel %vm2661_vm5, %v2322_v49, %v2699_v26 }
 0x115   : > { %v1659_v8 = vmul.f32 0.00390625, %v1175_v18  ;;  %v2693_v5 = vsel %vm2661_vm5, %v2290_v42, %v2692_v38  ;;  %v2326_v61 = vrot.slane %v2058_v63, %v4316_v41  ;;  %v2294_v36 = vrot.slane %v2050_v46, %v4316_v41 }
 0x116   : > { %1619 = vadd.xlane.f32.xlu1 %v1618_v22  ;;  %v1795_v45 = vpack.c.bf16 %v1667_v32, %v1667_v32  ;;  %v1809_v48 = vpack.c.bf16 %v1681_v15, %v1681_v15  ;;  %v1801_v19 = vpack.c.bf16 %v1673_v53, %v1673_v53  ;;  %v2382_v30 = vrot.slane %v4792_v34, %v4316_v41 }
 0x117   : > { %v1787_v44 = vpack.c.bf16 %v1659_v8, %v1659_v8  ;;  %1579 = vadd.xlane.f32.xlu0 %v1578_v13  ;;  %v1290_v29 = vpop.xlane.xlu1 %1289  ;;  %v2350_v59 = vrot.slane %v4794_v10, %v4316_v41  ;;  %v2701_v58 = vsel %vm2663_vm6, %v2326_v61, %v2700_v52  ;;  %v2694_v39 = vsel %vm2663_vm6, %v2294_v36, %v2693_v5 }
 0x118   : > { %v1250_v1 = vpop.xlane.xlu0 %1249  ;;  %v1682_v22 = vmul.f32 0.00390625, %v1290_v29  ;;  %v2059_v43 = vunpack.c.l.b16 %v1795_v45  ;;  %v2073_v28 = vunpack.c.l.b16 %v1809_v48  ;;  %v2065_v6 = vunpack.c.l.b16 %v1801_v19 }
 0x119   : > { %v1674_v13 = vmul.f32 0.00390625, %v1250_v1  ;;  %v2051_v54 = vunpack.c.l.b16 %v1787_v44  ;;  %v2705_v38 = vsel %vm2657_vm3, %v2346_v21, %v4782_v31 }
 0x11a   : > { %v1810_v27 = vpack.c.bf16 %v1682_v22, %v1682_v22  ;;  %v2330_v60 = vrot.slane %v2059_v43, %v4316_v41  ;;  %v2386_v44 = vrot.slane %v2073_v28, %v4316_v41  ;;  %v2354_v29 = vrot.slane %v2065_v6, %v4316_v41 }
 0x11b   : > { %v1220_v57 = vpop.xlane.xlu1 %1219  ;;  %v1802_v14 = vpack.c.bf16 %v1674_v13, %v1674_v13  ;;  %v2298_v3 = vrot.slane %v2051_v54, %v4316_v41  ;;  %v2713_v13 = vsel %vm2659_vm4, %v2382_v30, %v2712_v35  ;;  %v2706_v43 = vsel %vm2659_vm4, %v2350_v59, %v2705_v38  ;;  %v4006_v38 = vld [vmem:[%s5092_s3 + $0x38] sm:$0xff]  }
 0x11c   : > { %v1180_v51 = vpop.xlane.xlu0 %1179  ;;  %v1668_v24 = vmul.f32 0.00390625, %v1220_v57  ;;  %v2074_v9 = vunpack.c.l.b16 %v1810_v27  ;;  %v2702_v47 = vsel %vm2665_vm7, %v2330_v60, %v2701_v58  ;;  %v2707_v52 = vsel %vm2661_vm5, %v2354_v29, %v2706_v43  ;;  %v4000_v60 = vld [vmem:[%s5092_s3 + $0x8] sm:$0xff]  }
 0x11d   : > { %v1660_v17 = vmul.f32 0.00390625, %v1180_v51  ;;  %v2066_v2 = vunpack.c.l.b16 %v1802_v14  ;;  %v2695_v23 = vsel %vm2665_vm7, %v2298_v3, %v2694_v39  ;;  %v2714_v51 = vsel %vm2661_vm5, %v2386_v44, %v2713_v13  ;;  %v4001_v3 = vld [vmem:[%s5092_s3 + $0x10] sm:$0xff]   ;;  %v4003_v39 = vld [vmem:[%s5092_s3 + $0x20] sm:$0xff]  }
 0x11e   : > { %v1796_v37 = vpack.c.bf16 %v1668_v24, %v1668_v24  ;;  %v2390_v42 = vrot.slane %v2074_v9, %v4316_v41  ;;  %v3999_v24 = vld [vmem:[%s5092_s3] sm:$0xff]  }
 0x11f   : > { %v1788_v16 = vpack.c.bf16 %v1660_v17, %v1660_v17  ;;  %v1295_v56 = vpop.xlane.xlu1 %1294  ;;  %v2358_v63 = vrot.slane %v2066_v2, %v4316_v41  ;;  %3925 = vmatprep.subr.bf16.mxu0 %v3999_v24  ;;  %3957 = vmatprep.subr.bf16.mxu1 %v3999_v24 }
 0x120   : > { %v1255_v40 = vpop.xlane.xlu0 %1254  ;;  %v1683_v50 = vmul.f32 0.00390625, %v1295_v56  ;;  %v2060_v55 = vunpack.c.l.b16 %v1796_v37  ;;  %v2715_v31 = vsel %vm2663_vm6, %v2390_v42, %v2714_v51  ;;  %3926 = vmatpush3.bf16.msra.mxu0 %v3999_v24  ;;  %3965 = vmatpush3.bf16.msra.mxu1 %v3999_v24  ;;  %v4002_v56 = vld [vmem:[%s5092_s3 + $0x18] sm:$0xff]  }
 0x121   : > { %v1675_v33 = vmul.f32 0.00390625, %v1255_v40  ;;  %v2052_v18 = vunpack.c.l.b16 %v1788_v16  ;;  %v2708_v21 = vsel %vm2663_vm6, %v2358_v63, %v2707_v52  ;;  %3927 = vmatprep.subr.bf16.mxu0 %v4000_v60  ;;  %3958 = vmatprep.subr.bf16.mxu1 %v4000_v60 }
 0x122   : > { %v1811_v32 = vpack.c.bf16 %v1683_v50, %v1683_v50  ;;  %v2334_v11 = vrot.slane %v2060_v55, %v4316_v41 }
 0x123   : > { %v1803_v8 = vpack.c.bf16 %v1675_v33, %v1675_v33  ;;  %v2302_v12 = vrot.slane %v2052_v18, %v4316_v41  ;;  %v1300_v4 = vpop.xlane.xlu1 %1299  ;;  %v4004_v33 = vld [vmem:[%s5092_s3 + $0x28] sm:$0xff]  }
 0x124   : > { %v1260_v0 = vpop.xlane.xlu0 %1259  ;;  %v2075_v7 = vunpack.c.l.b16 %v1811_v32  ;;  %v1684_v62 = vmul.f32 0.00390625, %v1300_v4  ;;  %v2703_v1 = vsel %vm2667_vm8, %v2334_v11, %v2702_v47  ;;  %3928 = vmatpush3.bf16.msra.mxu0 %v4000_v60  ;;  %3966 = vmatpush3.bf16.msra.mxu1 %v4000_v60 }
 0x125   : > { %v2067_v20 = vunpack.c.l.b16 %v1803_v8  ;;  %v1676_v45 = vmul.f32 0.00390625, %v1260_v0  ;;  %v2696_v49 = vsel %vm2667_vm8, %v2302_v12, %v2695_v23  ;;  %3929 = vmatprep.subr.bf16.mxu0 %v4001_v3  ;;  %3959 = vmatprep.subr.bf16.mxu1 %v4001_v3  ;;  %v4005_v0 = vld [vmem:[%s5092_s3 + $0x30] sm:$0xff]  }
 0x126   : > { %v1812_v46 = vpack.c.bf16 %v1684_v62, %v1684_v62  ;;  %v2394_v15 = vrot.slane %v2075_v7, %v4316_v41  ;;  %v2776_v10 = vpack.c.b16 %v2703_v1, %v2696_v49 }
 0x127   : > { %v1804_v26 = vpack.c.bf16 %v1676_v45, %v1676_v45  ;;  %v2362_v53 = vrot.slane %v2067_v20, %v4316_v41  ;;  %v1310_v34 = vpop.xlane.xlu1 %1309 }
 0x128   : > { %v1305_v22 = vpop.xlane.xlu0 %1304  ;;  %v2076_v54 = vunpack.c.l.b16 %v1812_v46  ;;  %3913 = vmatprep.mubr.msk.bf16.mxu0 %vm2782_vm9, %v2776_v10  ;;  %v2716_v35 = vsel %vm2665_vm7, %v2394_v15, %v2715_v31  ;;  %3930 = vmatpush3.bf16.msra.mxu0 %v4001_v3  ;;  %v1686_v6 = vmul.f32 0.00390625, %v1310_v34 }
 0x129   : > { %v2068_v57 = vunpack.c.l.b16 %v1804_v26  ;;  %v2709_v36 = vsel %vm2665_vm7, %v2362_v53, %v2708_v21  ;;  %3931 = vmatprep.subr.bf16.mxu0 %v4002_v56  ;;  %3967 = vmatpush3.bf16.msra.mxu1 %v4001_v3  ;;  %v1685_v55 = vmul.f32 0.00390625, %v1305_v22 }
 0x12a   : > { %v2398_v5 = vrot.slane %v2076_v54, %v4316_v41  ;;  %3960 = vmatprep.subr.bf16.mxu1 %v4002_v56  ;;  %v1814_v47 = vpack.c.bf16 %v1686_v6, %v1686_v6 }
 0x12b   : > { %v2366_v61 = vrot.slane %v2068_v57, %v4316_v41  ;;  %v1350_v48 = vpop.xlane.xlu1 %1349  ;;  %v1813_v23 = vpack.c.bf16 %v1685_v55, %v1685_v55 }
 0x12c   : > { %v1345_v19 = vpop.xlane.xlu0 %1344  ;;  %v2717_v17 = vsel %vm2667_vm8, %v2398_v5, %v2716_v35  ;;  %3932 = vmatpush3.bf16.msra.mxu0 %v4002_v56  ;;  %v1694_v18 = vmul.f32 0.00390625, %v1350_v48  ;;  %v2078_v45 = vunpack.c.l.b16 %v1814_v47 }
 0x12d   : > { %v2710_v30 = vsel %vm2667_vm8, %v2366_v61, %v2709_v36  ;;  %3933 = vmatprep.subr.bf16.mxu0 %v4003_v39  ;;  %3968 = vmatpush3.bf16.msra.mxu1 %v4002_v56  ;;  %v1693_v9 = vmul.f32 0.00390625, %v1345_v19  ;;  %v2077_v44 = vunpack.c.l.b16 %v1813_v23 }
 0x12e   : > { %v2777_v59 = vpack.c.b16 %v2717_v17, %v2710_v30  ;;  %3961 = vmatprep.subr.bf16.mxu1 %v4003_v39  ;;  %v1822_v11 = vpack.c.bf16 %v1694_v18, %v1694_v18  ;;  %v2406_v13 = vrot.slane %v2078_v45, %v4316_v41 }
 0x12f   : > { %v1355_v27 = vpop.xlane.xlu1 %1354  ;;  %v1821_v12 = vpack.c.bf16 %v1693_v9, %v1693_v9  ;;  %v2402_v43 = vrot.slane %v2077_v44, %v4316_v41 }
 0x130   : > { %3914 = vmatmul.mubr.msk.bf16.gmra.mrb[4].mxu0 %vm2782_vm9, %v2777_v59  ;;  %v1315_v14 = vpop.xlane.xlu0 %1314  ;;  %v1695_v8 = vmul.f32 0.00390625, %v1355_v27  ;;  %v2086_v49 = vunpack.c.l.b16 %v1822_v11 }
 0x131   : > { %3934 = vmatpush3.bf16.msra.mxu0 %v4003_v39  ;;  %3969 = vmatpush3.bf16.msra.mxu1 %v4003_v39  ;;  %v1687_v7 = vmul.f32 0.00390625, %v1315_v14  ;;  %v2085_v42 = vunpack.c.l.b16 %v1821_v12  ;;  %v2718_v30 = vsel %vm2655_vm2, %v2406_v13, %v2402_v43 }
 0x132   : > { %3935 = vmatprep.subr.bf16.mxu0 %v4004_v33  ;;  %3962 = vmatprep.subr.bf16.mxu1 %v4004_v33  ;;  %v1823_v62 = vpack.c.bf16 %v1695_v8, %v1695_v8  ;;  %v2438_v51 = vrot.slane %v2086_v49, %v4316_v41 }
 0x133   : > { %v1390_v37 = vpop.xlane.xlu1 %1389  ;;  %v1815_v15 = vpack.c.bf16 %v1687_v7, %v1687_v7  ;;  %v2434_v52 = vrot.slane %v2085_v42, %v4316_v41 }
 0x134   : > { %v1385_v16 = vpop.xlane.xlu0 %1384  ;;  %v1702_v29 = vmul.f32 0.00390625, %v1390_v37  ;;  %v2087_v10 = vunpack.c.l.b16 %v1823_v62 }
 0x135   : > { %3936 = vmatpush3.bf16.msra.mxu0 %v4004_v33  ;;  %3970 = vmatpush3.bf16.msra.mxu1 %v4004_v33  ;;  %v1701_v1 = vmul.f32 0.00390625, %v1385_v16  ;;  %v2079_v61 = vunpack.c.l.b16 %v1815_v15  ;;  %v2725_v60 = vsel %vm2655_vm2, %v2438_v51, %v2434_v52 }
 0x136   : > { %3937 = vmatprep.subr.bf16.mxu0 %v4005_v0  ;;  %3963 = vmatprep.subr.bf16.mxu1 %v4005_v0  ;;  %v1830_v54 = vpack.c.bf16 %v1702_v29, %v1702_v29  ;;  %v2442_v19 = vrot.slane %v2087_v10, %v4316_v41 }
 0x137   : > { %v1430_v40 = vpop.xlane.xlu1 %1429  ;;  %v1829_v57 = vpack.c.bf16 %v1701_v1, %v1701_v1 }
 0x138   : > { %v1425_v58 = vpop.xlane.xlu0 %1424  ;;  %v1710_v63 = vmul.f32 0.00390625, %v1430_v40  ;;  %v2094_v59 = vunpack.c.l.b16 %v1830_v54  ;;  %v2410_v40 = vrot.slane %v2079_v61, %v4316_v41 }
 0x139   : > { %3938 = vmatpush3.bf16.msra.mxu0 %v4005_v0  ;;  %v1709_v46 = vmul.f32 0.00390625, %v1425_v58  ;;  %3971 = vmatpush3.bf16.msra.mxu1 %v4005_v0  ;;  %v2093_v27 = vunpack.c.l.b16 %v1829_v57 }
 0x13a   : > { %3939 = vmatprep.subr.bf16.mxu0 %v4006_v38  ;;  %3964 = vmatprep.subr.bf16.mxu1 %v4006_v38  ;;  %v1838_v31 = vpack.c.bf16 %v1710_v63, %v1710_v63  ;;  %v2470_v9 = vrot.slane %v2094_v59, %v4316_v41  ;;  %v2719_v42 = vsel %vm2657_vm3, %v2410_v40, %v2718_v30 }
 0x13b   : > { %v1360_v50 = vpop.xlane.xlu1 %1359  ;;  %v1837_v21 = vpack.c.bf16 %v1709_v46, %v1709_v46 }
 0x13c   : > { %v1320_v28 = vpop.xlane.xlu0 %1319  ;;  %v1696_v53 = vmul.f32 0.00390625, %v1360_v50  ;;  %v2102_v3 = vunpack.c.l.b16 %v1838_v31 }
 0x13d   : > { %v1688_v22 = vmul.f32 0.00390625, %v1320_v28  ;;  %3940 = vmatpush3.bf16.msra.mxu0 %v4006_v38  ;;  %3972 = vmatpush3.bf16.msra.mxu1 %v4006_v38  ;;  %v2101_v37 = vunpack.c.l.b16 %v1837_v21  ;;  %v2726_v28 = vsel %vm2657_vm3, %v2442_v19, %v2725_v60 }
 0x13e   : > { %v1824_v35 = vpack.c.bf16 %v1696_v53, %v1696_v53 }
 0x13f   : > { %v1435_v2 = vpop.xlane.xlu1 %1434  ;;  %v1816_v24 = vpack.c.bf16 %v1688_v22, %v1688_v22  ;;  %v2498_v23 = vrot.slane %v2101_v37, %v4316_v41 }
 0x140   : > { %v1395_v32 = vpop.xlane.xlu0 %1394  ;;  %v1711_v14 = vmul.f32 0.00390625, %v1435_v2  ;;  %v2088_v58 = vunpack.c.l.b16 %v1824_v35  ;;  %v2466_v2 = vrot.slane %v2093_v27, %v4316_v41 }
 0x141   : > { %v1703_v16 = vmul.f32 0.00390625, %v1395_v32  ;;  %v2080_v6 = vunpack.c.l.b16 %v1816_v24  ;;  %v2502_v32 = vrot.slane %v2102_v3, %v4316_v41 }
 0x142   : > { %v1839_v8 = vpack.c.bf16 %v1711_v14, %v1711_v14  ;;  %v2446_v0 = vrot.slane %v2088_v58, %v4316_v41  ;;  %v4880_v63 = vsel %vm2655_vm2, %v2470_v9, %v2466_v2 }
 0x143   : > { %v1365_v4 = vpop.xlane.xlu1 %1364  ;;  %v1831_v11 = vpack.c.bf16 %v1703_v16, %v1703_v16  ;;  %v2414_v44 = vrot.slane %v2080_v6, %v4316_v41  ;;  %v4885_v38 = vsel %vm2655_vm2, %v2502_v32, %v2498_v23 }
 0x144   : > { %v1325_v20 = vpop.xlane.xlu0 %1324  ;;  %v1697_v36 = vmul.f32 0.00390625, %v1365_v4  ;;  %v4882_v46 = vunpack.c.l.b16 %v1839_v8  ;;  %v2727_v22 = vsel %vm2659_vm4, %v2446_v0, %v2726_v28 }
 0x145   : > { %v1689_v17 = vmul.f32 0.00390625, %v1325_v20  ;;  %v4887_v15 = vunpack.c.l.b16 %v1831_v11  ;;  %v2720_v51 = vsel %vm2659_vm4, %v2414_v44, %v2719_v42 }
 0x146   : > { %v1825_v39 = vpack.c.bf16 %v1697_v36, %v1697_v36 }
 0x147   : > { %v1440_v26 = vpop.xlane.xlu1 %1439  ;;  %v1817_v55 = vpack.c.bf16 %v1689_v17, %v1689_v17 }
 0x148   : > { %v1400_v34 = vpop.xlane.xlu0 %1399  ;;  %v1712_v47 = vmul.f32 0.00390625, %v1440_v26  ;;  %v2089_v7 = vunpack.c.l.b16 %v1825_v39 }
 0x149   : > { %v1704_v12 = vmul.f32 0.00390625, %v1400_v34  ;;  %v2081_v29 = vunpack.c.l.b16 %v1817_v55 }
 0x14a   : > { %v1840_v26 = vpack.c.bf16 %v1712_v47, %v1712_v47  ;;  %v2450_v13 = vrot.slane %v2089_v7, %v4316_v41 }
 0x14b   : > { %v1370_v5 = vpop.xlane.xlu1 %1369  ;;  %v1832_v53 = vpack.c.bf16 %v1704_v12, %v1704_v12  ;;  %v2418_v52 = vrot.slane %v2081_v29, %v4316_v41 }
 0x14c   : > { %v1330_v48 = vpop.xlane.xlu0 %1329  ;;  %v1698_v50 = vmul.f32 0.00390625, %v1370_v5  ;;  %v2506_v5 = vrot.slane %v4882_v46, %v4316_v41  ;;  %v4895_v61 = vunpack.c.l.b16 %v1840_v26  ;;  %v2728_v59 = vsel %vm2661_vm5, %v2450_v13, %v2727_v22 }
 0x14d   : > { %v1690_v18 = vmul.f32 0.00390625, %v1330_v48  ;;  %v2474_v48 = vrot.slane %v4887_v15, %v4316_v41  ;;  %v4899_v19 = vunpack.c.l.b16 %v1832_v53  ;;  %v2721_v37 = vsel %vm2661_vm5, %v2418_v52, %v2720_v51 }
 0x14e   : > { %v1826_v20 = vpack.c.bf16 %v1698_v50, %v1698_v50  ;;  %v2510_v58 = vrot.slane %v4895_v61, %v4316_v41 }
 0x14f   : > { %v1445_v56 = vpop.xlane.xlu1 %1444  ;;  %v1818_v1 = vpack.c.bf16 %v1690_v18, %v1690_v18  ;;  %v2478_v28 = vrot.slane %v4899_v19, %v4316_v41  ;;  %v2733_v19 = vsel %vm2657_vm3, %v2474_v48, %v4880_v63 }
 0x150   : > { %v1405_v33 = vpop.xlane.xlu0 %1404  ;;  %v2090_v43 = vunpack.c.l.b16 %v1826_v20  ;;  %v1713_v21 = vmul.f32 0.00390625, %v1445_v56 }
 0x151   : > { %v2082_v31 = vunpack.c.l.b16 %v1818_v1  ;;  %v1705_v35 = vmul.f32 0.00390625, %v1405_v33 }
 0x152   : > { %v2454_v27 = vrot.slane %v2090_v43, %v4316_v41  ;;  %v1841_v56 = vpack.c.bf16 %v1713_v21, %v1713_v21 }
 0x153   : > { %v1375_v4 = vpop.xlane.xlu1 %1374  ;;  %v2422_v16 = vrot.slane %v2082_v31, %v4316_v41  ;;  %v1833_v39 = vpack.c.bf16 %v1705_v35, %v1705_v35  ;;  %v2740_v31 = vsel %vm2657_vm3, %v2506_v5, %v4885_v38 }
 0x154   : > { %v1699_v62 = vmul.f32 0.00390625, %v1375_v4  ;;  %v1335_v45 = vpop.xlane.xlu0 %1334  ;;  %v2729_v2 = vsel %vm2663_vm6, %v2454_v27, %v2728_v59  ;;  %v2105_v12 = vunpack.c.l.b16 %v1841_v56  ;;  %v2734_v27 = vsel %vm2659_vm4, %v2478_v28, %v2733_v19 }
 0x155   : > { %v1691_v49 = vmul.f32 0.00390625, %v1335_v45  ;;  %v2722_v11 = vsel %vm2663_vm6, %v2422_v16, %v2721_v37  ;;  %v2097_v7 = vunpack.c.l.b16 %v1833_v39 }
 0x156   : > { %v1827_v34 = vpack.c.bf16 %v1699_v62, %v1699_v62 }
 0x157   : > { %v1450_v10 = vpop.xlane.xlu1 %1449  ;;  %v1819_v54 = vpack.c.bf16 %v1691_v49, %v1691_v49 }
 0x158   : > { %v1410_v57 = vpop.xlane.xlu0 %1409  ;;  %v1714_v36 = vmul.f32 0.00390625, %v1450_v10  ;;  %v2091_v24 = vunpack.c.l.b16 %v1827_v34  ;;  %v2514_v10 = vrot.slane %v2105_v12, %v4316_v41 }
 0x159   : > { %v1706_v17 = vmul.f32 0.00390625, %v1410_v57  ;;  %v2083_v14 = vunpack.c.l.b16 %v1819_v54  ;;  %v2482_v54 = vrot.slane %v2097_v7, %v4316_v41 }
 0x15a   : > { %v1842_v50 = vpack.c.bf16 %v1714_v36, %v1714_v36  ;;  %v2458_v6 = vrot.slane %v2091_v24, %v4316_v41  ;;  %v2741_v24 = vsel %vm2659_vm4, %v2510_v58, %v2740_v31 }
 0x15b   : > { %v1380_v30 = vpop.xlane.xlu1 %1379  ;;  %v1834_v55 = vpack.c.bf16 %v1706_v17, %v1706_v17  ;;  %v2426_v8 = vrot.slane %v2083_v14, %v4316_v41  ;;  %v2742_v38 = vsel %vm2661_vm5, %v2514_v10, %v2741_v24  ;;  %v2735_v14 = vsel %vm2661_vm5, %v2482_v54, %v2734_v27 }
 0x15c   : > { %v1700_v60 = vmul.f32 0.00390625, %v1380_v30  ;;  %v1340_v3 = vpop.xlane.xlu0 %1339  ;;  %v2106_v20 = vunpack.c.l.b16 %v1842_v50  ;;  %v2730_v44 = vsel %vm2665_vm7, %v2458_v6, %v2729_v2 }
 0x15d   : > { %v1692_v40 = vmul.f32 0.00390625, %v1340_v3  ;;  %v2098_v29 = vunpack.c.l.b16 %v1834_v55  ;;  %v2723_v46 = vsel %vm2665_vm7, %v2426_v8, %v2722_v11 }
 0x15e   : > { %v1828_v33 = vpack.c.bf16 %v1700_v60, %v1700_v60  ;;  %v2518_v57 = vrot.slane %v2106_v20, %v4316_v41 }
 0x15f   : > { %v1820_v18 = vpack.c.bf16 %v1692_v40, %v1692_v40  ;;  %v1455_v9 = vpop.xlane.xlu1 %1454  ;;  %v2486_v21 = vrot.slane %v2098_v29, %v4316_v41 }
 0x160   : > { %v2092_v47 = vunpack.c.l.b16 %v1828_v33  ;;  %v1715_v32 = vmul.f32 0.00390625, %v1455_v9  ;;  %v1415_v23 = vpop.xlane.xlu0 %1414  ;;  %v2743_v60 = vsel %vm2663_vm6, %v2518_v57, %v2742_v38 }
 0x161   : > { %v2084_v4 = vunpack.c.l.b16 %v1820_v18  ;;  %v1707_v0 = vmul.f32 0.00390625, %v1415_v23  ;;  %v2736_v63 = vsel %vm2663_vm6, %v2486_v21, %v2735_v14 }
 0x162   : > { %v2462_v62 = vrot.slane %v2092_v47, %v4316_v41  ;;  %v1843_v45 = vpack.c.bf16 %v1715_v32, %v1715_v32 }
 0x163   : > { %v2430_v1 = vrot.slane %v2084_v4, %v4316_v41  ;;  %v1835_v49 = vpack.c.bf16 %v1707_v0, %v1707_v0  ;;  %v1460_v42 = vpop.xlane.xlu1 %1459 }
 0x164   : > { %v2731_v26 = vsel %vm2667_vm8, %v2462_v62, %v2730_v44  ;;  %v2107_v15 = vunpack.c.l.b16 %v1843_v45  ;;  %v1716_v53 = vmul.f32 0.00390625, %v1460_v42  ;;  %v1420_v34 = vpop.xlane.xlu0 %1419 }
 0x165   : > { %v2724_v22 = vsel %vm2667_vm8, %v2430_v1, %v2723_v46  ;;  %v2099_v13 = vunpack.c.l.b16 %v1835_v49  ;;  %v1708_v43 = vmul.f32 0.00390625, %v1420_v34 }
 0x166   : > { %v1844_v51 = vpack.c.bf16 %v1716_v53, %v1716_v53  ;;  %v2778_v52 = vpack.c.b16 %v2731_v26, %v2724_v22  ;;  %v2522_v61 = vrot.slane %v2107_v15, %v4316_v41 }
 0x167   : > { %v1836_v35 = vpack.c.bf16 %v1708_v43, %v1708_v43  ;;  %v1470_v36 = vpop.xlane.xlu1 %1469  ;;  %v2490_v17 = vrot.slane %v2099_v13, %v4316_v41 }
 0x168   : > { %v2108_v30 = vunpack.c.l.b16 %v1844_v51  ;;  %3917 = vmatprep.mubr.msk.bf16.mxu0 %vm2782_vm9, %v2778_v52  ;;  %v1465_v59 = vpop.xlane.xlu0 %1464  ;;  %v2744_v48 = vsel %vm2665_vm7, %v2522_v61, %v2743_v60  ;;  %v1718_v47 = vmul.f32 0.00390625, %v1470_v36 }
 0x169   : > { %v2100_v5 = vunpack.c.l.b16 %v1836_v35  ;;  %v2737_v56 = vsel %vm2665_vm7, %v2490_v17, %v2736_v63  ;;  %v1717_v32 = vmul.f32 0.00390625, %v1465_v59 }
 0x16a   : > { %v2526_v3 = vrot.slane %v2108_v30, %v4316_v41  ;;  %v1846_v7 = vpack.c.bf16 %v1718_v47, %v1718_v47 }
 0x16b   : > { %v2494_v37 = vrot.slane %v2100_v5, %v4316_v41  ;;  %v1510_v16 = vpop.xlane.xlu1 %1509  ;;  %v1845_v20 = vpack.c.bf16 %v1717_v32, %v1717_v32 }
 0x16c   : > { %v2745_v40 = vsel %vm2667_vm8, %v2526_v3, %v2744_v48  ;;  %v1505_v58 = vpop.xlane.xlu0 %1504  ;;  %v1726_v23 = vmul.f32 0.00390625, %v1510_v16  ;;  %v2110_v42 = vunpack.c.l.b16 %v1846_v7 }
 0x16d   : > { %v2738_v39 = vsel %vm2667_vm8, %v2494_v37, %v2737_v56  ;;  %v1725_v11 = vmul.f32 0.00390625, %v1505_v58  ;;  %v2109_v46 = vunpack.c.l.b16 %v1845_v20 }
 0x16e   : > { %v2779_v50 = vpack.c.b16 %v2745_v40, %v2738_v39  ;;  %v1854_v62 = vpack.c.bf16 %v1726_v23, %v1726_v23  ;;  %v2534_v31 = vrot.slane %v2110_v42, %v4316_v41 }
 0x16f   : > { %v1515_v33 = vpop.xlane.xlu1 %1514  ;;  %v1853_v45 = vpack.c.bf16 %v1725_v11, %v1725_v11  ;;  %v2530_v21 = vrot.slane %v2109_v46, %v4316_v41 }
 0x170   : > { %3918 = vmatmul.mubr.msk.bf16.gmra.mrb[8].mxu0 %vm2782_vm9, %v2779_v50  ;;  %v1475_v28 = vpop.xlane.xlu0 %1474  ;;  %v1727_v0 = vmul.f32 0.00390625, %v1515_v33  ;;  %v2118_v53 = vunpack.c.l.b16 %v1854_v62 }
 0x171   : > { %v1719_v29 = vmul.f32 0.00390625, %v1475_v28  ;;  %v2117_v34 = vunpack.c.l.b16 %v1853_v45  ;;  %v2746_v63 = vsel %vm2655_vm2, %v2534_v31, %v2530_v21 }
 0x172   : > { %v1855_v49 = vpack.c.bf16 %v1727_v0, %v1727_v0  ;;  %v2566_v36 = vrot.slane %v2118_v53, %v4316_v41 }
 0x173   : > { %v1550_v6 = vpop.xlane.xlu1 %1549  ;;  %v1847_v43 = vpack.c.bf16 %v1719_v29, %v1719_v29  ;;  %v2562_v19 = vrot.slane %v2117_v34, %v4316_v41 }
 0x174   : > { %v1545_v55 = vpop.xlane.xlu0 %1544  ;;  %v1734_v26 = vmul.f32 0.00390625, %v1550_v6  ;;  %v2119_v51 = vunpack.c.l.b16 %v1855_v49 }
 0x175   : > { %v1733_v15 = vmul.f32 0.00390625, %v1545_v55  ;;  %v2111_v59 = vunpack.c.l.b16 %v1847_v43  ;;  %v2753_v56 = vsel %vm2655_vm2, %v2566_v36, %v2562_v19 }
 0x176   : > { %v1862_v61 = vpack.c.bf16 %v1734_v26, %v1734_v26  ;;  %v2570_v14 = vrot.slane %v2119_v51, %v4316_v41 }
 0x177   : > { %v1590_v18 = vpop.xlane.xlu1 %1589  ;;  %v1861_v35 = vpack.c.bf16 %v1733_v15, %v1733_v15  ;;  %v2538_v33 = vrot.slane %v2111_v59, %v4316_v41 }
 0x178   : > { %v1585_v9 = vpop.xlane.xlu0 %1584  ;;  %v1742_v10 = vmul.f32 0.00390625, %v1590_v18  ;;  %v2126_v48 = vunpack.c.l.b16 %v1862_v61 }
 0x179   : > { %v1741_v22 = vmul.f32 0.00390625, %v1585_v9  ;;  %v2125_v37 = vunpack.c.l.b16 %v1861_v35  ;;  %v2754_v9 = vsel %vm2657_vm3, %v2570_v14, %v2753_v56  ;;  %v2747_v53 = vsel %vm2657_vm3, %v2538_v33, %v2746_v63 }
 0x17a   : > { %v1870_v24 = vpack.c.bf16 %v1742_v10, %v1742_v10  ;;  %v2598_v32 = vrot.slane %v2126_v48, %v4316_v41 }
 0x17b   : > { %v1520_v2 = vpop.xlane.xlu1 %1519  ;;  %v1869_v17 = vpack.c.bf16 %v1741_v22, %v1741_v22  ;;  %v2594_v23 = vrot.slane %v2125_v37, %v4316_v41 }
 0x17c   : > { %v1480_v8 = vpop.xlane.xlu0 %1479  ;;  %v1728_v54 = vmul.f32 0.00390625, %v1520_v2  ;;  %v2134_v40 = vunpack.c.l.b16 %v1870_v24 }
 0x17d   : > { %v1720_v52 = vmul.f32 0.00390625, %v1480_v8  ;;  %v2133_v58 = vunpack.c.l.b16 %v1869_v17  ;;  %v4960_v34 = vsel %vm2655_vm2, %v2598_v32, %v2594_v23 }
 0x17e   : > { %v1856_v27 = vpack.c.bf16 %v1728_v54, %v1728_v54 }
 0x17f   : > { %v1595_v12 = vpop.xlane.xlu1 %1594  ;;  %v1848_v60 = vpack.c.bf16 %v1720_v52, %v1720_v52  ;;  %v2626_v0 = vrot.slane %v2133_v58, %v4316_v41 }
 0x180   : > { %v1555_v4 = vpop.xlane.xlu0 %1554  ;;  %v1743_v16 = vmul.f32 0.00390625, %v1595_v12  ;;  %v2120_v28 = vunpack.c.l.b16 %v1856_v27 }
 0x181   : > { %v1735_v39 = vmul.f32 0.00390625, %v1555_v4  ;;  %v2112_v2 = vunpack.c.l.b16 %v1848_v60  ;;  %v2630_v4 = vrot.slane %v2134_v40, %v4316_v41 }
 0x182   : > { %v1871_v11 = vpack.c.bf16 %v1743_v16, %v1743_v16  ;;  %v2574_v45 = vrot.slane %v2120_v28, %v4316_v41 }
 0x183   : > { %v1525_v44 = vpop.xlane.xlu1 %1524  ;;  %v1863_v7 = vpack.c.bf16 %v1735_v39, %v1735_v39  ;;  %v2542_v42 = vrot.slane %v2112_v2, %v4316_v41 }
 0x184   : > { %v1485_v1 = vpop.xlane.xlu0 %1484  ;;  %v1729_v38 = vmul.f32 0.00390625, %v1525_v44  ;;  %v4962_v10 = vunpack.c.l.b16 %v1871_v11  ;;  %v2755_v52 = vsel %vm2659_vm4, %v2574_v45, %v2754_v9 }
 0x185   : > { %v1721_v3 = vmul.f32 0.00390625, %v1485_v1  ;;  %v4967_v43 = vunpack.c.l.b16 %v1863_v7  ;;  %v2748_v36 = vsel %vm2659_vm4, %v2542_v42, %v2747_v53 }
 0x186   : > { %v1857_v6 = vpack.c.bf16 %v1729_v38, %v1729_v38 }
 0x187   : > { %v1600_v13 = vpop.xlane.xlu1 %1599  ;;  %v1849_v8 = vpack.c.bf16 %v1721_v3, %v1721_v3 }
 0x188   : > { %v1560_v57 = vpop.xlane.xlu0 %1559  ;;  %v1744_v12 = vmul.f32 0.00390625, %v1600_v13  ;;  %v2121_v44 = vunpack.c.l.b16 %v1857_v6  ;;  %v4965_v13 = vsel %vm2655_vm2, %v2630_v4, %v2626_v0 }
 0x189   : > { %v1736_v20 = vmul.f32 0.00390625, %v1560_v57  ;;  %v2113_v46 = vunpack.c.l.b16 %v1849_v8 }
 0x18a   : > { %v1872_v22 = vpack.c.bf16 %v1744_v12, %v1744_v12  ;;  %v2578_v31 = vrot.slane %v2121_v44, %v4316_v41 }
 0x18b   : > { %v1530_v30 = vpop.xlane.xlu1 %1529  ;;  %v1864_v54 = vpack.c.bf16 %v1736_v20, %v1736_v20  ;;  %v2546_v19 = vrot.slane %v2113_v46, %v4316_v41 }
 0x18c   : > { %v1490_v5 = vpop.xlane.xlu0 %1489  ;;  %v1730_v55 = vmul.f32 0.00390625, %v1530_v30  ;;  %v2634_v30 = vrot.slane %v4962_v10, %v4316_v41  ;;  %v4975_v59 = vunpack.c.l.b16 %v1872_v22  ;;  %v2756_v48 = vsel %vm2661_vm5, %v2578_v31, %v2755_v52 }
 0x18d   : > { %v1722_v47 = vmul.f32 0.00390625, %v1490_v5  ;;  %v2602_v5 = vrot.slane %v4967_v43, %v4316_v41  ;;  %v4979_v14 = vunpack.c.l.b16 %v1864_v54  ;;  %v2749_v58 = vsel %vm2661_vm5, %v2546_v19, %v2748_v36 }
 0x18e   : > { %v1858_v29 = vpack.c.bf16 %v1730_v55, %v1730_v55  ;;  %v2638_v28 = vrot.slane %v4975_v59, %v4316_v41 }
 0x18f   : > { %v1605_v50 = vpop.xlane.xlu1 %1604  ;;  %v1850_v26 = vpack.c.bf16 %v1722_v47, %v1722_v47  ;;  %v2606_v9 = vrot.slane %v4979_v14, %v4316_v41 }
 0x190   : > { %v1565_v18 = vpop.xlane.xlu0 %1564  ;;  %v2122_v21 = vunpack.c.l.b16 %v1858_v29  ;;  %v1745_v17 = vmul.f32 0.00390625, %v1605_v50 }
 0x191   : > { %v2114_v24 = vunpack.c.l.b16 %v1850_v26  ;;  %v1737_v27 = vmul.f32 0.00390625, %v1565_v18 }
 0x192   : > { %v2582_v37 = vrot.slane %v2122_v21, %v4316_v41  ;;  %v1873_v50 = vpack.c.bf16 %v1745_v17, %v1745_v17 }
 0x193   : > { %v1535_v62 = vpop.xlane.xlu1 %1534  ;;  %v2550_v39 = vrot.slane %v2114_v24, %v4316_v41  ;;  %v1865_v6 = vpack.c.bf16 %v1737_v27, %v1737_v27  ;;  %v2768_v24 = vsel %vm2657_vm3, %v2634_v30, %v4965_v13 }
 0x194   : > { %v1731_v1 = vmul.f32 0.00390625, %v1535_v62  ;;  %v1495_v49 = vpop.xlane.xlu0 %1494  ;;  %v2757_v23 = vsel %vm2663_vm6, %v2582_v37, %v2756_v48  ;;  %v2137_v20 = vunpack.c.l.b16 %v1873_v50  ;;  %v2769_v14 = vsel %vm2659_vm4, %v2638_v28, %v2768_v24  ;;  %v3463_v28 = vld [vmem:[%s5091_s2] ss:$0 sm:$0xff] }
 0x195   : > { %v1723_v15 = vmul.f32 0.00390625, %v1495_v49  ;;  %v2750_v7 = vsel %vm2663_vm6, %v2550_v39, %v2749_v58  ;;  %v2129_v44 = vunpack.c.l.b16 %v1865_v6  ;;  %v5044_v24 = vld [vmem:[%s5093_s4] ss:$0 sm:$0xff] }
 0x196   : > { %v1859_v57 = vpack.c.bf16 %v1731_v1, %v1731_v1 }
 0x197   : > { %v1610_v51 = vpop.xlane.xlu1 %1609  ;;  %v1851_v61 = vpack.c.bf16 %v1723_v15, %v1723_v15 }
 0x198   : > { %v1570_v35 = vpop.xlane.xlu0 %1569  ;;  %v1746_v38 = vmul.f32 0.00390625, %v1610_v51  ;;  %v2123_v60 = vunpack.c.l.b16 %v1859_v57  ;;  %v2642_v51 = vrot.slane %v2137_v20, %v4316_v41 }
 0x199   : > { %v1738_v3 = vmul.f32 0.00390625, %v1570_v35  ;;  %v2115_v16 = vunpack.c.l.b16 %v1851_v61  ;;  %v2610_v61 = vrot.slane %v2129_v44, %v4316_v41 }
 0x19a   : > { %v1874_v55 = vpack.c.bf16 %v1746_v38, %v1746_v38  ;;  %v2586_v2 = vrot.slane %v2123_v60, %v4316_v41  ;;  %v2761_v38 = vsel %vm2657_vm3, %v2602_v5, %v4960_v34  ;;  %v2770_v48 = vsel %vm2661_vm5, %v2642_v51, %v2769_v14 }
 0x19b   : > { %v1540_v63 = vpop.xlane.xlu1 %1539  ;;  %v1866_v8 = vpack.c.bf16 %v1738_v3, %v1738_v3  ;;  %v2554_v11 = vrot.slane %v2115_v16, %v4316_v41 }
 0x19c   : > { %v1732_v56 = vmul.f32 0.00390625, %v1540_v63  ;;  %v1500_v40 = vpop.xlane.xlu0 %1499  ;;  %v2138_v29 = vunpack.c.l.b16 %v1874_v55  ;;  %v2758_v42 = vsel %vm2665_vm7, %v2586_v2, %v2757_v23  ;;  %v2762_v63 = vsel %vm2659_vm4, %v2606_v9, %v2761_v38 }
 0x19d   : > { %v1724_v33 = vmul.f32 0.00390625, %v1500_v40  ;;  %v2130_v46 = vunpack.c.l.b16 %v1866_v8  ;;  %v2751_v10 = vsel %vm2665_vm7, %v2554_v11, %v2750_v7  ;;  %v2763_v30 = vsel %vm2661_vm5, %v2610_v61, %v2762_v63 }
 0x19e   : > { %v1860_v18 = vpack.c.bf16 %v1732_v56, %v1732_v56  ;;  %v2646_v35 = vrot.slane %v2138_v29, %v4316_v41  ;;  %v4031_v29 = vmov 0.0  }
 0x19f   : > { %v1852_v47 = vpack.c.bf16 %v1724_v33, %v1724_v33  ;;  %v1615_v32 = vpop.xlane.xlu1 %1614  ;;  %v2614_v17 = vrot.slane %v2130_v46, %v4316_v41  ;;  %338 = vst [vmem:[%s5030_s14] sm:$0x1] %v4031_v29  ;;  %339 = vst [vmem:[%s5036_s17] sm:$0x1] %v4031_v29 }
 0x1a0   : > { %v2124_v12 = vunpack.c.l.b16 %v1860_v18  ;;  %v1747_v4 = vmul.f32 0.00390625, %v1615_v32  ;;  %v1575_v0 = vpop.xlane.xlu0 %1574  ;;  %v2771_v37 = vsel %vm2663_vm6, %v2646_v35, %v2770_v48 }
 0x1a1   : > { %v2116_v62 = vunpack.c.l.b16 %v1852_v47  ;;  %v1739_v45 = vmul.f32 0.00390625, %v1575_v0  ;;  %v2764_v34 = vsel %vm2663_vm6, %v2614_v17, %v2763_v30 }
 0x1a2   : > { %v2590_v1 = vrot.slane %v2124_v12, %v4316_v41  ;;  %v1875_v49 = vpack.c.bf16 %v1747_v4, %v1747_v4 }
 0x1a3   : > { %v2558_v26 = vrot.slane %v2116_v62, %v4316_v41  ;;  %v1867_v15 = vpack.c.bf16 %v1739_v45, %v1739_v45  ;;  %v1620_v53 = vpop.xlane.xlu1 %1619 }
 0x1a4   : > { %v2759_v22 = vsel %vm2667_vm8, %v2590_v1, %v2758_v42  ;;  %v2139_v43 = vunpack.c.l.b16 %v1875_v49  ;;  %v1748_v54 = vmul.f32 0.00390625, %v1620_v53  ;;  %v1580_v57 = vpop.xlane.xlu0 %1579 }
 0x1a5   : > { %v2752_v52 = vsel %vm2667_vm8, %v2558_v26, %v2751_v10  ;;  %v2131_v31 = vunpack.c.l.b16 %v1867_v15  ;;  %v1740_v21 = vmul.f32 0.00390625, %v1580_v57 }
 0x1a6   : > { %v1876_v36 = vpack.c.bf16 %v1748_v54, %v1748_v54  ;;  %v2780_v19 = vpack.c.b16 %v2759_v22, %v2752_v52  ;;  %v2650_v59 = vrot.slane %v2139_v43, %v4316_v41 }
 0x1a7   : > { %v1868_v27 = vpack.c.bf16 %v1740_v21, %v1740_v21  ;;  %v2618_v60 = vrot.slane %v2131_v31, %v4316_v41 }
 0x1a8   : > { %v2140_v3 = vunpack.c.l.b16 %v1876_v36  ;;  %3921 = vmatprep.mubr.msk.bf16.mxu0 %vm2782_vm9, %v2780_v19  ;;  %v2772_v5 = vsel %vm2665_vm7, %v2650_v59, %v2771_v37 }
 0x1a9   : > { %v2132_v13 = vunpack.c.l.b16 %v1868_v27  ;;  %v2765_v40 = vsel %vm2665_vm7, %v2618_v60, %v2764_v34 }
 0x1aa   : > { %v2654_v16 = vrot.slane %v2140_v3, %v4316_v41 }
 0x1ab   : > { %v2622_v56 = vrot.slane %v2132_v13, %v4316_v41 }
 0x1ac   : > { %v2773_v58 = vsel %vm2667_vm8, %v2654_v16, %v2772_v5 }
 0x1ad   : > { %v2766_v39 = vsel %vm2667_vm8, %v2622_v56, %v2765_v40 }
 0x1ae   : > { %v2781_v50 = vpack.c.b16 %v2773_v58, %v2766_v39 }
 0x1b0   : > { %3922 = vmatmul.mubr.msk.bf16.gmra.mrb[12].mxu0 %vm2782_vm9, %v2781_v50 }
 0x1c3   : > { %v3911_v33 = vpop.f32.mrb[0].mxu0 }
 0x1c4   : > { %v2845_v6 = vpop.f32.mrb[1].mxu0  ;;  %v2854_v18 = vadd.f32 %v3911_v33, %v3463_v28  ;;  %v3263_v33 = vld [vmem:[%s5030_s14] sm:$0x1] }
 0x1c5   : > { %v3912_v55 = vpop.f32.mrb[2].mxu0  ;;  %v2846_v41 = vadd.f32 %v3463_v28, %v2845_v6 }
 0x1c6   : > { %v2857_v9 = vadd.f32 %v3912_v55, %v3463_v28  ;;  %v2848_v2 = vpop.f32.mrb[3].mxu0  ;;  %v3287_v55 = vld [vmem:[%s5036_s17] sm:$0x1] }
 0x1c7   : > { %v2849_v8 = vadd.f32 %v3463_v28, %v2848_v2 }
 0x1c8   : > { %v2909_v47 = vpack.c.bf16 %v2857_v9, %v2854_v18 }
 0x1c9   : > { %v2908_v32 = vpack.c.bf16 %v2849_v8, %v2846_v41 }
 0x1cb   : > { %3941 = vmatprep.mubr.bf16.mxu0 %v2908_v32 }
 0x1cc   : > { %3942 = vmatmul.mubr.bf16.vlgmr.msra.gmra.mrb[16].mxu0 %v2909_v47 }
 0x203   : > { %v3915_v23 = vpop.f32.mrb[4].mxu0 }
 0x204   : > { %v2861_v11 = vpop.f32.mrb[5].mxu0  ;;  %v2870_v4 = vadd.f32 %v3915_v23, %v3463_v28 }
 0x205   : > { %v3916_v12 = vpop.f32.mrb[6].mxu0  ;;  %v2862_v20 = vadd.f32 %v3463_v28, %v2861_v11 }
 0x206   : > { %v2873_v0 = vadd.f32 %v3916_v12, %v3463_v28  ;;  %v2864_v7 = vpop.f32.mrb[7].mxu0 }
 0x207   : > { %v2865_v62 = vadd.f32 %v3463_v28, %v2864_v7 }
 0x208   : > { %v2911_v45 = vpack.c.bf16 %v2873_v0, %v2870_v4 }
 0x209   : > { %v2910_v44 = vpack.c.bf16 %v2865_v62, %v2862_v20 }
 0x20b   : > { %3945 = vmatprep.mubr.bf16.mxu1 %v2910_v44 }
 0x20c   : > { %3946 = vmatmul.mubr.bf16.vlgmr.msra.gmra.mrb[0].mxu1 %v2911_v45 }
 0x243   : > { %v3919_v1 = vpop.f32.mrb[8].mxu0 }
 0x244   : > { %v2877_v49 = vpop.f32.mrb[9].mxu0  ;;  %v2886_v46 = vadd.f32 %v3919_v1, %v3463_v28 }
 0x245   : > { %v3920_v42 = vpop.f32.mrb[10].mxu0  ;;  %v2878_v53 = vadd.f32 %v3463_v28, %v2877_v49 }
 0x246   : > { %v2889_v26 = vadd.f32 %v3920_v42, %v3463_v28  ;;  %v2880_v15 = vpop.f32.mrb[11].mxu0 }
 0x247   : > { %v2881_v10 = vadd.f32 %v3463_v28, %v2880_v15 }
 0x248   : > { %v2913_v22 = vpack.c.bf16 %v2889_v26, %v2886_v46 }
 0x249   : > { %v2912_v43 = vpack.c.bf16 %v2881_v10, %v2878_v53 }
 0x24b   : > { %3949 = vmatprep.mubr.bf16.mxu1 %v2912_v43 }
 0x24c   : > { %3950 = vmatmul.mubr.bf16.gmra.mrb[4].mxu1 %v2913_v22 }
 0x283   : > { %v3923_v54 = vpop.f32.mrb[12].mxu0 }
 0x284   : > { %v2893_v57 = vpop.f32.mrb[13].mxu0  ;;  %v2902_v52 = vadd.f32 %v3923_v54, %v3463_v28 }
 0x285   : > { %v3924_v51 = vpop.f32.mrb[14].mxu0  ;;  %v2894_v61 = vadd.f32 %v3463_v28, %v2893_v57 }
 0x286   : > { %v2905_v31 = vadd.f32 %v3924_v51, %v3463_v28  ;;  %v2896_v21 = vpop.f32.mrb[15].mxu0 }
 0x287   : > { %v2897_v35 = vadd.f32 %v3463_v28, %v2896_v21 }
 0x288   : > { %v2915_v36 = vpack.c.bf16 %v2905_v31, %v2902_v52 }
 0x289   : > { %v2914_v19 = vpack.c.bf16 %v2897_v35, %v2894_v61 }
 0x28b   : > { %3953 = vmatprep.mubr.bf16.mxu1 %v2914_v19 }
 0x28c   : > { %3954 = vmatmul.mubr.bf16.gmra.mrb[8].mxu1 %v2915_v36 }
 0x29f   : > { %v3943_v17 = vpop.f32.mrb[16].mxu0 }
 0x2a0   : > { %v3021_v59 = vpop.f32.mrb[17].mxu0  ;;  %v3030_v14 = vadd.f32 %v3943_v17, %v5044_v24 }
 0x2a1   : > { %v3022_v27 = vadd.f32 %v5044_v24, %v3021_v59  ;;  %v3944_v38 = vpop.f32.mrb[18].mxu0 }
 0x2a2   : > { %v3033_v60 = vadd.f32 %v3944_v38, %v5044_v24  ;;  %v3024_v3 = vpop.f32.mrb[19].mxu0 }
 0x2a3   : > { %v3247_v63 = vsel %vm3199_vm10, %v3022_v27, 0.0  ;;  %v3025_v25 = vadd.f32 %v5044_v24, %v3024_v3 }
 0x2a4   : > { %v3279_v48 = vrot.slane %v3247_v63, 4  ;;  %v3288_v13 = vmul.f32 %v3247_v63, %v3247_v63  ;;  %v3780_v30 = vpack.c.bf16 %v3033_v60, %v3030_v14 }
 0x2a5   : > { %v3775_v37 = vpack.c.bf16 %v3025_v25, %v3022_v27 }
 0x2a6   : > { %v3280_v16 = vadd.f32 %v3279_v48, %v3247_v63  ;;  %v3319_v34 = vrot.slane %v3288_v13, 4  ;;  %3875 = vst [vmem:[%s5053_s22 + $0x8] sm:$0xff] %v3780_v30  }
 0x2a7   : > { %3776 = vst [vmem:[%s5053_s22] sm:$0xff] %v3775_v37  }
 0x2a8   : > { %v3281_v5 = vrot.slane %v3280_v16, 2  ;;  %v3320_v56 = vadd.f32 %v3319_v34, %v3288_v13 }
 0x2aa   : > { %v3282_v40 = vadd.f32 %v3281_v5, %v3280_v16  ;;  %v3321_v58 = vrot.slane %v3320_v56, 2 }
 0x2ac   : > { %v3283_v39 = vrot.slane %v3282_v40, 1  ;;  %v3322_v50 = vadd.f32 %v3321_v58, %v3320_v56 }
 0x2ae   : > { %v3284_v28 = vadd.f32 %v3283_v39, %v3282_v40  ;;  %v3323_v6 = vrot.slane %v3322_v50, 1 }
 0x2b0   : > { %v3285_v18 = vadd.f32 %v3284_v28, %v3263_v33  ;;  %v3324_v9 = vadd.f32 %v3323_v6, %v3322_v50 }
 0x2b2   : > { %3286 = vst [vmem:[%s5030_s14] sm:$0x1] %v3285_v18  ;;  %v3325_v2 = vadd.f32 %v3324_v9, %v3287_v55 }
 0x2b4   : > { %3326 = vst [vmem:[%s5036_s17] sm:$0x1] %v3325_v2 }
 0x2df   : > { %v3947_v41 = vpop.f32.mrb[0].mxu1 }
 0x2e0   : > { %v3037_v8 = vpop.f32.mrb[1].mxu1  ;;  %v3046_v32 = vadd.f32 %v3947_v41, %v5044_v24 }
 0x2e1   : > { %v3948_v47 = vpop.f32.mrb[2].mxu1  ;;  %v3038_v12 = vadd.f32 %v5044_v24, %v3037_v8 }
 0x2e2   : > { %v3049_v23 = vadd.f32 %v3948_v47, %v5044_v24  ;;  %v3040_v11 = vpop.f32.mrb[3].mxu1 }
 0x2e3   : > { %v3041_v4 = vadd.f32 %v5044_v24, %v3040_v11 }
 0x2e4   : > { %v3790_v0 = vpack.c.bf16 %v3049_v23, %v3046_v32 }
 0x2e5   : > { %v3785_v7 = vpack.c.bf16 %v3041_v4, %v3038_v12 }
 0x2e6   : > { %3877 = vst [vmem:[%s5053_s22 + $0x18] sm:$0xff] %v3790_v0  }
 0x2e7   : > { %3876 = vst [vmem:[%s5053_s22 + $0x10] sm:$0xff] %v3785_v7  }
 0x31f   : > { %v3951_v20 = vpop.f32.mrb[4].mxu1 }
 0x320   : > { %v3053_v62 = vpop.f32.mrb[5].mxu1  ;;  %v3062_v44 = vadd.f32 %v3951_v20, %v5044_v24 }
 0x321   : > { %v3952_v45 = vpop.f32.mrb[6].mxu1  ;;  %v3054_v49 = vadd.f32 %v5044_v24, %v3053_v62 }
 0x322   : > { %v3065_v29 = vadd.f32 %v3952_v45, %v5044_v24  ;;  %v3056_v1 = vpop.f32.mrb[7].mxu1 }
 0x323   : > { %v3057_v42 = vadd.f32 %v5044_v24, %v3056_v1 }
 0x324   : > { %v3800_v46 = vpack.c.bf16 %v3065_v29, %v3062_v44 }
 0x325   : > { %v3795_v26 = vpack.c.bf16 %v3057_v42, %v3054_v49 }
 0x326   : > { %3879 = vst [vmem:[%s5053_s22 + $0x28] sm:$0xff] %v3800_v46  }
 0x327   : > { %3878 = vst [vmem:[%s5053_s22 + $0x20] sm:$0xff] %v3795_v26  }
 0x35f   : > { %v3955_v15 = vpop.f32.mrb[8].mxu1 }
 0x360   : > { %v3069_v53 = vpop.f32.mrb[9].mxu1  ;;  %v3078_v22 = vadd.f32 %v3955_v15, %v5044_v24 }
 0x361   : > { %v3956_v10 = vpop.f32.mrb[10].mxu1  ;;  %v3070_v57 = vadd.f32 %v5044_v24, %v3069_v53 }
 0x362   : > { %v3081_v43 = vadd.f32 %v3956_v10, %v5044_v24  ;;  %v3072_v54 = vpop.f32.mrb[11].mxu1 }
 0x363   : > { %v3073_v51 = vadd.f32 %v5044_v24, %v3072_v54 }
 0x364   : > { %v3810_v52 = vpack.c.bf16 %v3081_v43, %v3078_v22 }
 0x365   : > { %v3805_v31 = vpack.c.bf16 %v3073_v51, %v3070_v57 }
 0x366   : > { %3881 = vst [vmem:[%s5053_s22 + $0x38] sm:$0xff] %v3810_v52  }
 0x367   : > { %3880 = vst [vmem:[%s5053_s22 + $0x30] sm:$0xff] %v3805_v31  }
 0x368 PF: > { %s18_s26 = sadd.s32 1, %s4029_s26   ;;  %s5097_s24 = smov %s4025_s25 }
 0x369   : > { %p15_p6 = scmp.ge.s32.totalorder %s18_s26, 4   ;;  %s5098_s25 = smov %s5100_s27 }
 0x36b   :  { %17 = sbr.rel (!%p15_p6) target bundleno = 2 (0x2), region = 98 }

</bundles_post_ra>
